<compile_context>
chip_gen: v5e
topology: v5e:2x2
jax: 0.10.0
libtpu: 0.0.40
codegen_flags: <defaults>
</compile_context>

<pallas_src>
import math
import numpy as np
import jax
import jax.numpy as jnp
from jax.experimental import pallas as pl
from jax.experimental.pallas import tpu as pltpu  # noqa: F401  (TPU backend)

D_MODEL = 32
NHEAD = 4
DIM_FF = 64
NUM_LAYERS = 2
LN_EPS = 1e-5

_STACK_KEYS = ('wq', 'bq', 'wk', 'bk', 'wv', 'bv', 'wo', 'bo',
               'l1w', 'l1b', 'l2w', 'l2b',
               'n1g', 'n1b', 'n2g', 'n2b')


# ---------------------------------------------------------------------------
# small helpers
# ---------------------------------------------------------------------------
def _layer_norm(x, gamma, beta):
    mu = jnp.mean(x, axis=-1, keepdims=True)
    xc = x - mu
    var = jnp.mean(xc * xc, axis=-1, keepdims=True)
    return xc * jax.lax.rsqrt(var + LN_EPS) * gamma + beta


# ---------------------------------------------------------------------------
# fused Pallas kernel: all layers + final norm, single invocation (no grid)
# ---------------------------------------------------------------------------
def _make_encoder_kernel(S, B, D, H, L, use_norm):
    def kernel(*refs):
        (src_ref, pos_ref, hmask_ref, bmask_ref, sel_ref,
         wq_ref, bq_ref, wk_ref, bk_ref, wv_ref, bv_ref, wo_ref, bo_ref,
         l1w_ref, l1b_ref, l2w_ref, l2b_ref,
         n1g_ref, n1b_ref, n2g_ref, n2b_ref) = refs[:21]
        if use_norm:
            ng_ref, nb_ref, out_ref = refs[21:]
        else:
            (out_ref,) = refs[21:]

        x = src_ref[...]            # (B*S, D)   batch-major flattened, f32
        pe = pos_ref[...]           # (B*S, D)
        hmask = hmask_ref[...]      # (B*H*S, D)   block-diagonal head mask (0/1)
        bmask = bmask_ref[...]      # (B*H*S, B*S) additive cross-batch mask (0 / -1e9)
        sel = sel_ref[...]          # (B*S, S)     tile(eye(S)) / H  (attn-map selector)

        for li in range(L):                       # static unroll over layers
            wq = wq_ref[li]                        # (D, D)  bf16 (scale folded in)
            wk = wk_ref[li]                        # (D, D)  bf16
            wv = wv_ref[li]                        # (D, D)  bf16
            wo = wo_ref[li]                        # (D, D)  bf16
            l1w = l1w_ref[li]                      # (D, FF) bf16
            l2w = l2w_ref[li]                      # (FF, D) bf16
            bq = bq_ref[li:li + 1]                 # (1, D)  f32
            bk = bk_ref[li:li + 1]
            bv = bv_ref[li:li + 1]
            bo = bo_ref[li:li + 1]
            l1b = l1b_ref[li:li + 1]               # (1, FF)
            l2b = l2b_ref[li:li + 1]               # (1, D)
            n1g = n1g_ref[li:li + 1]
            n1b = n1b_ref[li:li + 1]
            n2g = n2g_ref[li:li + 1]
            n2b = n2b_ref[li:li + 1]

            # ---- self-attention: q = k = x + pos, v = x (bf16 MXU, f32 accumulate) --
            xq_b = (x + pe).astype(jnp.bfloat16)
            x_b = x.astype(jnp.bfloat16)
            q = jnp.dot(xq_b, wq, preferred_element_type=jnp.float32) + bq   # (B*S, D)
            k = jnp.dot(xq_b, wk, preferred_element_type=jnp.float32) + bk
            v = jnp.dot(x_b, wv, preferred_element_type=jnp.float32) + bv

            # wide-Q: replicate every batch row per head, zero non-head columns.
            q_wide = jnp.broadcast_to(
                q.reshape(B, 1, S, D), (B, H, S, D)).reshape(B * H * S, D) * hmask

            # one MXU push for ALL (batch, head) scores; mask cross-batch columns
            scores = jax.lax.dot_general(
                q_wide.astype(jnp.bfloat16), k.astype(jnp.bfloat16),
                (((1,), (1,)), ((), ())),
                preferred_element_type=jnp.float32)                 # (B*H*S, B*S)
            scores = scores + bmask
            scores = scores - jnp.max(scores, axis=-1, keepdims=True)
            ex = jnp.exp(scores)
            probs = ex * pl.reciprocal(jnp.sum(ex, axis=-1, keepdims=True),
                                       approx=True)                 # (B*H*S, B*S)

            # context (cross-batch probs are exactly 0), masked back to head columns
            ctx = jnp.dot(probs.astype(jnp.bfloat16), v.astype(jnp.bfloat16),
                          preferred_element_type=jnp.float32) * hmask
            proj = jnp.dot(ctx.astype(jnp.bfloat16), wo,
                           preferred_element_type=jnp.float32)      # (B*H*S, D)
            attn_out = proj.reshape(B, H, S, D).sum(axis=1).reshape(B * S, D) + bo

            # attention map averaged over heads, written straight to the output slab
            aw_heads = probs.reshape(B, H, S, B * S).sum(axis=1).reshape(B * S, B * S)
            aw = jnp.dot(aw_heads, sel, preferred_element_type=jnp.float32)  # (B*S, S)
            out_ref[:, D + li * S: D + (li + 1) * S] = aw

            # ---- add & norm, feed-forward (ReLU), add & norm (all f32) --------------
            x = _layer_norm(x + attn_out, n1g, n1b)
            h1 = jnp.maximum(
                jnp.dot(x.astype(jnp.bfloat16), l1w,
                        preferred_element_type=jnp.float32) + l1b, 0.0)
            ff = jnp.dot(h1.astype(jnp.bfloat16), l2w,
                         preferred_element_type=jnp.float32) + l2b
            x = _layer_norm(x + ff, n2g, n2b)

        if use_norm:
            x = _layer_norm(x, ng_ref[...], nb_ref[...])

        out_ref[:, :D] = x            # lanes [D + L*S, 128) stay unwritten (padding)

    return kernel


# ---------------------------------------------------------------------------
# module forward (mirrors TransformerEncoder.forward; mask / padding mask = None)
# ---------------------------------------------------------------------------
def transformer_encoder_forward(src, pos, kparams):
    """src, pos: (S, B, D) seq-first (PyTorch layout).
    Returns (output (S, B, D), attn_weights (L, B, S, S))."""
    S, B, D = src.shape
    H = NHEAD
    HD = D // H
    stacked = kparams['stacked']
    L = stacked['wq'].shape[0]
    use_norm = kparams['norm'] is not None
    out_lanes = max(128, ((D + L * S + 127) // 128) * 128)   # lane-dense output slab

    # layout plumbing (cheap XLA ops, fused under jit): seq-first -> (B*S, D) batch-major
    src_flat = jnp.transpose(src, (1, 0, 2)).reshape(B * S, D)
    pos_flat = jnp.transpose(pos, (1, 0, 2)).reshape(B * S, D)

    # tiny precomputed constant masks (host-side numpy -> literal constants under jit)
    rows = np.arange(B * H * S)
    hmask = (((rows // S) % H)[:, None] ==
             (np.arange(D) // HD)[None, :]).astype(np.float32)          # (B*H*S, D)
    bmask = np.where((rows // (H * S))[:, None] ==
                     (np.arange(B * S) // S)[None, :],
                     0.0, -1e9).astype(np.float32)                      # (B*H*S, B*S)
    sel = (np.tile(np.eye(S, dtype=np.float32), (B, 1)) / H)            # (B*S, S)

    args = [src_flat, pos_flat, jnp.asarray(hmask), jnp.asarray(bmask), jnp.asarray(sel)]
    args += [stacked[kname] for kname in _STACK_KEYS]
    if use_norm:
        args += [kparams['norm']['g'], kparams['norm']['b']]

    slab = pl.pallas_call(
        _make_encoder_kernel(S, B, D, H, L, use_norm),
        out_shape=jax.ShapeDtypeStruct((B * S, out_lanes), jnp.float32),
    )(*args)

    output = jnp.transpose(slab[:, :D].reshape(B, S, D), (1, 0, 2))            # (S,B,D)
    attn_weights = jnp.transpose(
        slab[:, D:D + L * S].reshape(B, S, L, S), (2, 0, 1, 3))                # (L,B,S,S)
    return output, attn_weights


# ---------------------------------------------------------------------------
# parameters: PyTorch-shaped raw params + kernel-ready (split / stacked / scaled / bf16)
# ---------------------------------------------------------------------------
def init_params(key, num_layers, d=D_MODEL, dff=DIM_FF, use_norm=True):
    def nrm(k, shape, scale=0.05):
        return scale * jax.random.normal(k, shape, jnp.float32)

    layers = []
    for li in range(num_layers):
        ks = jax.random.split(jax.random.fold_in(key, li), 12)
        layers.append({
            'in_proj_weight': nrm(ks[0], (3 * d, d)),
            'in_proj_bias':   nrm(ks[1], (3 * d,)),
            'out_proj_weight': nrm(ks[2], (d, d)),
            'out_proj_bias':   nrm(ks[3], (d,)),
            'linear1_weight': nrm(ks[4], (dff, d)),
            'linear1_bias':   nrm(ks[5], (dff,)),
            'linear2_weight': nrm(ks[6], (d, dff)),
            'linear2_bias':   nrm(ks[7], (d,)),
            'norm1_weight': 1.0 + nrm(ks[8], (d,)),
            'norm1_bias':   nrm(ks[9], (d,)),
            'norm2_weight': 1.0 + nrm(ks[10], (d,)),
            'norm2_bias':   nrm(ks[11], (d,)),
        })
    norm = None
    if use_norm:
        kn1, kn2 = jax.random.split(jax.random.fold_in(key, 1000))
        norm = {'weight': 1.0 + nrm(kn1, (d,)), 'bias': nrm(kn2, (d,))}
    return {'layers': layers, 'norm': norm}


def prepare_kernel_params(params, nhead=NHEAD):
    d = params['layers'][0]['in_proj_weight'].shape[1]
    scale = 1.0 / math.sqrt(d // nhead)

    per = {kname: [] for kname in _STACK_KEYS}
    for p in params['layers']:
        W, bW = p['in_proj_weight'], p['in_proj_bias']
        # fold 1/sqrt(head_dim) into the Q projection; bf16 MXU weights, f32 biases
        per['wq'].append(((W[:d] * scale).T).astype(jnp.bfloat16))          # (D, D)
        per['bq'].append((bW[:d] * scale).astype(jnp.float32))              # (D,)
        per['wk'].append(W[d:2 * d].T.astype(jnp.bfloat16))
        per['bk'].append(bW[d:2 * d])
        per['wv'].append(W[2 * d:].T.astype(jnp.bfloat16))
        per['bv'].append(bW[2 * d:])
        per['wo'].append(p['out_proj_weight'].T.astype(jnp.bfloat16))       # (D, D)
        per['bo'].append(p['out_proj_bias'])
        per['l1w'].append(p['linear1_weight'].T.astype(jnp.bfloat16))       # (D, FF)
        per['l1b'].append(p['linear1_bias'])
        per['l2w'].append(p['linear2_weight'].T.astype(jnp.bfloat16))       # (FF, D)
        per['l2b'].append(p['linear2_bias'])
        per['n1g'].append(p['norm1_weight'])
        per['n1b'].append(p['norm1_bias'])
        per['n2g'].append(p['norm2_weight'])
        per['n2b'].append(p['norm2_bias'])
    stacked = {kname: jnp.stack(v, axis=0) for kname, v in per.items()}

    norm = None
    if params['norm'] is not None:
        norm = {'g': params['norm']['weight'][None, :],
                'b': params['norm']['bias'][None, :]}
    return {'stacked': stacked, 'norm': norm}


# ---------------------------------------------------------------------------
# independent pure-JAX reference (PyTorch-faithful per-head formulation)
# ---------------------------------------------------------------------------
def _ref_layer_norm(x, g, b):
    mu = jnp.mean(x, axis=-1, keepdims=True)
    var = jnp.mean((x - mu) ** 2, axis=-1, keepdims=True)
    return (x - mu) * jax.lax.rsqrt(var + LN_EPS) * g + b


def reference_forward(src, pos, params, nhead=NHEAD):
    S, B, D = src.shape
    hd = D // nhead
    scale = 1.0 / math.sqrt(hd)
    x = jnp.transpose(src, (1, 0, 2))     # (B, S, D)
    pe = jnp.transpose(pos, (1, 0, 2))

    attn_all = []
    for p in params['layers']:
        def one(xb, pb, p=p):
            qk_in = xb + pb
            W, bW = p['in_proj_weight'], p['in_proj_bias']
            q = qk_in @ W[:D].T + bW[:D]
            k = qk_in @ W[D:2 * D].T + bW[D:2 * D]
            v = xb @ W[2 * D:].T + bW[2 * D:]
            heads, ws = [], []
            for h in range(nhead):
                qh = q[:, h * hd:(h + 1) * hd] * scale
                kh = k[:, h * hd:(h + 1) * hd]
                vh = v[:, h * hd:(h + 1) * hd]
                w = jax.nn.softmax(qh @ kh.T, axis=-1)
                ws.append(w)
                heads.append(w @ vh)
            ctx = jnp.concatenate(heads, axis=-1)
            attn_out = ctx @ p['out_proj_weight'].T + p['out_proj_bias']
            attn_w = sum(ws) / nhead
            x1 = _ref_layer_norm(xb + attn_out, p['norm1_weight'], p['norm1_bias'])
            ff = jnp.maximum(x1 @ p['linear1_weight'].T + p['linear1_bias'], 0.0)
            ff = ff @ p['linear2_weight'].T + p['linear2_bias']
            x2 = _ref_layer_norm(x1 + ff, p['norm2_weight'], p['norm2_bias'])
            return x2, attn_w
        x, aw = jax.vmap(one)(x, pe)
        attn_all.append(aw)

    if params['norm'] is not None:
        x = _ref_layer_norm(x, params['norm']['weight'], params['norm']['bias'])
    return jnp.transpose(x, (1, 0, 2)), jnp.stack(attn_all, axis=0)


# ---------------------------------------------------------------------------
if __name__ == "__main__":
    S, B = 16, 2          # sequence length (memory tokens), batch
    key = jax.random.PRNGKey(0)
    k0, k1, k2 = jax.random.split(key, 3)

    src = jax.random.normal(k0, (S, B, D_MODEL), jnp.float32)
    pos = jax.random.normal(k1, (S, B, D_MODEL), jnp.float32)

    params = init_params(k2, NUM_LAYERS, use_norm=True)     # norm = LayerNorm(d_model)
    kparams = prepare_kernel_params(params)

    fwd = jax.jit(transformer_encoder_forward)
    out, attn = fwd(src, pos, kparams)
    out, attn = jax.block_until_ready((out, attn))

    assert out.shape == (S, B, D_MODEL)
    assert attn.shape == (NUM_LAYERS, B, S, S)

    ref_out, ref_attn = reference_forward(src, pos, params)
    # bf16 MXU operands + approx softmax reciprocal -> slightly looser than pure-f32.
    np.testing.assert_allclose(np.asarray(out), np.asarray(ref_out), rtol=2e-2, atol=2e-2)
    np.testing.assert_allclose(np.asarray(attn), np.asarray(ref_attn), rtol=5e-3, atol=5e-3)

    print("KERNEL_OK")
</pallas_src>

<mosaic_0001>
module attributes {stable_mosaic.version = 11 : i64} {
  func.func @kernel(%arg0: memref<32x32xf32, #tpu.memory_space<vmem>>, %arg1: memref<32x32xf32, #tpu.memory_space<vmem>>, %arg2: memref<128x32xf32, #tpu.memory_space<vmem>>, %arg3: memref<128x32xf32, #tpu.memory_space<vmem>>, %arg4: memref<32x16xf32, #tpu.memory_space<vmem>>, %arg5: memref<2x32x32xbf16, #tpu.memory_space<vmem>>, %arg6: memref<2x32xf32, #tpu.memory_space<vmem>>, %arg7: memref<2x32x32xbf16, #tpu.memory_space<vmem>>, %arg8: memref<2x32xf32, #tpu.memory_space<vmem>>, %arg9: memref<2x32x32xbf16, #tpu.memory_space<vmem>>, %arg10: memref<2x32xf32, #tpu.memory_space<vmem>>, %arg11: memref<2x32x32xbf16, #tpu.memory_space<vmem>>, %arg12: memref<2x32xf32, #tpu.memory_space<vmem>>, %arg13: memref<2x32x64xbf16, #tpu.memory_space<vmem>>, %arg14: memref<2x64xf32, #tpu.memory_space<vmem>>, %arg15: memref<2x64x32xbf16, #tpu.memory_space<vmem>>, %arg16: memref<2x32xf32, #tpu.memory_space<vmem>>, %arg17: memref<2x32xf32, #tpu.memory_space<vmem>>, %arg18: memref<2x32xf32, #tpu.memory_space<vmem>>, %arg19: memref<2x32xf32, #tpu.memory_space<vmem>>, %arg20: memref<2x32xf32, #tpu.memory_space<vmem>>, %arg21: memref<1x32xf32, #tpu.memory_space<vmem>>, %arg22: memref<1x32xf32, #tpu.memory_space<vmem>>, %arg23: memref<32x128xf32, #tpu.memory_space<vmem>>) attributes {dimension_semantics = [], scalar_prefetch = 0 : i64, scratch_operands = 0 : i64, tpu.core_type = #tpu.core_type<tc>} {
    %c0 = arith.constant 0 : index
    %c0_0 = arith.constant 0 : index
    %0 = vector.load %arg0[%c0, %c0_0] : memref<32x32xf32, #tpu.memory_space<vmem>>, vector<32x32xf32>
    %c0_1 = arith.constant 0 : index
    %c0_2 = arith.constant 0 : index
    %1 = vector.load %arg1[%c0_1, %c0_2] : memref<32x32xf32, #tpu.memory_space<vmem>>, vector<32x32xf32>
    %c0_3 = arith.constant 0 : index
    %c0_4 = arith.constant 0 : index
    %2 = vector.load %arg2[%c0_3, %c0_4] : memref<128x32xf32, #tpu.memory_space<vmem>>, vector<128x32xf32>
    %c0_5 = arith.constant 0 : index
    %c0_6 = arith.constant 0 : index
    %3 = vector.load %arg3[%c0_5, %c0_6] : memref<128x32xf32, #tpu.memory_space<vmem>>, vector<128x32xf32>
    %c0_7 = arith.constant 0 : index
    %c0_8 = arith.constant 0 : index
    %4 = vector.load %arg4[%c0_7, %c0_8] : memref<32x16xf32, #tpu.memory_space<vmem>>, vector<32x16xf32>
    %c0_9 = arith.constant 0 : index
    %c0_10 = arith.constant 0 : index
    %c0_11 = arith.constant 0 : index
    %5 = vector.load %arg5[%c0_9, %c0_10, %c0_11] : memref<2x32x32xbf16, #tpu.memory_space<vmem>>, vector<1x32x32xbf16>
    %6 = vector.shape_cast %5 : vector<1x32x32xbf16> to vector<32x32xbf16>
    %c0_12 = arith.constant 0 : index
    %c0_13 = arith.constant 0 : index
    %c0_14 = arith.constant 0 : index
    %7 = vector.load %arg7[%c0_12, %c0_13, %c0_14] : memref<2x32x32xbf16, #tpu.memory_space<vmem>>, vector<1x32x32xbf16>
    %8 = vector.shape_cast %7 : vector<1x32x32xbf16> to vector<32x32xbf16>
    %c0_15 = arith.constant 0 : index
    %c0_16 = arith.constant 0 : index
    %c0_17 = arith.constant 0 : index
    %9 = vector.load %arg9[%c0_15, %c0_16, %c0_17] : memref<2x32x32xbf16, #tpu.memory_space<vmem>>, vector<1x32x32xbf16>
    %10 = vector.shape_cast %9 : vector<1x32x32xbf16> to vector<32x32xbf16>
    %c0_18 = arith.constant 0 : index
    %c0_19 = arith.constant 0 : index
    %c0_20 = arith.constant 0 : index
    %11 = vector.load %arg11[%c0_18, %c0_19, %c0_20] : memref<2x32x32xbf16, #tpu.memory_space<vmem>>, vector<1x32x32xbf16>
    %12 = vector.shape_cast %11 : vector<1x32x32xbf16> to vector<32x32xbf16>
    %c0_21 = arith.constant 0 : index
    %c0_22 = arith.constant 0 : index
    %c0_23 = arith.constant 0 : index
    %13 = vector.load %arg13[%c0_21, %c0_22, %c0_23] : memref<2x32x64xbf16, #tpu.memory_space<vmem>>, vector<1x32x64xbf16>
    %14 = vector.shape_cast %13 : vector<1x32x64xbf16> to vector<32x64xbf16>
    %c0_24 = arith.constant 0 : index
    %c0_25 = arith.constant 0 : index
    %c0_26 = arith.constant 0 : index
    %15 = vector.load %arg15[%c0_24, %c0_25, %c0_26] : memref<2x64x32xbf16, #tpu.memory_space<vmem>>, vector<1x64x32xbf16>
    %16 = vector.shape_cast %15 : vector<1x64x32xbf16> to vector<64x32xbf16>
    %c0_27 = arith.constant 0 : index
    %c0_28 = arith.constant 0 : index
    %17 = vector.load %arg6[%c0_27, %c0_28] : memref<2x32xf32, #tpu.memory_space<vmem>>, vector<1x32xf32>
    %c0_29 = arith.constant 0 : index
    %c0_30 = arith.constant 0 : index
    %18 = vector.load %arg8[%c0_29, %c0_30] : memref<2x32xf32, #tpu.memory_space<vmem>>, vector<1x32xf32>
    %c0_31 = arith.constant 0 : index
    %c0_32 = arith.constant 0 : index
    %19 = vector.load %arg10[%c0_31, %c0_32] : memref<2x32xf32, #tpu.memory_space<vmem>>, vector<1x32xf32>
    %c0_33 = arith.constant 0 : index
    %c0_34 = arith.constant 0 : index
    %20 = vector.load %arg12[%c0_33, %c0_34] : memref<2x32xf32, #tpu.memory_space<vmem>>, vector<1x32xf32>
    %c0_35 = arith.constant 0 : index
    %c0_36 = arith.constant 0 : index
    %21 = vector.load %arg14[%c0_35, %c0_36] : memref<2x64xf32, #tpu.memory_space<vmem>>, vector<1x64xf32>
    %c0_37 = arith.constant 0 : index
    %c0_38 = arith.constant 0 : index
    %22 = vector.load %arg16[%c0_37, %c0_38] : memref<2x32xf32, #tpu.memory_space<vmem>>, vector<1x32xf32>
    %c0_39 = arith.constant 0 : index
    %c0_40 = arith.constant 0 : index
    %23 = vector.load %arg17[%c0_39, %c0_40] : memref<2x32xf32, #tpu.memory_space<vmem>>, vector<1x32xf32>
    %c0_41 = arith.constant 0 : index
    %c0_42 = arith.constant 0 : index
    %24 = vector.load %arg18[%c0_41, %c0_42] : memref<2x32xf32, #tpu.memory_space<vmem>>, vector<1x32xf32>
    %c0_43 = arith.constant 0 : index
    %c0_44 = arith.constant 0 : index
    %25 = vector.load %arg19[%c0_43, %c0_44] : memref<2x32xf32, #tpu.memory_space<vmem>>, vector<1x32xf32>
    %c0_45 = arith.constant 0 : index
    %c0_46 = arith.constant 0 : index
    %26 = vector.load %arg20[%c0_45, %c0_46] : memref<2x32xf32, #tpu.memory_space<vmem>>, vector<1x32xf32>
    %27 = arith.addf %0, %1 : vector<32x32xf32>
    %28 = arith.truncf %27 : vector<32x32xf32> to vector<32x32xbf16>
    %29 = arith.truncf %0 : vector<32x32xf32> to vector<32x32xbf16>
    %cst = arith.constant dense<0.000000e+00> : vector<32x32xf32>
    %30 = tpu.matmul %28, %6, %cst {dimension_numbers = #tpu.dot_dimension_numbers<[1], [0], [0], [1], [0, 0, 1, 1], [], []>} : vector<32x32xbf16>, vector<32x32xbf16>, vector<32x32xf32> -> vector<32x32xf32>
    %31 = vector.broadcast %17 : vector<1x32xf32> to vector<32x32xf32>
    %32 = arith.addf %30, %31 : vector<32x32xf32>
    %cst_47 = arith.constant dense<0.000000e+00> : vector<32x32xf32>
    %33 = tpu.matmul %28, %8, %cst_47 {dimension_numbers = #tpu.dot_dimension_numbers<[1], [0], [0], [1], [0, 0, 1, 1], [], []>} : vector<32x32xbf16>, vector<32x32xbf16>, vector<32x32xf32> -> vector<32x32xf32>
    %34 = vector.broadcast %18 : vector<1x32xf32> to vector<32x32xf32>
    %35 = arith.addf %33, %34 : vector<32x32xf32>
    %cst_48 = arith.constant dense<0.000000e+00> : vector<32x32xf32>
    %36 = tpu.matmul %29, %10, %cst_48 {dimension_numbers = #tpu.dot_dimension_numbers<[1], [0], [0], [1], [0, 0, 1, 1], [], []>} : vector<32x32xbf16>, vector<32x32xbf16>, vector<32x32xf32> -> vector<32x32xf32>
    %37 = vector.broadcast %19 : vector<1x32xf32> to vector<32x32xf32>
    %38 = arith.addf %36, %37 : vector<32x32xf32>
    %39 = vector.shape_cast %32 : vector<32x32xf32> to vector<2x1x16x32xf32>
    %40 = vector.shape_cast %39 : vector<2x1x16x32xf32> to vector<2x1x16x32xf32>
    %41 = vector.broadcast %40 : vector<2x1x16x32xf32> to vector<2x4x16x32xf32>
    %42 = vector.shape_cast %41 : vector<2x4x16x32xf32> to vector<128x32xf32>
    %43 = arith.mulf %42, %2 : vector<128x32xf32>
    %44 = arith.truncf %43 : vector<128x32xf32> to vector<128x32xbf16>
    %45 = arith.truncf %35 : vector<32x32xf32> to vector<32x32xbf16>
    %cst_49 = arith.constant dense<0.000000e+00> : vector<128x32xf32>
    %46 = tpu.matmul %44, %45, %cst_49 {dimension_numbers = #tpu.dot_dimension_numbers<[1], [1], [0], [0], [0, 0, 1, 0], [], []>} : vector<128x32xbf16>, vector<32x32xbf16>, vector<128x32xf32> -> vector<128x32xf32>
    %47 = arith.addf %46, %3 : vector<128x32xf32>
    %cst_50 = arith.constant dense<0xFF800000> : vector<128xf32>
    %48 = vector.multi_reduction <maximumf>, %47, %cst_50 [1] : vector<128x32xf32> to vector<128xf32>
    %49 = vector.shape_cast %48 : vector<128xf32> to vector<128x1xf32>
    %50 = vector.broadcast %49 : vector<128x1xf32> to vector<128x32xf32>
    %51 = arith.subf %47, %50 : vector<128x32xf32>
    %52 = math.exp %51 : vector<128x32xf32>
    %cst_51 = arith.constant dense<0.000000e+00> : vector<128xf32>
    %53 = vector.multi_reduction <add>, %52, %cst_51 [1] : vector<128x32xf32> to vector<128xf32>
    %54 = vector.shape_cast %53 : vector<128xf32> to vector<128x1xf32>
    %55 = tpu.reciprocal %54 {approx = true} : vector<128x1xf32> -> vector<128x1xf32>
    %56 = vector.broadcast %55 : vector<128x1xf32> to vector<128x32xf32>
    %57 = arith.mulf %52, %56 : vector<128x32xf32>
    %58 = arith.truncf %57 : vector<128x32xf32> to vector<128x32xbf16>
    %59 = arith.truncf %38 : vector<32x32xf32> to vector<32x32xbf16>
    %cst_52 = arith.constant dense<0.000000e+00> : vector<128x32xf32>
    %60 = tpu.matmul %58, %59, %cst_52 {dimension_numbers = #tpu.dot_dimension_numbers<[1], [0], [0], [1], [0, 0, 1, 1], [], []>} : vector<128x32xbf16>, vector<32x32xbf16>, vector<128x32xf32> -> vector<128x32xf32>
    %61 = arith.mulf %60, %2 : vector<128x32xf32>
    %62 = arith.truncf %61 : vector<128x32xf32> to vector<128x32xbf16>
    %cst_53 = arith.constant dense<0.000000e+00> : vector<128x32xf32>
    %63 = tpu.matmul %62, %12, %cst_53 {dimension_numbers = #tpu.dot_dimension_numbers<[1], [0], [0], [1], [0, 0, 1, 1], [], []>} : vector<128x32xbf16>, vector<32x32xbf16>, vector<128x32xf32> -> vector<128x32xf32>
    %64 = vector.shape_cast %63 : vector<128x32xf32> to vector<2x4x16x32xf32>
    %cst_54 = arith.constant dense<0.000000e+00> : vector<2x16x32xf32>
    %65 = vector.multi_reduction <add>, %64, %cst_54 [1] : vector<2x4x16x32xf32> to vector<2x16x32xf32>
    %66 = vector.shape_cast %65 : vector<2x16x32xf32> to vector<32x32xf32>
    %67 = vector.broadcast %20 : vector<1x32xf32> to vector<32x32xf32>
    %68 = arith.addf %66, %67 : vector<32x32xf32>
    %69 = vector.shape_cast %57 : vector<128x32xf32> to vector<2x4x16x32xf32>
    %cst_55 = arith.constant dense<0.000000e+00> : vector<2x16x32xf32>
    %70 = vector.multi_reduction <add>, %69, %cst_55 [1] : vector<2x4x16x32xf32> to vector<2x16x32xf32>
    %71 = vector.shape_cast %70 : vector<2x16x32xf32> to vector<32x32xf32>
    %cst_56 = arith.constant dense<0.000000e+00> : vector<32x16xf32>
    %72 = tpu.matmul %71, %4, %cst_56 {dimension_numbers = #tpu.dot_dimension_numbers<[1], [0], [0], [1], [0, 0, 1, 1], [], []>} : vector<32x32xf32>, vector<32x16xf32>, vector<32x16xf32> -> vector<32x16xf32>
    %c0_57 = arith.constant 0 : index
    %c32 = arith.constant 32 : index
    %73 = vector.load %arg23[%c0_57, %c32] : memref<32x128xf32, #tpu.memory_space<vmem>>, vector<32x16xf32>
    tpu.vector_store %arg23[%c0_57, %c32], %72 {strides = array<i32>} : memref<32x128xf32, #tpu.memory_space<vmem>>, vector<32x16xf32>,
    %74 = arith.addf %0, %68 : vector<32x32xf32>
    %cst_58 = arith.constant dense<0.000000e+00> : vector<32xf32>
    %75 = vector.multi_reduction <add>, %74, %cst_58 [1] : vector<32x32xf32> to vector<32xf32>
    %76 = vector.shape_cast %75 : vector<32xf32> to vector<32x1xf32>
    %cst_59 = arith.constant 3.200000e+01 : f32
    %77 = vector.broadcast %cst_59 : f32 to vector<32x1xf32>
    %78 = arith.divf %76, %77 : vector<32x1xf32>
    %79 = vector.broadcast %78 : vector<32x1xf32> to vector<32x32xf32>
    %80 = arith.subf %74, %79 : vector<32x32xf32>
    %81 = arith.mulf %80, %80 : vector<32x32xf32>
    %cst_60 = arith.constant dense<0.000000e+00> : vector<32xf32>
    %82 = vector.multi_reduction <add>, %81, %cst_60 [1] : vector<32x32xf32> to vector<32xf32>
    %83 = vector.shape_cast %82 : vector<32xf32> to vector<32x1xf32>
    %cst_61 = arith.constant 3.200000e+01 : f32
    %84 = vector.broadcast %cst_61 : f32 to vector<32x1xf32>
    %85 = arith.divf %83, %84 : vector<32x1xf32>
    %cst_62 = arith.constant 9.99999974E-6 : f32
    %86 = vector.broadcast %cst_62 : f32 to vector<32x1xf32>
    %87 = arith.addf %85, %86 : vector<32x1xf32>
    %88 = math.rsqrt %87 : vector<32x1xf32>
    %89 = vector.broadcast %88 : vector<32x1xf32> to vector<32x32xf32>
    %90 = arith.mulf %80, %89 : vector<32x32xf32>
    %91 = vector.broadcast %23 : vector<1x32xf32> to vector<32x32xf32>
    %92 = arith.mulf %90, %91 : vector<32x32xf32>
    %93 = vector.broadcast %24 : vector<1x32xf32> to vector<32x32xf32>
    %94 = arith.addf %92, %93 : vector<32x32xf32>
    %95 = arith.truncf %94 : vector<32x32xf32> to vector<32x32xbf16>
    %cst_63 = arith.constant dense<0.000000e+00> : vector<32x64xf32>
    %96 = tpu.matmul %95, %14, %cst_63 {dimension_numbers = #tpu.dot_dimension_numbers<[1], [0], [0], [1], [0, 0, 1, 1], [], []>} : vector<32x32xbf16>, vector<32x64xbf16>, vector<32x64xf32> -> vector<32x64xf32>
    %97 = vector.broadcast %21 : vector<1x64xf32> to vector<32x64xf32>
    %98 = arith.addf %96, %97 : vector<32x64xf32>
    %cst_64 = arith.constant 0.000000e+00 : f32
    %99 = vector.broadcast %cst_64 : f32 to vector<32x64xf32>
    %100 = arith.maximumf %98, %99 : vector<32x64xf32>
    %101 = arith.truncf %100 : vector<32x64xf32> to vector<32x64xbf16>
    %cst_65 = arith.constant dense<0.000000e+00> : vector<32x32xf32>
    %102 = tpu.matmul %101, %16, %cst_65 {dimension_numbers = #tpu.dot_dimension_numbers<[1], [0], [0], [1], [0, 0, 1, 1], [], []>} : vector<32x64xbf16>, vector<64x32xbf16>, vector<32x32xf32> -> vector<32x32xf32>
    %103 = vector.broadcast %22 : vector<1x32xf32> to vector<32x32xf32>
    %104 = arith.addf %102, %103 : vector<32x32xf32>
    %105 = arith.addf %94, %104 : vector<32x32xf32>
    %cst_66 = arith.constant dense<0.000000e+00> : vector<32xf32>
    %106 = vector.multi_reduction <add>, %105, %cst_66 [1] : vector<32x32xf32> to vector<32xf32>
    %107 = vector.shape_cast %106 : vector<32xf32> to vector<32x1xf32>
    %cst_67 = arith.constant 3.200000e+01 : f32
    %108 = vector.broadcast %cst_67 : f32 to vector<32x1xf32>
    %109 = arith.divf %107, %108 : vector<32x1xf32>
    %110 = vector.broadcast %109 : vector<32x1xf32> to vector<32x32xf32>
    %111 = arith.subf %105, %110 : vector<32x32xf32>
    %112 = arith.mulf %111, %111 : vector<32x32xf32>
    %cst_68 = arith.constant dense<0.000000e+00> : vector<32xf32>
    %113 = vector.multi_reduction <add>, %112, %cst_68 [1] : vector<32x32xf32> to vector<32xf32>
    %114 = vector.shape_cast %113 : vector<32xf32> to vector<32x1xf32>
    %cst_69 = arith.constant 3.200000e+01 : f32
    %115 = vector.broadcast %cst_69 : f32 to vector<32x1xf32>
    %116 = arith.divf %114, %115 : vector<32x1xf32>
    %cst_70 = arith.constant 9.99999974E-6 : f32
    %117 = vector.broadcast %cst_70 : f32 to vector<32x1xf32>
    %118 = arith.addf %116, %117 : vector<32x1xf32>
    %119 = math.rsqrt %118 : vector<32x1xf32>
    %120 = vector.broadcast %119 : vector<32x1xf32> to vector<32x32xf32>
    %121 = arith.mulf %111, %120 : vector<32x32xf32>
    %122 = vector.broadcast %25 : vector<1x32xf32> to vector<32x32xf32>
    %123 = arith.mulf %121, %122 : vector<32x32xf32>
    %124 = vector.broadcast %26 : vector<1x32xf32> to vector<32x32xf32>
    %125 = arith.addf %123, %124 : vector<32x32xf32>
    %c1 = arith.constant 1 : index
    %c0_71 = arith.constant 0 : index
    %c0_72 = arith.constant 0 : index
    %126 = vector.load %arg5[%c1, %c0_71, %c0_72] : memref<2x32x32xbf16, #tpu.memory_space<vmem>>, vector<1x32x32xbf16>
    %127 = vector.shape_cast %126 : vector<1x32x32xbf16> to vector<32x32xbf16>
    %c1_73 = arith.constant 1 : index
    %c0_74 = arith.constant 0 : index
    %c0_75 = arith.constant 0 : index
    %128 = vector.load %arg7[%c1_73, %c0_74, %c0_75] : memref<2x32x32xbf16, #tpu.memory_space<vmem>>, vector<1x32x32xbf16>
    %129 = vector.shape_cast %128 : vector<1x32x32xbf16> to vector<32x32xbf16>
    %c1_76 = arith.constant 1 : index
    %c0_77 = arith.constant 0 : index
    %c0_78 = arith.constant 0 : index
    %130 = vector.load %arg9[%c1_76, %c0_77, %c0_78] : memref<2x32x32xbf16, #tpu.memory_space<vmem>>, vector<1x32x32xbf16>
    %131 = vector.shape_cast %130 : vector<1x32x32xbf16> to vector<32x32xbf16>
    %c1_79 = arith.constant 1 : index
    %c0_80 = arith.constant 0 : index
    %c0_81 = arith.constant 0 : index
    %132 = vector.load %arg11[%c1_79, %c0_80, %c0_81] : memref<2x32x32xbf16, #tpu.memory_space<vmem>>, vector<1x32x32xbf16>
    %133 = vector.shape_cast %132 : vector<1x32x32xbf16> to vector<32x32xbf16>
    %c1_82 = arith.constant 1 : index
    %c0_83 = arith.constant 0 : index
    %c0_84 = arith.constant 0 : index
    %134 = vector.load %arg13[%c1_82, %c0_83, %c0_84] : memref<2x32x64xbf16, #tpu.memory_space<vmem>>, vector<1x32x64xbf16>
    %135 = vector.shape_cast %134 : vector<1x32x64xbf16> to vector<32x64xbf16>
    %c1_85 = arith.constant 1 : index
    %c0_86 = arith.constant 0 : index
    %c0_87 = arith.constant 0 : index
    %136 = vector.load %arg15[%c1_85, %c0_86, %c0_87] : memref<2x64x32xbf16, #tpu.memory_space<vmem>>, vector<1x64x32xbf16>
    %137 = vector.shape_cast %136 : vector<1x64x32xbf16> to vector<64x32xbf16>
    %c1_88 = arith.constant 1 : index
    %c0_89 = arith.constant 0 : index
    %138 = vector.load %arg6[%c1_88, %c0_89] : memref<2x32xf32, #tpu.memory_space<vmem>>, vector<1x32xf32>
    %c1_90 = arith.constant 1 : index
    %c0_91 = arith.constant 0 : index
    %139 = vector.load %arg8[%c1_90, %c0_91] : memref<2x32xf32, #tpu.memory_space<vmem>>, vector<1x32xf32>
    %c1_92 = arith.constant 1 : index
    %c0_93 = arith.constant 0 : index
    %140 = vector.load %arg10[%c1_92, %c0_93] : memref<2x32xf32, #tpu.memory_space<vmem>>, vector<1x32xf32>
    %c1_94 = arith.constant 1 : index
    %c0_95 = arith.constant 0 : index
    %141 = vector.load %arg12[%c1_94, %c0_95] : memref<2x32xf32, #tpu.memory_space<vmem>>, vector<1x32xf32>
    %c1_96 = arith.constant 1 : index
    %c0_97 = arith.constant 0 : index
    %142 = vector.load %arg14[%c1_96, %c0_97] : memref<2x64xf32, #tpu.memory_space<vmem>>, vector<1x64xf32>
    %c1_98 = arith.constant 1 : index
    %c0_99 = arith.constant 0 : index
    %143 = vector.load %arg16[%c1_98, %c0_99] : memref<2x32xf32, #tpu.memory_space<vmem>>, vector<1x32xf32>
    %c1_100 = arith.constant 1 : index
    %c0_101 = arith.constant 0 : index
    %144 = vector.load %arg17[%c1_100, %c0_101] : memref<2x32xf32, #tpu.memory_space<vmem>>, vector<1x32xf32>
    %c1_102 = arith.constant 1 : index
    %c0_103 = arith.constant 0 : index
    %145 = vector.load %arg18[%c1_102, %c0_103] : memref<2x32xf32, #tpu.memory_space<vmem>>, vector<1x32xf32>
    %c1_104 = arith.constant 1 : index
    %c0_105 = arith.constant 0 : index
    %146 = vector.load %arg19[%c1_104, %c0_105] : memref<2x32xf32, #tpu.memory_space<vmem>>, vector<1x32xf32>
    %c1_106 = arith.constant 1 : index
    %c0_107 = arith.constant 0 : index
    %147 = vector.load %arg20[%c1_106, %c0_107] : memref<2x32xf32, #tpu.memory_space<vmem>>, vector<1x32xf32>
    %148 = arith.addf %125, %1 : vector<32x32xf32>
    %149 = arith.truncf %148 : vector<32x32xf32> to vector<32x32xbf16>
    %150 = arith.truncf %125 : vector<32x32xf32> to vector<32x32xbf16>
    %cst_108 = arith.constant dense<0.000000e+00> : vector<32x32xf32>
    %151 = tpu.matmul %149, %127, %cst_108 {dimension_numbers = #tpu.dot_dimension_numbers<[1], [0], [0], [1], [0, 0, 1, 1], [], []>} : vector<32x32xbf16>, vector<32x32xbf16>, vector<32x32xf32> -> vector<32x32xf32>
    %152 = vector.broadcast %138 : vector<1x32xf32> to vector<32x32xf32>
    %153 = arith.addf %151, %152 : vector<32x32xf32>
    %cst_109 = arith.constant dense<0.000000e+00> : vector<32x32xf32>
    %154 = tpu.matmul %149, %129, %cst_109 {dimension_numbers = #tpu.dot_dimension_numbers<[1], [0], [0], [1], [0, 0, 1, 1], [], []>} : vector<32x32xbf16>, vector<32x32xbf16>, vector<32x32xf32> -> vector<32x32xf32>
    %155 = vector.broadcast %139 : vector<1x32xf32> to vector<32x32xf32>
    %156 = arith.addf %154, %155 : vector<32x32xf32>
    %cst_110 = arith.constant dense<0.000000e+00> : vector<32x32xf32>
    %157 = tpu.matmul %150, %131, %cst_110 {dimension_numbers = #tpu.dot_dimension_numbers<[1], [0], [0], [1], [0, 0, 1, 1], [], []>} : vector<32x32xbf16>, vector<32x32xbf16>, vector<32x32xf32> -> vector<32x32xf32>
    %158 = vector.broadcast %140 : vector<1x32xf32> to vector<32x32xf32>
    %159 = arith.addf %157, %158 : vector<32x32xf32>
    %160 = vector.shape_cast %153 : vector<32x32xf32> to vector<2x1x16x32xf32>
    %161 = vector.shape_cast %160 : vector<2x1x16x32xf32> to vector<2x1x16x32xf32>
    %162 = vector.broadcast %161 : vector<2x1x16x32xf32> to vector<2x4x16x32xf32>
    %163 = vector.shape_cast %162 : vector<2x4x16x32xf32> to vector<128x32xf32>
    %164 = arith.mulf %163, %2 : vector<128x32xf32>
    %165 = arith.truncf %164 : vector<128x32xf32> to vector<128x32xbf16>
    %166 = arith.truncf %156 : vector<32x32xf32> to vector<32x32xbf16>
    %cst_111 = arith.constant dense<0.000000e+00> : vector<128x32xf32>
    %167 = tpu.matmul %165, %166, %cst_111 {dimension_numbers = #tpu.dot_dimension_numbers<[1], [1], [0], [0], [0, 0, 1, 0], [], []>} : vector<128x32xbf16>, vector<32x32xbf16>, vector<128x32xf32> -> vector<128x32xf32>
    %168 = arith.addf %167, %3 : vector<128x32xf32>
    %cst_112 = arith.constant dense<0xFF800000> : vector<128xf32>
    %169 = vector.multi_reduction <maximumf>, %168, %cst_112 [1] : vector<128x32xf32> to vector<128xf32>
    %170 = vector.shape_cast %169 : vector<128xf32> to vector<128x1xf32>
    %171 = vector.broadcast %170 : vector<128x1xf32> to vector<128x32xf32>
    %172 = arith.subf %168, %171 : vector<128x32xf32>
    %173 = math.exp %172 : vector<128x32xf32>
    %cst_113 = arith.constant dense<0.000000e+00> : vector<128xf32>
    %174 = vector.multi_reduction <add>, %173, %cst_113 [1] : vector<128x32xf32> to vector<128xf32>
    %175 = vector.shape_cast %174 : vector<128xf32> to vector<128x1xf32>
    %176 = tpu.reciprocal %175 {approx = true} : vector<128x1xf32> -> vector<128x1xf32>
    %177 = vector.broadcast %176 : vector<128x1xf32> to vector<128x32xf32>
    %178 = arith.mulf %173, %177 : vector<128x32xf32>
    %179 = arith.truncf %178 : vector<128x32xf32> to vector<128x32xbf16>
    %180 = arith.truncf %159 : vector<32x32xf32> to vector<32x32xbf16>
    %cst_114 = arith.constant dense<0.000000e+00> : vector<128x32xf32>
    %181 = tpu.matmul %179, %180, %cst_114 {dimension_numbers = #tpu.dot_dimension_numbers<[1], [0], [0], [1], [0, 0, 1, 1], [], []>} : vector<128x32xbf16>, vector<32x32xbf16>, vector<128x32xf32> -> vector<128x32xf32>
    %182 = arith.mulf %181, %2 : vector<128x32xf32>
    %183 = arith.truncf %182 : vector<128x32xf32> to vector<128x32xbf16>
    %cst_115 = arith.constant dense<0.000000e+00> : vector<128x32xf32>
    %184 = tpu.matmul %183, %133, %cst_115 {dimension_numbers = #tpu.dot_dimension_numbers<[1], [0], [0], [1], [0, 0, 1, 1], [], []>} : vector<128x32xbf16>, vector<32x32xbf16>, vector<128x32xf32> -> vector<128x32xf32>
    %185 = vector.shape_cast %184 : vector<128x32xf32> to vector<2x4x16x32xf32>
    %cst_116 = arith.constant dense<0.000000e+00> : vector<2x16x32xf32>
    %186 = vector.multi_reduction <add>, %185, %cst_116 [1] : vector<2x4x16x32xf32> to vector<2x16x32xf32>
    %187 = vector.shape_cast %186 : vector<2x16x32xf32> to vector<32x32xf32>
    %188 = vector.broadcast %141 : vector<1x32xf32> to vector<32x32xf32>
    %189 = arith.addf %187, %188 : vector<32x32xf32>
    %190 = vector.shape_cast %178 : vector<128x32xf32> to vector<2x4x16x32xf32>
    %cst_117 = arith.constant dense<0.000000e+00> : vector<2x16x32xf32>
    %191 = vector.multi_reduction <add>, %190, %cst_117 [1] : vector<2x4x16x32xf32> to vector<2x16x32xf32>
    %192 = vector.shape_cast %191 : vector<2x16x32xf32> to vector<32x32xf32>
    %cst_118 = arith.constant dense<0.000000e+00> : vector<32x16xf32>
    %193 = tpu.matmul %192, %4, %cst_118 {dimension_numbers = #tpu.dot_dimension_numbers<[1], [0], [0], [1], [0, 0, 1, 1], [], []>} : vector<32x32xf32>, vector<32x16xf32>, vector<32x16xf32> -> vector<32x16xf32>
    %c0_119 = arith.constant 0 : index
    %c48 = arith.constant 48 : index
    %194 = vector.load %arg23[%c0_119, %c48] : memref<32x128xf32, #tpu.memory_space<vmem>>, vector<32x16xf32>
    tpu.vector_store %arg23[%c0_119, %c48], %193 {strides = array<i32>} : memref<32x128xf32, #tpu.memory_space<vmem>>, vector<32x16xf32>,
    %195 = arith.addf %125, %189 : vector<32x32xf32>
    %cst_120 = arith.constant dense<0.000000e+00> : vector<32xf32>
    %196 = vector.multi_reduction <add>, %195, %cst_120 [1] : vector<32x32xf32> to vector<32xf32>
    %197 = vector.shape_cast %196 : vector<32xf32> to vector<32x1xf32>
    %cst_121 = arith.constant 3.200000e+01 : f32
    %198 = vector.broadcast %cst_121 : f32 to vector<32x1xf32>
    %199 = arith.divf %197, %198 : vector<32x1xf32>
    %200 = vector.broadcast %199 : vector<32x1xf32> to vector<32x32xf32>
    %201 = arith.subf %195, %200 : vector<32x32xf32>
    %202 = arith.mulf %201, %201 : vector<32x32xf32>
    %cst_122 = arith.constant dense<0.000000e+00> : vector<32xf32>
    %203 = vector.multi_reduction <add>, %202, %cst_122 [1] : vector<32x32xf32> to vector<32xf32>
    %204 = vector.shape_cast %203 : vector<32xf32> to vector<32x1xf32>
    %cst_123 = arith.constant 3.200000e+01 : f32
    %205 = vector.broadcast %cst_123 : f32 to vector<32x1xf32>
    %206 = arith.divf %204, %205 : vector<32x1xf32>
    %cst_124 = arith.constant 9.99999974E-6 : f32
    %207 = vector.broadcast %cst_124 : f32 to vector<32x1xf32>
    %208 = arith.addf %206, %207 : vector<32x1xf32>
    %209 = math.rsqrt %208 : vector<32x1xf32>
    %210 = vector.broadcast %209 : vector<32x1xf32> to vector<32x32xf32>
    %211 = arith.mulf %201, %210 : vector<32x32xf32>
    %212 = vector.broadcast %144 : vector<1x32xf32> to vector<32x32xf32>
    %213 = arith.mulf %211, %212 : vector<32x32xf32>
    %214 = vector.broadcast %145 : vector<1x32xf32> to vector<32x32xf32>
    %215 = arith.addf %213, %214 : vector<32x32xf32>
    %216 = arith.truncf %215 : vector<32x32xf32> to vector<32x32xbf16>
    %cst_125 = arith.constant dense<0.000000e+00> : vector<32x64xf32>
    %217 = tpu.matmul %216, %135, %cst_125 {dimension_numbers = #tpu.dot_dimension_numbers<[1], [0], [0], [1], [0, 0, 1, 1], [], []>} : vector<32x32xbf16>, vector<32x64xbf16>, vector<32x64xf32> -> vector<32x64xf32>
    %218 = vector.broadcast %142 : vector<1x64xf32> to vector<32x64xf32>
    %219 = arith.addf %217, %218 : vector<32x64xf32>
    %cst_126 = arith.constant 0.000000e+00 : f32
    %220 = vector.broadcast %cst_126 : f32 to vector<32x64xf32>
    %221 = arith.maximumf %219, %220 : vector<32x64xf32>
    %222 = arith.truncf %221 : vector<32x64xf32> to vector<32x64xbf16>
    %cst_127 = arith.constant dense<0.000000e+00> : vector<32x32xf32>
    %223 = tpu.matmul %222, %137, %cst_127 {dimension_numbers = #tpu.dot_dimension_numbers<[1], [0], [0], [1], [0, 0, 1, 1], [], []>} : vector<32x64xbf16>, vector<64x32xbf16>, vector<32x32xf32> -> vector<32x32xf32>
    %224 = vector.broadcast %143 : vector<1x32xf32> to vector<32x32xf32>
    %225 = arith.addf %223, %224 : vector<32x32xf32>
    %226 = arith.addf %215, %225 : vector<32x32xf32>
    %cst_128 = arith.constant dense<0.000000e+00> : vector<32xf32>
    %227 = vector.multi_reduction <add>, %226, %cst_128 [1] : vector<32x32xf32> to vector<32xf32>
    %228 = vector.shape_cast %227 : vector<32xf32> to vector<32x1xf32>
    %cst_129 = arith.constant 3.200000e+01 : f32
    %229 = vector.broadcast %cst_129 : f32 to vector<32x1xf32>
    %230 = arith.divf %228, %229 : vector<32x1xf32>
    %231 = vector.broadcast %230 : vector<32x1xf32> to vector<32x32xf32>
    %232 = arith.subf %226, %231 : vector<32x32xf32>
    %233 = arith.mulf %232, %232 : vector<32x32xf32>
    %cst_130 = arith.constant dense<0.000000e+00> : vector<32xf32>
    %234 = vector.multi_reduction <add>, %233, %cst_130 [1] : vector<32x32xf32> to vector<32xf32>
    %235 = vector.shape_cast %234 : vector<32xf32> to vector<32x1xf32>
    %cst_131 = arith.constant 3.200000e+01 : f32
    %236 = vector.broadcast %cst_131 : f32 to vector<32x1xf32>
    %237 = arith.divf %235, %236 : vector<32x1xf32>
    %cst_132 = arith.constant 9.99999974E-6 : f32
    %238 = vector.broadcast %cst_132 : f32 to vector<32x1xf32>
    %239 = arith.addf %237, %238 : vector<32x1xf32>
    %240 = math.rsqrt %239 : vector<32x1xf32>
    %241 = vector.broadcast %240 : vector<32x1xf32> to vector<32x32xf32>
    %242 = arith.mulf %232, %241 : vector<32x32xf32>
    %243 = vector.broadcast %146 : vector<1x32xf32> to vector<32x32xf32>
    %244 = arith.mulf %242, %243 : vector<32x32xf32>
    %245 = vector.broadcast %147 : vector<1x32xf32> to vector<32x32xf32>
    %246 = arith.addf %244, %245 : vector<32x32xf32>
    %c0_133 = arith.constant 0 : index
    %c0_134 = arith.constant 0 : index
    %247 = vector.load %arg21[%c0_133, %c0_134] : memref<1x32xf32, #tpu.memory_space<vmem>>, vector<1x32xf32>
    %c0_135 = arith.constant 0 : index
    %c0_136 = arith.constant 0 : index
    %248 = vector.load %arg22[%c0_135, %c0_136] : memref<1x32xf32, #tpu.memory_space<vmem>>, vector<1x32xf32>
    %cst_137 = arith.constant dense<0.000000e+00> : vector<32xf32>
    %249 = vector.multi_reduction <add>, %246, %cst_137 [1] : vector<32x32xf32> to vector<32xf32>
    %250 = vector.shape_cast %249 : vector<32xf32> to vector<32x1xf32>
    %cst_138 = arith.constant 3.200000e+01 : f32
    %251 = vector.broadcast %cst_138 : f32 to vector<32x1xf32>
    %252 = arith.divf %250, %251 : vector<32x1xf32>
    %253 = vector.broadcast %252 : vector<32x1xf32> to vector<32x32xf32>
    %254 = arith.subf %246, %253 : vector<32x32xf32>
    %255 = arith.mulf %254, %254 : vector<32x32xf32>
    %cst_139 = arith.constant dense<0.000000e+00> : vector<32xf32>
    %256 = vector.multi_reduction <add>, %255, %cst_139 [1] : vector<32x32xf32> to vector<32xf32>
    %257 = vector.shape_cast %256 : vector<32xf32> to vector<32x1xf32>
    %cst_140 = arith.constant 3.200000e+01 : f32
    %258 = vector.broadcast %cst_140 : f32 to vector<32x1xf32>
    %259 = arith.divf %257, %258 : vector<32x1xf32>
    %cst_141 = arith.constant 9.99999974E-6 : f32
    %260 = vector.broadcast %cst_141 : f32 to vector<32x1xf32>
    %261 = arith.addf %259, %260 : vector<32x1xf32>
    %262 = math.rsqrt %261 : vector<32x1xf32>
    %263 = vector.broadcast %262 : vector<32x1xf32> to vector<32x32xf32>
    %264 = arith.mulf %254, %263 : vector<32x32xf32>
    %265 = vector.broadcast %247 : vector<1x32xf32> to vector<32x32xf32>
    %266 = arith.mulf %264, %265 : vector<32x32xf32>
    %267 = vector.broadcast %248 : vector<1x32xf32> to vector<32x32xf32>
    %268 = arith.addf %266, %267 : vector<32x32xf32>
    %c0_142 = arith.constant 0 : index
    %c0_143 = arith.constant 0 : index
    %269 = vector.load %arg23[%c0_142, %c0_143] : memref<32x128xf32, #tpu.memory_space<vmem>>, vector<32x32xf32>
    tpu.vector_store %arg23[%c0_142, %c0_143], %268 {strides = array<i32>} : memref<32x128xf32, #tpu.memory_space<vmem>>, vector<32x32xf32>,
    return
  }
}

</mosaic_0001>

<bundles_post_ra>
// kernel: transformer_encoder_forward.1
= control target key start
LH: loop header
LB: loop body
LE: loop exit
PB: predicated region body
PF: predicated region fallthrough
CT: control target
= control target key end

     0   :  { %s4548_s0 = inlined_call_operand.vmem [shape: f32[32,32], index: 0, kind: input, shape index: {}]   ;;  %s4549_s1 = inlined_call_operand.vmem [shape: f32[32,32], index: 1, kind: input, shape index: {}]   ;;  %s4550_s2 = inlined_call_operand.hbm [shape: f32[128,32], index: 2, kind: input, shape index: {}]   ;;  %s4551_s3 = inlined_call_operand.vmem [shape: f32[128,32], index: 3, kind: input, shape index: {}]   ;;  %s4552_s4 = inlined_call_operand.hbm [shape: f32[32,16], index: 4, kind: input, shape index: {}]   ;;  %s4553_s5 = inlined_call_operand.vmem [shape: bf16[2,32,32], index: 5, kind: input, shape index: {}]   ;;  %s4554_s6 = inlined_call_operand.vmem [shape: f32[2,32], index: 6, kind: input, shape index: {}]   ;;  %s4555_s7 = inlined_call_operand.hbm [shape: bf16[2,32,32], index: 7, kind: input, shape index: {}]   ;;  %s4556_s8 = inlined_call_operand.vmem [shape: f32[2,32], index: 8, kind: input, shape index: {}]   ;;  %s4557_s9 = inlined_call_operand.hbm [shape: bf16[2,32,32], index: 9, kind: input, shape index: {}]   ;;  %s4558_s10 = inlined_call_operand.vmem [shape: f32[2,32], index: 10, kind: input, shape index: {}]   ;;  %s4559_s11 = inlined_call_operand.hbm [shape: bf16[2,32,32], index: 11, kind: input, shape index: {}]   ;;  %s4560_s12 = inlined_call_operand.hbm [shape: f32[2,32], index: 12, kind: input, shape index: {}]   ;;  %s4561_s13 = inlined_call_operand.hbm [shape: bf16[2,32,64], index: 13, kind: input, shape index: {}]   ;;  %s4562_s14 = inlined_call_operand.vmem [shape: f32[2,64], index: 14, kind: input, shape index: {}]   ;;  %s4563_s15 = inlined_call_operand.vmem [shape: bf16[2,64,32], index: 15, kind: input, shape index: {}]   ;;  %s4564_s16 = inlined_call_operand.vmem [shape: f32[2,32], index: 16, kind: input, shape index: {}]   ;;  %s4565_s17 = inlined_call_operand.vmem [shape: f32[2,32], index: 17, kind: input, shape index: {}]   ;;  %s4566_s18 = inlined_call_operand.hbm [shape: f32[2,32], index: 18, kind: input, shape index: {}]   ;;  %s4567_s19 = inlined_call_operand.vmem [shape: f32[2,32], index: 19, kind: input, shape index: {}]   ;;  %s4568_s20 = inlined_call_operand.vmem [shape: f32[2,32], index: 20, kind: input, shape index: {}]   ;;  %s4569_s21 = inlined_call_operand.hbm [shape: f32[1,32], index: 21, kind: input, shape index: {}]   ;;  %s4570_s22 = inlined_call_operand.hbm [shape: f32[1,32], index: 22, kind: input, shape index: {}]   ;;  %s4571_s23 = inlined_call_operand.vmem [shape: f32[32,128], index: 23, kind: output, shape index: {}]  }
   0x1   :  { %4581 = sst [smem:[#allocation24_spill]] %s4548_s0 }
   0x2   :  { %4582 = sst [smem:[#allocation25_spill]] %s4549_s1 }
   0x3   :  { %4583 = sst [smem:[#allocation26_spill]] %s4550_s2 }
   0x4   :  { %4584 = sst [smem:[#allocation27_spill]] %s4551_s3 }
   0x5   :  { %4585 = sst [smem:[#allocation28_spill]] %s4552_s4 }
   0x6   :  { %4586 = sst [smem:[#allocation29_spill]] %s4553_s5 }
   0x7   :  { %4587 = sst [smem:[#allocation30_spill]] %s4554_s6 }
   0x8   :  { %4588 = sst [smem:[#allocation31_spill]] %s4555_s7 }
   0x9   :  { %28 = vsyncpa [#allocation3], 0 }
   0xa   :  { %29 = vsyncpa [#allocation5], 0 }
   0xb   :  { %30 = vsyncpa [#allocation8], 0 }
   0xc   :  { %31 = vsyncpa [#allocation11], 0 }
   0xd   :  { %32 = vsyncpa [#allocation14], 0 }
   0xe   :  { %33 = vsyncpa [#allocation17], 0  ;;  %s4589_s24 = sld [smem:[#allocation28_spill]]  ;;  %s3229_s5 = smov [#allocation4]  }
   0xf   :  { %s59_s1 = sshll.u32 %s3229_s5, 4  ;;  %s4577_s26 = smov 128   ;;  %s60_s1 = int_to_ptr.vmem [resolvable:$true] %s59_s1 }
  0x10   :  { %s4578_s2 = smov 8   ;;  %s89_s7 = sshll.u32 %s4557_s9, 4  ;;  %s90_s7 = int_to_ptr.hbm [resolvable:$true] %s89_s7 }
  0x11   :  { %s3232_s28 = smov [#allocation7]   ;;  %s118_s4 = sshll.u32 %s4560_s12, 4  ;;  %s119_s4 = int_to_ptr.hbm [resolvable:$true] %s118_s4 }
  0x12   :  { %s91_s29 = sshll.u32 %s3232_s28, 4  ;;  %s4579_s30 = smov 64   ;;  %s92_s29 = int_to_ptr.vmem [resolvable:$true] %s91_s29 }
  0x13   :  { %s3235_s9 = smov [#allocation10]   ;;  %s3236_s27 = smov [#allocation13]  }
  0x14   :  { %s57_s25 = sshll.u32 %s4589_s24, 4  ;;  %s3234_s24 = smov 4   ;;  %s58_s25 = int_to_ptr.hbm [resolvable:$true] %s57_s25 }
  0x15   :  { %65 = dma.hbm_to_vmem [thread:$0]  %s58_s25, 512, %s60_s1, [#allocation5], %s4577_s26, %s4577_s26, %s4578_s2  }
  0x16   :  { %97 = dma.hbm_to_vmem [thread:$0]  %s90_s7, 512, %s92_s29, [#allocation8], %s4579_s30, %s4579_s30, %s3234_s24  }
  0x17   :  { %s150_s1 = sshll.u32 %s4566_s18, 4  ;;  %s120_s6 = sshll.u32 %s3235_s9, 4  ;;  %s151_s1 = int_to_ptr.hbm [resolvable:$true] %s150_s1  ;;  %s121_s6 = int_to_ptr.vmem [resolvable:$true] %s120_s6 }
  0x18   :  { %123 = dma.hbm_to_vmem [thread:$0]  %s119_s4, 32, %s121_s6, [#allocation11]  }
  0x19   :  { %s152_s28 = sshll.u32 %s3236_s27, 4  ;;  %s4590_s0 = sld [smem:[#allocation26_spill]]  ;;  %s153_s28 = int_to_ptr.vmem [resolvable:$true] %s152_s28 }
  0x1a   :  { %155 = dma.hbm_to_vmem [thread:$0]  %s151_s1, 32, %s153_s28, [#allocation14]  }
  0x1b   :  { %s4591_s29 = sld [smem:[#allocation31_spill]]  ;;  %s3237_s25 = smov [#allocation2]  }
  0x1c   :  { %s44_s18 = sshll.u32 %s3237_s25, 4  ;;  %s4592_s5 = smov 8   ;;  %s45_s18 = int_to_ptr.vmem [resolvable:$true] %s44_s18 }
  0x1d   :  { %s4593_s9 = smov 128   ;;  %s3238_s4 = smov [#allocation6]  }
  0x1e   :  { %s76_s6 = sshll.u32 %s3238_s4, 4  ;;  %s104_s3 = sshll.u32 %s4559_s11, 4  ;;  %s77_s6 = int_to_ptr.vmem [resolvable:$true] %s76_s6  ;;  %s105_s3 = int_to_ptr.hbm [resolvable:$true] %s104_s3 }
  0x1f   :  { %s42_s26 = sshll.u32 %s4590_s0, 4  ;;  %s4594_s1 = smov 64   ;;  %s43_s26 = int_to_ptr.hbm [resolvable:$true] %s42_s26 }
  0x20   :  { %50 = dma.hbm_to_vmem [thread:$0]  %s43_s26, 2048, %s45_s18, [#allocation3], %s4593_s9, %s4593_s9, %s4592_s5  }
  0x21   :  { %s74_s30 = sshll.u32 %s4591_s29, 4  ;;  %s128_s0 = sshll.u32 %s4561_s13, 4  ;;  %s75_s30 = int_to_ptr.hbm [resolvable:$true] %s74_s30  ;;  %s129_s0 = int_to_ptr.hbm [resolvable:$true] %s128_s0 }
  0x22   :  { %82 = dma.hbm_to_vmem [thread:$0]  %s75_s30, 512, %s77_s6, [#allocation5], %s4594_s1, %s4594_s1, %s3234_s24  }
  0x23   :  { %s3239_s7 = smov [#allocation9]   ;;  %s3240_s26 = smov [#allocation12]  }
  0x24   :  { %s106_s29 = sshll.u32 %s3239_s7, 4  ;;  %s130_s11 = sshll.u32 %s3240_s26, 4  ;;  %s107_s29 = int_to_ptr.vmem [resolvable:$true] %s106_s29  ;;  %s131_s11 = int_to_ptr.vmem [resolvable:$true] %s130_s11 }
  0x25   :  { %112 = dma.hbm_to_vmem [thread:$0]  %s105_s3, 512, %s107_s29, [#allocation8], %s4594_s1, %s4594_s1, %s3234_s24  }
  0x26   :  { %s165_s5 = sshll.u32 %s4569_s21, 4  ;;  %s176_s9 = sshll.u32 %s4570_s22, 4  ;;  %s166_s5 = int_to_ptr.hbm [resolvable:$true] %s165_s5  ;;  %s177_s9 = int_to_ptr.hbm [resolvable:$true] %s176_s9 }
  0x27   :  { %136 = dma.hbm_to_vmem [thread:$0]  %s129_s0, 512, %s131_s11, [#allocation11], %s4594_s1, %s4594_s1, %s3234_s24  }
  0x28   :  { %s3241_s4 = smov [#allocation15]   ;;  %s3242_s27 = smov [#allocation16]  }
  0x29   :  { %s167_s6 = sshll.u32 %s3241_s4, 4  ;;  %s178_s12 = sshll.u32 %s3242_s27, 4  ;;  %s168_s6 = int_to_ptr.vmem [resolvable:$true] %s167_s6  ;;  %s179_s12 = int_to_ptr.vmem [resolvable:$true] %s178_s12 }
  0x2a   :  { %170 = dma.hbm_to_vmem [thread:$0]  %s166_s5, 16, %s168_s6, [#allocation14]  }
  0x2b   :  { %181 = dma.hbm_to_vmem [thread:$0]  %s177_s9, 16, %s179_s12, [#allocation17]  }
  0x2c   :  { %3217 = dma.done.wait [#allocation3], 2048  }
  0x2d   :  { %3218 = vsyncadd [#allocation3], 4294965248 }
  0x2e   :  { %3219 = dma.done.wait [#allocation5], 1024  }
  0x2f   :  { %3220 = vsyncadd [#allocation5], 4294966272 }
  0x30   :  { %3221 = dma.done.wait [#allocation8], 1024  }
  0x31   :  { %3222 = vsyncadd [#allocation8], 4294966272 }
  0x32   :  { %3223 = dma.done.wait [#allocation11], 544  }
  0x33   :  { %3224 = vsyncadd [#allocation11], 4294966752 }
  0x34   :  { %3225 = dma.done.wait [#allocation14], 48  }
  0x35   :  { %3226 = vsyncadd [#allocation14], 4294967248 }
  0x36   :  { %3227 = dma.done.wait [#allocation17], 16  }
  0x37   :  { %3228 = vsyncadd [#allocation17], 4294967280  ;;  %v2703_v0 = vld [vmem:[#allocation6 + $0x8] sm:$0xff]  ;;  %s4595_s24 = sld [smem:[#allocation24_spill]]  ;;  %v2702_v5 = vld [vmem:[#allocation6] sm:$0xff]  ;;  %vm326_vm0 = vcmask 261120  }
  0x38   :  { %s4596_s0 = sld [smem:[#allocation25_spill]]  ;;  %371 = vmatpush.bf16.msra.mxu1 %v2703_v0  ;;  %v2745_v22 = vld [vmem:[%s4556_s8] ss:$0 sm:$0xff]  ;;  %v3469_v36 = vld [vmem:[#allocation2 + $0x8] sm:$0xff]  ;;  %v3475_v41 = vld [vmem:[#allocation2 + $0x10] sm:$0xff]  ;;  %vm1198_vm14 = vcmask 523264  }
  0x39   :  { %s4597_s25 = sld [smem:[#allocation29_spill]]  ;;  %v3467_v35 = vld [vmem:[#allocation2] sm:$0xff]  ;;  %v3477_v42 = vld [vmem:[#allocation2 + $0x18] sm:$0xff]  ;;  %v3484_v47 = vld [vmem:[#allocation2 + $0x28] sm:$0xff]  ;;  %s3245_s9 = smov 48  }
  0x3a   :  { %s4598_s28 = sld [smem:[#allocation30_spill]]  ;;  %v3482_v46 = vld [vmem:[#allocation2 + $0x20] sm:$0xff]  ;;  %v3489_v51 = vld [vmem:[#allocation2 + $0x30] sm:$0xff]  ;;  %v3491_v52 = vld [vmem:[#allocation2 + $0x38] sm:$0xff] }
  0x3b   :  { %v3496_v60 = vld [vmem:[#allocation2 + $0x40] sm:$0xff]  ;;  %v3498_v61 = vld [vmem:[#allocation2 + $0x48] sm:$0xff]  ;;  %s4599_s26 = sld [smem:[#allocation27_spill]] }
  0x3c   :  { %372 = vmatpush.bf16.msra.mxu1 %v2702_v5 }
  0x3d   :  { %v3417_v1 = vld [vmem:[%s4595_s24] sm:$0xff]  ;;  %v3422_v2 = vld [vmem:[%s4595_s24 + $0x8] sm:$0xff]  ;;  %v3443_v11 = vld [vmem:[%s4595_s24 + $0x10] sm:$0xff] }
  0x3e   :  { %v227_v3 = vld [vmem:[%s4596_s0] sm:$0xff]  ;;  %v228_v4 = vld [vmem:[%s4596_s0 + $0x8] sm:$0xff]  ;;  %v3448_v12 = vld [vmem:[%s4595_s24 + $0x18] sm:$0xff] }
  0x3f   :  { %v305_v6 = vadd.f32 %v227_v3, %v3417_v1  ;;  %v306_v7 = vadd.f32 %v228_v4, %v3422_v2  ;;  %v2701_v8 = vld [vmem:[%s4597_s25 + $0x8] sm:$0xff]  ;;  %v2700_v9 = vld [vmem:[%s4597_s25] sm:$0xff]  ;;  %v229_v13 = vld [vmem:[%s4596_s0 + $0x10] sm:$0xff] }
  0x40   :  { %339 = vmatpush.bf16.msra.mxu0 %v2701_v8  ;;  %v230_v14 = vld [vmem:[%s4596_s0 + $0x18] sm:$0xff]  ;;  %v307_v15 = vadd.f32 %v229_v13, %v3443_v11  ;;  %v2746_v30 = vld [vmem:[%s4598_s28] ss:$0 sm:$0xff]  ;;  %v3503_v3 = vld [vmem:[#allocation2 + $0x50] sm:$0xff] }
  0x41   :  { %v309_v10 = vpack.c.bf16 %v306_v7, %v305_v6  ;;  %v308_v16 = vadd.f32 %v230_v14, %v3448_v12  ;;  %v3505_v4 = vld [vmem:[#allocation2 + $0x58] sm:$0xff]  ;;  %v3510_v8 = vld [vmem:[#allocation2 + $0x60] sm:$0xff] }
  0x43   :  { %2518 = vmatmul.msk.bf16.vlgmr.msra.gmra.mxu1 %vm326_vm0, %v309_v10  ;;  %v310_v17 = vpack.c.bf16 %v308_v16, %v307_v15  ;;  %v3517_v15 = vld [vmem:[#allocation2 + $0x70] sm:$0xff]  ;;  %v3519_v16 = vld [vmem:[#allocation2 + $0x78] sm:$0xff] }
  0x44   :  { %340 = vmatpush.bf16.msra.mxu0 %v2700_v9  ;;  %v3512_v9 = vld [vmem:[#allocation2 + $0x68] sm:$0xff] }
  0x47   :  { %2508 = vmatmul.msk.bf16.vlgmr.msra.gmra.mxu0 %vm326_vm0, %v309_v10 }
  0x53   :  { %2519 = vmatmul.msk.bf16.gmra.mxu1 %vm326_vm0, %v310_v17 }
  0x57   :  { %2509 = vmatmul.msk.bf16.gmra.mxu0 %vm326_vm0, %v310_v17 }
  0xc0   :  { %v374_v18 = vpop.f32.mrf.mxu1 }
  0xc1   :  { %v375_v29 = vadd.f32 %v2745_v22, %v374_v18 }
  0xc4   :  { %v342_v21 = vpop.f32.mrf.mxu0 }
  0xc5   :  { %v343_v33 = vadd.f32 %v2746_v30, %v342_v21 }
  0xc7   :  { %v422_v38 = vmul.f32 %v343_v33, %v3467_v35  ;;  %v424_v43 = vmul.f32 %v343_v33, %v3475_v41  ;;  %v426_v48 = vmul.f32 %v343_v33, %v3482_v46  ;;  %v428_v54 = vmul.f32 %v343_v33, %v3489_v51 }
  0xc8   :  { %v376_v19 = vpop.f32.mrf.mxu1 }
  0xc9   :  { %v377_v27 = vadd.f32 %v2745_v22, %v376_v19 }
  0xcb   :  { %v446_v32 = vpack.c.bf16 %v377_v27, %v375_v29 }
  0xcc   :  { %v344_v31 = vpop.f32.mrf.mxu0 }
  0xcd   :  { %v345_v34 = vadd.f32 %v2746_v30, %v344_v31  ;;  %v473_v37 = vsel %vm326_vm0, %v446_v32, 0  ;;  %v250_v32 = vld [vmem:[%s4599_s26 + $0x18] sm:$0xff] }
  0xcf   :  { %v423_v39 = vmul.f32 %v345_v34, %v3469_v36  ;;  %v425_v44 = vmul.f32 %v345_v34, %v3477_v42  ;;  %v427_v49 = vmul.f32 %v345_v34, %v3484_v47  ;;  %v429_v55 = vmul.f32 %v345_v34, %v3491_v52 }
  0xd0   :  { %v379_v20 = vpop.f32.mrf.mxu1 }
  0xd1   :  { %v380_v24 = vadd.f32 %v2745_v22, %v379_v20  ;;  %v438_v40 = vpack.c.bf16 %v423_v39, %v422_v38  ;;  %v439_v45 = vpack.c.bf16 %v425_v44, %v424_v43  ;;  %v440_v50 = vpack.c.bf16 %v427_v49, %v426_v48  ;;  %v247_v20 = vld [vmem:[%s4599_s26] sm:$0xff]  ;;  %v252_v44 = vld [vmem:[%s4599_s26 + $0x28] sm:$0xff] }
  0xd2   :  { %v441_v56 = vpack.c.bf16 %v429_v55, %v428_v54  ;;  %v251_v38 = vld [vmem:[%s4599_s26 + $0x20] sm:$0xff] }
  0xd4   :  { %v347_v53 = vpop.f32.mrf.mxu0 }
  0xd5   :  { %v348_v58 = vadd.f32 %v2746_v30, %v347_v53 }
  0xd7   :  { %v430_v62 = vmul.f32 %v348_v58, %v3496_v60  ;;  %v432_v5 = vmul.f32 %v348_v58, %v3503_v3  ;;  %v434_v10 = vmul.f32 %v348_v58, %v3510_v8  ;;  %v436_v17 = vmul.f32 %v348_v58, %v3517_v15 }
  0xd8   :  { %v381_v23 = vpop.f32.mrf.mxu1 }
  0xd9   :  { %v382_v25 = vadd.f32 %v2745_v22, %v381_v23 }
  0xdb   :  { %v447_v26 = vpack.c.bf16 %v382_v25, %v380_v24  ;;  %v248_v24 = vld [vmem:[%s4599_s26 + $0x8] sm:$0xff] }
  0xdc   :  { %v349_v57 = vpop.f32.mrf.mxu0 }
  0xdd   :  { %v476_v28 = vsel %vm326_vm0, %v447_v26, 0  ;;  %v350_v59 = vadd.f32 %v2746_v30, %v349_v57 }
  0xde   :  { %484 = vmatpush.bf16.xpose.msra.mxu3 %v476_v28  ;;  %v249_v28 = vld [vmem:[%s4599_s26 + $0x10] sm:$0xff] }
  0xdf   :  { %v431_v63 = vmul.f32 %v350_v59, %v3498_v61  ;;  %v433_v6 = vmul.f32 %v350_v59, %v3505_v4  ;;  %v435_v13 = vmul.f32 %v350_v59, %v3512_v9  ;;  %v437_v18 = vmul.f32 %v350_v59, %v3519_v16  ;;  %v2705_v59 = vld [vmem:[#allocation7 + $0x8] sm:$0xff] }
  0xe0   :  { %409 = vmatpush.bf16.msra.mxu2 %v2705_v59 }
  0xe1   :  { %v442_v0 = vpack.c.bf16 %v431_v63, %v430_v62  ;;  %v443_v7 = vpack.c.bf16 %v433_v6, %v432_v5  ;;  %v444_v14 = vpack.c.bf16 %v435_v13, %v434_v10  ;;  %v445_v19 = vpack.c.bf16 %v437_v18, %v436_v17  ;;  %v255_v63 = vld [vmem:[%s4599_s26 + $0x40] sm:$0xff] }
  0xe2   :  { %v312_v13 = vpack.c.bf16 %v3448_v12, %v3443_v11  ;;  %v256_v11 = vld [vmem:[%s4599_s26 + $0x48] sm:$0xff] }
  0xe6   :  { %485 = vmatpush.bf16.xpose.msra.mxu3 %v473_v37 }
  0xed   :  { %2530 = vmatmul.msk.bf16.vlgmr.msra.gmra.mxu3 %vm326_vm0, %v438_v40 }
  0xfd   :  { %2531 = vmatmul.msk.bf16.gmra.mxu3 %vm326_vm0, %v439_v45 }
 0x10d   :  { %2532 = vmatmul.msk.bf16.gmra.mxu3 %vm326_vm0, %v440_v50  ;;  %v253_v50 = vld [vmem:[%s4599_s26 + $0x30] sm:$0xff] }
 0x11d   :  { %2533 = vmatmul.msk.bf16.gmra.mxu3 %vm326_vm0, %v441_v56  ;;  %v254_v56 = vld [vmem:[%s4599_s26 + $0x38] sm:$0xff] }
 0x12d   :  { %2534 = vmatmul.msk.bf16.gmra.mxu3 %vm326_vm0, %v442_v0  ;;  %v2704_v0 = vld [vmem:[#allocation7] sm:$0xff] }
 0x12e   :  { %410 = vmatpush.bf16.msra.mxu2 %v2704_v0 }
 0x13d   :  { %2535 = vmatmul.msk.bf16.gmra.mxu3 %vm326_vm0, %v443_v7  ;;  %v311_v7 = vpack.c.bf16 %v3422_v2, %v3417_v1 }
 0x13f   :  { %2528 = vmatmul.msk.bf16.vlgmr.msra.gmra.mxu2 %vm326_vm0, %v311_v7 }
 0x14d   :  { %2536 = vmatmul.msk.bf16.gmra.mxu3 %vm326_vm0, %v444_v14 }
 0x14f   :  { %2529 = vmatmul.msk.bf16.gmra.mxu2 %vm326_vm0, %v312_v13 }
 0x15d   :  { %2537 = vmatmul.msk.bf16.gmra.mxu3 %vm326_vm0, %v445_v19 }
 0x170   :  { %v487_v21 = vpop.f32.mrf.mxu3 }
 0x171   :  { %v488_v22 = vadd.f32 %v487_v21, %v247_v20 }
 0x173   :  { %v527_v23 = vsel %vm326_vm0, %v488_v22, -inf }
 0x174   :  { %528 = vmax.xlane.f32.xlu0 %v527_v23 }
 0x178   :  { %v489_v25 = vpop.f32.mrf.mxu3 }
 0x179   :  { %v490_v26 = vadd.f32 %v489_v25, %v248_v24 }
 0x17b   :  { %v530_v27 = vsel %vm326_vm0, %v490_v26, -inf }
 0x17c   :  { %531 = vmax.xlane.f32.xlu0 %v530_v27 }
 0x180   :  { %v492_v29 = vpop.f32.mrf.mxu3 }
 0x181   :  { %v493_v30 = vadd.f32 %v492_v29, %v249_v28 }
 0x183   :  { %v533_v31 = vsel %vm326_vm0, %v493_v30, -inf }
 0x184   :  { %534 = vmax.xlane.f32.xlu1 %v533_v31  ;;  %v257_v31 = vld [vmem:[%s4599_s26 + $0x50] sm:$0xff] }
 0x188   :  { %v494_v33 = vpop.f32.mrf.mxu3 }
 0x189   :  { %v3539_v34 = vadd.f32 %v494_v33, %v250_v32 }
 0x18b   :  { %v536_v37 = vsel %vm326_vm0, %v3539_v34, -inf }
 0x18c   :  { %537 = vmax.xlane.f32.xlu1 %v536_v37 }
 0x190   :  { %v497_v39 = vpop.f32.mrf.mxu3 }
 0x191   :  { %v3546_v40 = vadd.f32 %v497_v39, %v251_v38 }
 0x193   :  { %v539_v43 = vsel %vm326_vm0, %v3546_v40, -inf }
 0x194   :  { %540 = vmax.xlane.f32.xlu2 %v539_v43 }
 0x198   :  { %v499_v45 = vpop.f32.mrf.mxu3 }
 0x199   :  { %v3553_v48 = vadd.f32 %v499_v45, %v252_v44  ;;  %v258_v45 = vld [vmem:[%s4599_s26 + $0x58] sm:$0xff] }
 0x19b   :  { %v542_v49 = vsel %vm326_vm0, %v3553_v48, -inf }
 0x19c   :  { %543 = vmax.xlane.f32.xlu2 %v542_v49 }
 0x1a0   :  { %v502_v53 = vpop.f32.mrf.mxu3 }
 0x1a1   :  { %v3560_v54 = vadd.f32 %v502_v53, %v253_v50 }
 0x1a3   :  { %v545_v55 = vsel %vm326_vm0, %v3560_v54, -inf }
 0x1a4   :  { %546 = vmax.xlane.f32.xlu0 %v545_v55 }
 0x1a8   :  { %v504_v57 = vpop.f32.mrf.mxu3 }
 0x1a9   :  { %v3567_v58 = vadd.f32 %v504_v57, %v254_v56 }
 0x1ab   :  { %v548_v62 = vsel %vm326_vm0, %v3567_v58, -inf }
 0x1ac   :  { %549 = vmax.xlane.f32.xlu1 %v548_v62  ;;  %v259_v62 = vld [vmem:[%s4599_s26 + $0x60] sm:$0xff] }
 0x1b0   :  { %v507_v5 = vpop.f32.mrf.mxu3 }
 0x1b1   :  { %v3574_v6 = vadd.f32 %v507_v5, %v255_v63 }
 0x1b3   :  { %v551_v10 = vsel %vm326_vm0, %v3574_v6, -inf }
 0x1b4   :  { %552 = vmax.xlane.f32.xlu1 %v551_v10 }
 0x1b8   :  { %v509_v17 = vpop.f32.mrf.mxu3 }
 0x1b9   :  { %v3591_v12 = vadd.f32 %v509_v17, %v256_v11  ;;  %v260_v17 = vld [vmem:[%s4599_s26 + $0x68] sm:$0xff]  ;;  %v261_v11 = vld [vmem:[%s4599_s26 + $0x70] sm:$0xff] }
 0x1bb   :  { %v554_v28 = vsel %vm326_vm0, %v3591_v12, -inf }
 0x1c0   :  { %v512_v1 = vpop.f32.mrf.mxu3 }
 0x1c1   :  { %v3602_v33 = vadd.f32 %v512_v1, %v257_v31 }
 0x1c3   :  { %v557_v43 = vsel %vm326_vm0, %v3602_v33, -inf }
 0x1c8   :  { %v514_v32 = vpop.f32.mrf.mxu3 }
 0x1c9   :  { %v3614_v50 = vadd.f32 %v514_v32, %v258_v45  ;;  %v262_v32 = vld [vmem:[%s4599_s26 + $0x78] sm:$0xff] }
 0x1cb   :  { %v560_v59 = vsel %vm326_vm0, %v3614_v50, -inf }
 0x1d0   :  { %v517_v49 = vpop.f32.mrf.mxu3 }
 0x1d1   :  { %v3626_v63 = vadd.f32 %v517_v49, %v259_v62 }
 0x1e7   :  { %v529_v14 = vpop.xlane.xlu0 %528 }
 0x1e8   :  { %v575_v18 = vsub.f32 %v488_v22, %v529_v14  ;;  %v563_v14 = vsel %vm326_vm0, %v3626_v63, -inf }
 0x1ea   :  { %v591_v19 = vmul.f32 1.442695, %v575_v18 }
 0x1ec   :  { %2767 = vpow2.f32 %v591_v19 }
 0x1ef   :  { %v532_v20 = vpop.xlane.xlu0 %531 }
 0x1f0   :  { %v576_v21 = vsub.f32 %v490_v26, %v532_v20 }
 0x1f2   :  { %v3584_v23 = vpop.eup %2767  ;;  %v593_v2 = vmul.f32 1.442695, %v576_v21 }
 0x1f3   :  { %v623_v24 = vsel %vm326_vm0, %v3584_v23, 0.0 }
 0x1f4   :  { %2769 = vpow2.f32 %v593_v2  ;;  %624 = vadd.xlane.f32.xlu2 %v623_v24 }
 0x1f7   :  { %v535_v22 = vpop.xlane.xlu1 %534 }
 0x1f8   :  { %v577_v25 = vsub.f32 %v493_v30, %v535_v22 }
 0x1fa   :  { %v3593_v27 = vpop.eup %2769  ;;  %v595_v26 = vmul.f32 1.442695, %v577_v25 }
 0x1fb   :  { %v626_v29 = vsel %vm326_vm0, %v3593_v27, 0.0 }
 0x1fc   :  { %2771 = vpow2.f32 %v595_v26  ;;  %555 = vmax.xlane.f32.xlu2 %v554_v28  ;;  %627 = vadd.xlane.f32.xlu0 %v626_v29 }
 0x1ff   :  { %v538_v30 = vpop.xlane.xlu1 %537 }
 0x200   :  { %v578_v37 = vsub.f32 %v3539_v34, %v538_v30 }
 0x202   :  { %v3605_v38 = vpop.eup %2771  ;;  %v597_v39 = vmul.f32 1.442695, %v578_v37 }
 0x203   :  { %v629_v44 = vsel %vm326_vm0, %v3605_v38, 0.0 }
 0x204   :  { %2773 = vpow2.f32 %v597_v39  ;;  %558 = vmax.xlane.f32.xlu2 %v557_v43  ;;  %630 = vadd.xlane.f32.xlu0 %v629_v44 }
 0x207   :  { %v541_v34 = vpop.xlane.xlu2 %540 }
 0x208   :  { %v579_v53 = vsub.f32 %v3546_v40, %v541_v34  ;;  %v519_v40 = vpop.f32.mrf.mxu3 }
 0x209   :  { %v3638_v18 = vadd.f32 %v519_v40, %v260_v17 }
 0x20a   :  { %v3617_v55 = vpop.eup %2773  ;;  %v599_v56 = vmul.f32 1.442695, %v579_v53 }
 0x20b   :  { %v632_v57 = vsel %vm326_vm0, %v3617_v55, 0.0  ;;  %v566_v2 = vsel %vm326_vm0, %v3638_v18, -inf }
 0x20c   :  { %2775 = vpow2.f32 %v599_v56  ;;  %633 = vadd.xlane.f32.xlu1 %v632_v57  ;;  %561 = vmax.xlane.f32.xlu0 %v560_v59  ;;  %v412_v56 = vpop.f32.mrf.mxu2  ;;  %v2747_v59 = vld [vmem:[%s4558_s10] ss:$0 sm:$0xff] }
 0x20f   :  { %v544_v0 = vpop.xlane.xlu2 %543 }
 0x210   :  { %v580_v5 = vsub.f32 %v3553_v48, %v544_v0  ;;  %v522_v21 = vpop.f32.mrf.mxu3 }
 0x211   :  { %v3650_v22 = vadd.f32 %v522_v21, %v261_v11 }
 0x212   :  { %v3629_v7 = vpop.eup %2775  ;;  %v601_v10 = vmul.f32 1.442695, %v580_v5  ;;  %v413_v5 = vadd.f32 %v2747_v59, %v412_v56 }
 0x213   :  { %v635_v13 = vsel %vm326_vm0, %v3629_v7, 0.0  ;;  %v569_v29 = vsel %vm326_vm0, %v3650_v22, -inf }
 0x214   :  { %2777 = vpow2.f32 %v601_v10  ;;  %636 = vadd.xlane.f32.xlu1 %v635_v13  ;;  %564 = vmax.xlane.f32.xlu0 %v563_v14 }
 0x217   :  { %v547_v19 = vpop.xlane.xlu0 %546 }
 0x218   :  { %v581_v48 = vsub.f32 %v3560_v54, %v547_v19  ;;  %v524_v30 = vpop.f32.mrf.mxu3 }
 0x219   :  { %v3662_v37 = vadd.f32 %v524_v30, %v262_v32 }
 0x21a   :  { %v3641_v20 = vpop.eup %2777  ;;  %v603_v1 = vmul.f32 1.442695, %v581_v48 }
 0x21b   :  { %v638_v24 = vsel %vm326_vm0, %v3641_v20, 0.0  ;;  %v572_v49 = vsel %vm326_vm0, %v3662_v37, -inf }
 0x21c   :  { %2779 = vpow2.f32 %v603_v1  ;;  %567 = vmax.xlane.f32.xlu1 %v566_v2  ;;  %639 = vadd.xlane.f32.xlu2 %v638_v24 }
 0x21f   :  { %v550_v54 = vpop.xlane.xlu1 %549 }
 0x220   :  { %v582_v25 = vsub.f32 %v3567_v58, %v550_v54 }
 0x222   :  { %v3653_v26 = vpop.eup %2779  ;;  %v605_v28 = vmul.f32 1.442695, %v582_v25 }
 0x223   :  { %v641_v31 = vsel %vm326_vm0, %v3653_v26, 0.0 }
 0x224   :  { %2781 = vpow2.f32 %v605_v28  ;;  %570 = vmax.xlane.f32.xlu1 %v569_v29  ;;  %642 = vadd.xlane.f32.xlu2 %v641_v31 }
 0x227   :  { %v553_v58 = vpop.xlane.xlu1 %552 }
 0x228   :  { %v583_v39 = vsub.f32 %v3574_v6, %v553_v58  ;;  %v414_v6 = vpop.f32.mrf.mxu2 }
 0x229   :  { %v415_v10 = vadd.f32 %v2747_v59, %v414_v6 }
 0x22a   :  { %v3665_v43 = vpop.eup %2781  ;;  %v607_v44 = vmul.f32 1.442695, %v583_v39 }
 0x22b   :  { %v644_v45 = vsel %vm326_vm0, %v3665_v43, 0.0  ;;  %v711_v14 = vpack.c.bf16 %v415_v10, %v413_v5 }
 0x22c   :  { %2783 = vpow2.f32 %v607_v44  ;;  %645 = vadd.xlane.f32.xlu0 %v644_v45  ;;  %573 = vmax.xlane.f32.xlu2 %v572_v49  ;;  %v3700_v44 = vld [vmem:[#allocation4 + $0x8] sm:$0xff] }
 0x230   :  { %v417_v57 = vpop.f32.mrf.mxu2 }
 0x231   :  { %v418_v62 = vadd.f32 %v2747_v59, %v417_v57 }
 0x232   :  { %v3671_v34 = vpop.eup %2783 }
 0x233   :  { %v647_v53 = vsel %vm326_vm0, %v3671_v34, 0.0 }
 0x234   :  { %648 = vadd.xlane.f32.xlu0 %v647_v53  ;;  %v3705_v53 = vld [vmem:[#allocation4] sm:$0xff] }
 0x238   :  { %v419_v0 = vpop.f32.mrf.mxu2 }
 0x239   :  { %v420_v40 = vadd.f32 %v2747_v59, %v419_v0 }
 0x23b   :  { %v712_v13 = vpack.c.bf16 %v420_v40, %v418_v62 }
 0x23d   :  { %743 = vmatpush.bf16.msrb.mxu0 %v712_v13 }
 0x241   :  { %744 = vmatpush.bf16.msrb.mxu0 %v711_v14 }
 0x267   :  { %v625_v17 = vpop.xlane.xlu2 %624 }
 0x268   :  { %2785 = vrcp.f32 %v625_v17 }
 0x26e   :  { %v2786_v2 = vpop.eup %2785 }
 0x26f   :  { %v556_v19 = vpop.xlane.xlu2 %555  ;;  %v628_v48 = vpop.xlane.xlu0 %627  ;;  %v3680_v11 = vmul.f32 %v2786_v2, %v3584_v23  ;;  %v3693_v23 = vld [vmem:[#allocation4 + $0x18] sm:$0xff] }
 0x270   :  { %v584_v21 = vsub.f32 %v3591_v12, %v556_v19  ;;  %2787 = vrcp.f32 %v628_v48  ;;  %980 = vmatpush.msrb.mxu2 %v3693_v23 }
 0x272   :  { %v609_v1 = vmul.f32 1.442695, %v584_v21 }
 0x274   :  { %2789 = vpow2.f32 %v609_v1 }
 0x276   :  { %v2788_v24 = vpop.eup %2787 }
 0x277   :  { %v3683_v54 = vmul.f32 %v2788_v24, %v3593_v27  ;;  %v559_v25 = vpop.xlane.xlu2 %558  ;;  %v631_v28 = vpop.xlane.xlu0 %630  ;;  %v3696_v27 = vld [vmem:[#allocation4 + $0x10] sm:$0xff] }
 0x278   :  { %v585_v29 = vsub.f32 %v3602_v33, %v559_v25  ;;  %981 = vmatpush.msrb.mxu2 %v3696_v27 }
 0x279   :  { %v703_v31 = vpack.c.bf16 %v3683_v54, %v3680_v11 }
 0x27a   :  { %v3688_v32 = vpop.eup %2789  ;;  %v611_v12 = vmul.f32 1.442695, %v585_v29  ;;  %982 = vmatpush.msrb.mxu2 %v3700_v44 }
 0x27b   :  { %2538 = vmatmul.msk.bf16.vlgmr.msrb.gmra.mxu0 %vm326_vm0, %v703_v31  ;;  %v650_v30 = vsel %vm326_vm0, %v3688_v32, 0.0 }
 0x27c   :  { %2791 = vpow2.f32 %v611_v12  ;;  %651 = vadd.xlane.f32.xlu1 %v650_v30  ;;  %983 = vmatpush.msrb.mxu2 %v3705_v53 }
 0x27d   :  { %2793 = vrcp.f32 %v631_v28 }
 0x27f   :  { %v634_v33 = vpop.xlane.xlu1 %633  ;;  %v562_v58 = vpop.xlane.xlu0 %561 }
 0x280   :  { %2795 = vrcp.f32 %v634_v33  ;;  %v586_v39 = vsub.f32 %v3614_v50, %v562_v58 }
 0x282   :  { %v3703_v45 = vpop.eup %2791  ;;  %v613_v49 = vmul.f32 1.442695, %v586_v39 }
 0x283   :  { %v653_v56 = vsel %vm326_vm0, %v3703_v45, 0.0  ;;  %v2794_v6 = vpop.eup %2793 }
 0x284   :  { %2797 = vpow2.f32 %v613_v49  ;;  %654 = vadd.xlane.f32.xlu2 %v653_v56  ;;  %v689_v62 = vmul.f32 %v2794_v6, %v3605_v38 }
 0x286   :  { %v2796_v57 = vpop.eup %2795  ;;  %v929_v30 = vsel %vm326_vm0, %v689_v62, 0.0 }
 0x287   :  { %v637_v59 = vpop.xlane.xlu1 %636  ;;  %v565_v50 = vpop.xlane.xlu0 %564  ;;  %v690_v0 = vmul.f32 %v2796_v57, %v3617_v55 }
 0x288   :  { %v587_v40 = vsub.f32 %v3626_v63, %v565_v50 }
 0x289   :  { %v704_v5 = vpack.c.bf16 %v690_v0, %v689_v62 }
 0x28a   :  { %v3713_v10 = vpop.eup %2797  ;;  %v615_v13 = vmul.f32 1.442695, %v587_v40 }
 0x28b   :  { %2539 = vmatmul.msk.bf16.gmra.mxu0 %vm326_vm0, %v704_v5  ;;  %v656_v14 = vsel %vm326_vm0, %v3713_v10, 0.0 }
 0x28c   :  { %2799 = vpow2.f32 %v615_v13  ;;  %657 = vadd.xlane.f32.xlu0 %v656_v14 }
 0x28d   :  { %2801 = vrcp.f32 %v637_v59 }
 0x28f   :  { %v568_v17 = vpop.xlane.xlu1 %567  ;;  %v640_v19 = vpop.xlane.xlu2 %639 }
 0x290   :  { %v588_v38 = vsub.f32 %v3638_v18, %v568_v17  ;;  %2803 = vrcp.f32 %v640_v19 }
 0x292   :  { %v3719_v55 = vpop.eup %2799  ;;  %v617_v63 = vmul.f32 1.442695, %v588_v38 }
 0x293   :  { %v659_v48 = vsel %vm326_vm0, %v3719_v55, 0.0  ;;  %v2802_v21 = vpop.eup %2801 }
 0x294   :  { %2805 = vpow2.f32 %v617_v63  ;;  %660 = vadd.xlane.f32.xlu1 %v659_v48  ;;  %v691_v25 = vmul.f32 %v2802_v21, %v3629_v7  ;;  %v928_v7 = vsel %vm326_vm0, %v3680_v11, 0.0  ;;  %v936_v11 = vsel %vm326_vm0, %v690_v0, 0.0 }
 0x295   :  { %v930_v58 = vadd.f32 %v929_v30, %v928_v7 }
 0x296   :  { %v2804_v1 = vpop.eup %2803 }
 0x297   :  { %v571_v2 = vpop.xlane.xlu1 %570  ;;  %v643_v24 = vpop.xlane.xlu2 %642  ;;  %v692_v28 = vmul.f32 %v2804_v1, %v3641_v20  ;;  %v931_v20 = vsel %vm326_vm0, %v691_v25, 0.0  ;;  %v2706_v1 = vld [vmem:[#allocation9] sm:$0xff] }
 0x298   :  { %v589_v29 = vsub.f32 %v3650_v22, %v571_v2  ;;  %2807 = vrcp.f32 %v643_v24  ;;  %v932_v6 = vadd.f32 %v931_v20, %v930_v58 }
 0x299   :  { %v705_v18 = vpack.c.bf16 %v692_v28, %v691_v25 }
 0x29a   :  { %v3726_v31 = vpop.eup %2805  ;;  %v619_v12 = vmul.f32 1.442695, %v589_v29 }
 0x29b   :  { %2540 = vmatmul.msk.bf16.gmra.mxu0 %vm326_vm0, %v705_v18  ;;  %v662_v33 = vsel %vm326_vm0, %v3726_v31, 0.0 }
 0x29c   :  { %2809 = vpow2.f32 %v619_v12  ;;  %663 = vadd.xlane.f32.xlu2 %v662_v33 }
 0x29e   :  { %v2808_v22 = vpop.eup %2807 }
 0x29f   :  { %v693_v39 = vmul.f32 %v2808_v22, %v3653_v26  ;;  %v574_v49 = vpop.xlane.xlu2 %573  ;;  %v646_v56 = vpop.xlane.xlu0 %645  ;;  %v935_v26 = vsel %vm326_vm0, %v3683_v54, 0.0  ;;  %v2707_v54 = vld [vmem:[#allocation9 + $0x8] sm:$0xff] }
 0x2a0   :  { %v590_v57 = vsub.f32 %v3662_v37, %v574_v49  ;;  %2811 = vrcp.f32 %v646_v56  ;;  %v938_v37 = vsel %vm326_vm0, %v692_v28, 0.0  ;;  %v937_v14 = vadd.f32 %v936_v11, %v935_v26  ;;  %852 = vmatpush.bf16.msrb.mxu1 %v2707_v54 }
 0x2a1   :  { %v933_v59 = vsel %vm326_vm0, %v693_v39, 0.0 }
 0x2a2   :  { %v3738_v50 = vpop.eup %2809  ;;  %v621_v62 = vmul.f32 1.442695, %v590_v57  ;;  %v934_v40 = vadd.f32 %v933_v59, %v932_v6  ;;  %v939_v19 = vadd.f32 %v938_v37, %v937_v14 }
 0x2a3   :  { %v665_v5 = vsel %vm326_vm0, %v3738_v50, 0.0 }
 0x2a4   :  { %2813 = vpow2.f32 %v621_v62  ;;  %2562 = vmatmul.msk.f32.vlgmr.msrb.gmra.mxu2 %vm326_vm0, %v934_v40  ;;  %666 = vadd.xlane.f32.xlu0 %v665_v5 }
 0x2a5   :  { %853 = vmatpush.bf16.msrb.mxu1 %v2706_v1 }
 0x2a6   :  { %v2812_v13 = vpop.eup %2811 }
 0x2a7   :  { %v694_v17 = vmul.f32 %v2812_v13, %v3665_v43  ;;  %v649_v43 = vpop.xlane.xlu0 %648 }
 0x2a8   :  { %2815 = vrcp.f32 %v649_v43 }
 0x2a9   :  { %v706_v38 = vpack.c.bf16 %v694_v17, %v693_v39  ;;  %v940_v0 = vsel %vm326_vm0, %v694_v17, 0.0 }
 0x2aa   :  { %v3749_v63 = vpop.eup %2813  ;;  %v941_v48 = vadd.f32 %v940_v0, %v939_v19 }
 0x2ab   :  { %2541 = vmatmul.msk.bf16.gmra.mxu0 %vm326_vm0, %v706_v38  ;;  %v668_v21 = vsel %vm326_vm0, %v3749_v63, 0.0 }
 0x2ac   :  { %669 = vadd.xlane.f32.xlu1 %v668_v21  ;;  %2563 = vmatmul.msk.f32.gmra.mxu2 %vm326_vm0, %v941_v48 }
 0x2ae   :  { %v2816_v24 = vpop.eup %2815 }
 0x2af   :  { %v695_v28 = vmul.f32 %v2816_v24, %v3671_v34 }
 0x2ef   :  { %v652_v2 = vpop.xlane.xlu1 %651 }
 0x2f0   :  { %2817 = vrcp.f32 %v652_v2 }
 0x2f6   :  { %v2818_v25 = vpop.eup %2817 }
 0x2f7   :  { %v696_v29 = vmul.f32 %v2818_v25, %v3688_v32  ;;  %v655_v30 = vpop.xlane.xlu2 %654 }
 0x2f8   :  { %v746_v18 = vpop.f32.mrf.mxu0  ;;  %2819 = vrcp.f32 %v655_v30 }
 0x2f9   :  { %v707_v12 = vpack.c.bf16 %v696_v29, %v695_v28  ;;  %v786_v20 = vmul.f32 %v746_v18, %v3467_v35  ;;  %v949_v24 = vsel %vm326_vm0, %v696_v29, 0.0 }
 0x2fb   :  { %2542 = vmatmul.msk.bf16.gmra.mxu0 %vm326_vm0, %v707_v12 }
 0x2fe   :  { %v2820_v39 = vpop.eup %2819 }
 0x2ff   :  { %v658_v33 = vpop.xlane.xlu0 %657  ;;  %v697_v32 = vmul.f32 %v2820_v39, %v3703_v45 }
 0x300   :  { %2821 = vrcp.f32 %v658_v33  ;;  %v748_v7 = vpop.f32.mrf.mxu0 }
 0x301   :  { %v787_v22 = vmul.f32 %v748_v7, %v3469_v36  ;;  %v943_v14 = vsel %vm326_vm0, %v697_v32, 0.0 }
 0x303   :  { %v802_v58 = vpack.c.bf16 %v787_v22, %v786_v20 }
 0x305   :  { %2554 = vmatmul.msk.bf16.vlgmr.msrb.gmra.mxu1 %vm326_vm0, %v802_v58 }
 0x306   :  { %v2822_v34 = vpop.eup %2821 }
 0x307   :  { %v698_v49 = vmul.f32 %v2822_v34, %v3713_v10  ;;  %v661_v57 = vpop.xlane.xlu1 %660 }
 0x308   :  { %v751_v56 = vpop.f32.mrf.mxu0  ;;  %2823 = vrcp.f32 %v661_v57 }
 0x309   :  { %v708_v6 = vpack.c.bf16 %v698_v49, %v697_v32  ;;  %v788_v36 = vmul.f32 %v751_v56, %v3475_v41  ;;  %v942_v41 = vsel %vm326_vm0, %v695_v28, 0.0  ;;  %v950_v43 = vsel %vm326_vm0, %v698_v49, 0.0 }
 0x30a   :  { %v944_v19 = vadd.f32 %v943_v14, %v942_v41  ;;  %v951_v28 = vadd.f32 %v950_v43, %v949_v24 }
 0x30b   :  { %2543 = vmatmul.msk.bf16.gmra.mxu0 %vm326_vm0, %v708_v6 }
 0x30e   :  { %v2824_v11 = vpop.eup %2823 }
 0x30f   :  { %v664_v59 = vpop.xlane.xlu2 %663  ;;  %v699_v10 = vmul.f32 %v2824_v11, %v3719_v55 }
 0x310   :  { %2825 = vrcp.f32 %v664_v59  ;;  %v753_v35 = vpop.f32.mrf.mxu0 }
 0x311   :  { %v789_v62 = vmul.f32 %v753_v35, %v3477_v42  ;;  %v945_v42 = vsel %vm326_vm0, %v699_v10, 0.0 }
 0x312   :  { %v946_v48 = vadd.f32 %v945_v42, %v944_v19  ;;  %v3803_v42 = vld [vmem:[#allocation10] ss:$0 sm:$0xff] }
 0x313   :  { %v803_v40 = vpack.c.bf16 %v789_v62, %v788_v36 }
 0x315   :  { %2555 = vmatmul.msk.bf16.gmra.mxu1 %vm326_vm0, %v803_v40 }
 0x316   :  { %v2826_v45 = vpop.eup %2825 }
 0x317   :  { %v667_v5 = vpop.xlane.xlu0 %666  ;;  %v700_v26 = vmul.f32 %v2826_v45, %v3726_v31 }
 0x318   :  { %2827 = vrcp.f32 %v667_v5  ;;  %v756_v37 = vpop.f32.mrf.mxu0 }
 0x319   :  { %v709_v13 = vpack.c.bf16 %v700_v26, %v699_v10  ;;  %v790_v31 = vmul.f32 %v756_v37, %v3482_v46 }
 0x31b   :  { %2544 = vmatmul.msk.bf16.gmra.mxu0 %vm326_vm0, %v709_v13 }
 0x31e   :  { %v2828_v17 = vpop.eup %2827 }
 0x31f   :  { %v670_v38 = vpop.xlane.xlu1 %669  ;;  %v701_v0 = vmul.f32 %v2828_v17, %v3738_v50  ;;  %v952_v50 = vsel %vm326_vm0, %v700_v26, 0.0 }
 0x320   :  { %2829 = vrcp.f32 %v670_v38  ;;  %v758_v55 = vpop.f32.mrf.mxu0 }
 0x321   :  { %v791_v21 = vmul.f32 %v758_v55, %v3484_v47  ;;  %v947_v54 = vsel %vm326_vm0, %v701_v0, 0.0  ;;  %v953_v47 = vadd.f32 %v952_v50, %v951_v28 }
 0x322   :  { %v948_v1 = vadd.f32 %v947_v54, %v946_v48 }
 0x323   :  { %v804_v2 = vpack.c.bf16 %v791_v21, %v790_v31 }
 0x324   :  { %2564 = vmatmul.msk.f32.gmra.mxu2 %vm326_vm0, %v948_v1 }
 0x325   :  { %2556 = vmatmul.msk.bf16.gmra.mxu1 %vm326_vm0, %v804_v2 }
 0x326   :  { %v2830_v25 = vpop.eup %2829 }
 0x327   :  { %v702_v46 = vmul.f32 %v2830_v25, %v3749_v63  ;;  %v2938_v25 = vld [vmem:[%s4595_s24 + $0x8] sm:$0xff] }
 0x328   :  { %v761_v18 = vpop.f32.mrf.mxu0 }
 0x329   :  { %v710_v12 = vpack.c.bf16 %v702_v46, %v701_v0  ;;  %v954_v30 = vsel %vm326_vm0, %v702_v46, 0.0  ;;  %v792_v29 = vmul.f32 %v761_v18, %v3489_v51 }
 0x32a   :  { %v955_v33 = vadd.f32 %v954_v30, %v953_v47  ;;  %v3243_v30 = vmov 32.0  }
 0x32b   :  { %2545 = vmatmul.msk.bf16.gmra.mxu0 %vm326_vm0, %v710_v12  ;;  %2831 = vrcp.f32 %v3243_v30 }
 0x32c   :  { %2565 = vmatmul.msk.f32.gmra.mxu2 %vm326_vm0, %v955_v33 }
 0x330   :  { %v763_v7 = vpop.f32.mrf.mxu0 }
 0x331   :  { %v793_v20 = vmul.f32 %v763_v7, %v3491_v52  ;;  %v2832_v33 = vpop.eup %2831 }
 0x332   :  { %vm1039_vm1 = vweird.f32 %v2832_v33 }
 0x333   :  { %v805_v22 = vpack.c.bf16 %v793_v20, %v792_v29  ;;  %v1035_v29 = vmul.f32 32.0, %v2832_v33 }
 0x335   :  { %2557 = vmatmul.msk.bf16.gmra.mxu1 %vm326_vm0, %v805_v22  ;;  %v1036_v20 = vsub.f32 1.0, %v1035_v29 }
 0x378   :  { %v766_v58 = vpop.f32.mrf.mxu0 }
 0x379   :  { %v794_v39 = vmul.f32 %v766_v58, %v3496_v60  ;;  %v1037_v58 = vmul.f32 %v2832_v33, %v1036_v20 }
 0x380   :  { %v768_v63 = vpop.f32.mrf.mxu0 }
 0x381   :  { %v795_v34 = vmul.f32 %v768_v63, %v3498_v61  ;;  %v1038_v63 = vadd.f32 %v2832_v33, %v1037_v58 }
 0x382   :  { %v855_v32 = vpop.f32.mrf.mxu1 }
 0x383   :  { %v806_v49 = vpack.c.bf16 %v795_v34, %v794_v39  ;;  %v3821_v34 = vsel %vm1039_vm1, %v2832_v33, %v1038_v63 }
 0x385   :  { %2558 = vmatmul.msk.bf16.gmra.mxu1 %vm326_vm0, %v806_v49 }
 0x388   :  { %v771_v56 = vpop.f32.mrf.mxu0 }
 0x389   :  { %v796_v51 = vmul.f32 %v771_v56, %v3503_v3 }
 0x38a   :  { %v857_v6 = vpop.f32.mrf.mxu1 }
 0x38b   :  { %v902_v48 = vsel %vm326_vm0, %v857_v6, 0.0 }
 0x390   :  { %v773_v57 = vpop.f32.mrf.mxu0 }
 0x391   :  { %v797_v52 = vmul.f32 %v773_v57, %v3505_v4  ;;  %v895_v4 = vsel %vm326_vm0, %v855_v32, 0.0 }
 0x392   :  { %v860_v59 = vpop.f32.mrf.mxu1 }
 0x393   :  { %v807_v35 = vpack.c.bf16 %v797_v52, %v796_v51  ;;  %v896_v3 = vsel %vm326_vm0, %v860_v59, 0.0 }
 0x394   :  { %v897_v37 = vadd.f32 %v896_v3, %v895_v4 }
 0x395   :  { %2559 = vmatmul.msk.bf16.gmra.mxu1 %vm326_vm0, %v807_v35 }
 0x398   :  { %v776_v36 = vpop.f32.mrf.mxu0 }
 0x399   :  { %v798_v61 = vmul.f32 %v776_v36, %v3510_v8 }
 0x39a   :  { %v862_v62 = vpop.f32.mrf.mxu1 }
 0x39b   :  { %v903_v0 = vsel %vm326_vm0, %v862_v62, 0.0 }
 0x39c   :  { %v904_v31 = vadd.f32 %v903_v0, %v902_v48  ;;  %v2940_v0 = vld [vmem:[%s4595_s24 + $0x18] sm:$0xff] }
 0x3a0   :  { %v778_v60 = vpop.f32.mrf.mxu0 }
 0x3a1   :  { %v799_v40 = vmul.f32 %v778_v60, %v3512_v9 }
 0x3a2   :  { %v865_v11 = vpop.f32.mrf.mxu1 }
 0x3a3   :  { %v808_v45 = vpack.c.bf16 %v799_v40, %v798_v61  ;;  %v898_v26 = vsel %vm326_vm0, %v865_v11, 0.0 }
 0x3a4   :  { %v899_v41 = vadd.f32 %v898_v26, %v897_v37  ;;  %v2939_v26 = vld [vmem:[%s4595_s24 + $0x10] sm:$0xff] }
 0x3a5   :  { %2560 = vmatmul.msk.bf16.gmra.mxu1 %vm326_vm0, %v808_v45 }
 0x3a8   :  { %v781_v5 = vpop.f32.mrf.mxu0 }
 0x3a9   :  { %v800_v14 = vmul.f32 %v781_v5, %v3517_v15 }
 0x3aa   :  { %v867_v10 = vpop.f32.mrf.mxu1 }
 0x3ab   :  { %v905_v15 = vsel %vm326_vm0, %v867_v10, 0.0 }
 0x3ac   :  { %v906_v54 = vadd.f32 %v905_v15, %v904_v31 }
 0x3b0   :  { %v783_v13 = vpop.f32.mrf.mxu0 }
 0x3b1   :  { %v801_v8 = vmul.f32 %v783_v13, %v3519_v16  ;;  %v2937_v16 = vld [vmem:[%s4595_s24] sm:$0xff] }
 0x3b2   :  { %v870_v9 = vpop.f32.mrf.mxu1 }
 0x3b3   :  { %v809_v17 = vpack.c.bf16 %v801_v8, %v800_v14  ;;  %v900_v19 = vsel %vm326_vm0, %v870_v9, 0.0 }
 0x3b4   :  { %v901_v38 = vadd.f32 %v900_v19, %v899_v41 }
 0x3b5   :  { %2561 = vmatmul.msk.bf16.gmra.mxu1 %vm326_vm0, %v809_v17 }
 0x3b6   :  { %v924_v55 = vadd.f32 %v3803_v42, %v901_v38 }
 0x3b8   :  { %v1018_v21 = vadd.f32 %v2937_v16, %v924_v55 }
 0x3ba   :  { %v872_v1 = vpop.f32.mrf.mxu1  ;;  %v1022_v43 = vsel %vm326_vm0, %v1018_v21, 0.0 }
 0x3bb   :  { %v907_v2 = vsel %vm326_vm0, %v872_v1, 0.0  ;;  %1023 = vadd.xlane.f32.xlu2 %v1022_v43  ;;  %v2708_v43 = vld [vmem:[#allocation12] sm:$0xff] }
 0x3bc   :  { %v908_v24 = vadd.f32 %v907_v2, %v906_v54  ;;  %v2709_v54 = vld [vmem:[#allocation12 + $0x8] sm:$0xff] }
 0x3bd   :  { %1154 = vmatpush.bf16.msra.mxu2 %v2709_v54 }
 0x3be   :  { %v925_v50 = vadd.f32 %v3803_v42, %v908_v24 }
 0x3c0   :  { %v1019_v28 = vadd.f32 %v2938_v25, %v925_v50 }
 0x3c1   :  { %1155 = vmatpush.bf16.msra.mxu2 %v2708_v43 }
 0x3c2   :  { %v1025_v46 = vsel %vm326_vm0, %v1019_v28, 0.0 }
 0x3c3   :  { %1026 = vadd.xlane.f32.xlu0 %v1025_v46 }
 0x402   :  { %v875_v18 = vpop.f32.mrf.mxu1 }
 0x403   :  { %v909_v56 = vsel %vm326_vm0, %v875_v18, 0.0 }
 0x40a   :  { %v877_v47 = vpop.f32.mrf.mxu1 }
 0x40b   :  { %v916_v5 = vsel %vm326_vm0, %v877_v47, 0.0 }
 0x412   :  { %v880_v12 = vpop.f32.mrf.mxu1 }
 0x413   :  { %v910_v32 = vsel %vm326_vm0, %v880_v12, 0.0 }
 0x414   :  { %v911_v51 = vadd.f32 %v910_v32, %v909_v56 }
 0x41a   :  { %v882_v7 = vpop.f32.mrf.mxu1 }
 0x41b   :  { %v917_v61 = vsel %vm326_vm0, %v882_v7, 0.0 }
 0x41c   :  { %v918_v4 = vadd.f32 %v917_v61, %v916_v5 }
 0x422   :  { %v885_v22 = vpop.f32.mrf.mxu1 }
 0x423   :  { %v912_v6 = vsel %vm326_vm0, %v885_v22, 0.0 }
 0x424   :  { %v913_v59 = vadd.f32 %v912_v6, %v911_v51  ;;  %v2749_v51 = vld [vmem:[%s4565_s17] ss:$0 sm:$0xff] }
 0x42a   :  { %v887_v39 = vpop.f32.mrf.mxu1 }
 0x42b   :  { %v919_v10 = vsel %vm326_vm0, %v887_v39, 0.0 }
 0x42c   :  { %v920_v13 = vadd.f32 %v919_v10, %v918_v4 }
 0x42e   :  { %v1024_v49 = vpop.xlane.xlu2 %1023 }
 0x42f   :  { %v1041_v57 = vmul.f32 %v3821_v34, %v1024_v49 }
 0x431   :  { %v3827_v52 = vsub.f32 %v1018_v21, %v1041_v57 }
 0x432   :  { %v890_v35 = vpop.f32.mrf.mxu1 }
 0x433   :  { %v914_v36 = vsel %vm326_vm0, %v890_v35, 0.0  ;;  %v1049_v62 = vmul.f32 %v3827_v52, %v3827_v52 }
 0x434   :  { %v915_v60 = vadd.f32 %v914_v36, %v913_v59 }
 0x435   :  { %v1053_v40 = vsel %vm326_vm0, %v1049_v62, 0.0  ;;  %v2750_v62 = vld [vmem:[#allocation13] ss:$0 sm:$0xff] }
 0x436   :  { %v926_v11 = vadd.f32 %v3803_v42, %v915_v60  ;;  %1054 = vadd.xlane.f32.xlu0 %v1053_v40  ;;  %v1027_v45 = vpop.xlane.xlu0 %1026 }
 0x437   :  { %v1042_v3 = vmul.f32 %v3821_v34, %v1027_v45 }
 0x438   :  { %v1020_v37 = vadd.f32 %v2939_v26, %v926_v11 }
 0x439   :  { %v1046_v14 = vsub.f32 %v1019_v28, %v1042_v3 }
 0x43a   :  { %v892_v8 = vpop.f32.mrf.mxu1  ;;  %v1028_v41 = vsel %vm326_vm0, %v1020_v37, 0.0 }
 0x43b   :  { %v921_v9 = vsel %vm326_vm0, %v892_v8, 0.0  ;;  %1029 = vadd.xlane.f32.xlu1 %v1028_v41  ;;  %v1050_v38 = vmul.f32 %v1046_v14, %v1046_v14  ;;  %v2713_v41 = vld [vmem:[%s4563_s15 + $0x18] sm:$0xff] }
 0x43c   :  { %v922_v17 = vadd.f32 %v921_v9, %v920_v13  ;;  %v3876_v13 = vpop.f32.mrf.mxu2  ;;  %1209 = vmatpush.bf16.msrb.mxu2 %v2713_v41 }
 0x43d   :  { %v1056_v15 = vsel %vm326_vm0, %v1050_v38, 0.0 }
 0x43e   :  { %v927_v19 = vadd.f32 %v3803_v42, %v922_v17 }
 0x440   :  { %v1021_v55 = vadd.f32 %v2940_v0, %v927_v19  ;;  %v2712_v19 = vld [vmem:[%s4563_s15 + $0x10] sm:$0xff] }
 0x441   :  { %1210 = vmatpush.bf16.msrb.mxu2 %v2712_v19 }
 0x442   :  { %v1031_v48 = vsel %vm326_vm0, %v1021_v55, 0.0 }
 0x443   :  { %1032 = vadd.xlane.f32.xlu2 %v1031_v48  ;;  %1057 = vadd.xlane.f32.xlu1 %v1056_v15 }
 0x444   :  { %v3884_v15 = vpop.f32.mrf.mxu2 }
 0x4a9   :  { %v1055_v31 = vpop.xlane.xlu0 %1054 }
 0x4aa   :  { %v1065_v16 = vmul.f32 %v1055_v31, %v3821_v34  ;;  %v2711_v31 = vld [vmem:[%s4563_s15 + $0x8] sm:$0xff] }
 0x4ab   :  { %1211 = vmatpush.bf16.msrb.mxu2 %v2711_v31 }
 0x4ac   :  { %v1069_v21 = vadd.f32 1e-05, %v1065_v16 }
 0x4ae   :  { %2833 = vrsqrt.f32 %v1069_v21  ;;  %v1030_v1 = vpop.xlane.xlu1 %1029  ;;  %vm1079_vm3 = vweird.f32 %v1069_v21 }
 0x4af   :  { %v1043_v42 = vmul.f32 %v3821_v34, %v1030_v1  ;;  %v2710_v1 = vld [vmem:[%s4563_s15] sm:$0xff] }
 0x4b0   :  { %1212 = vmatpush.bf16.msrb.mxu2 %v2710_v1 }
 0x4b1   :  { %v3851_v2 = vsub.f32 %v1020_v37, %v1043_v42 }
 0x4b3   :  { %v1051_v24 = vmul.f32 %v3851_v2, %v3851_v2 }
 0x4b4   :  { %v2834_v50 = vpop.eup %2833 }
 0x4b5   :  { %v1074_v25 = vmul.f32 %v2834_v50, %v1069_v21  ;;  %v1059_v28 = vsel %vm326_vm0, %v1051_v24, 0.0  ;;  %vm1080_vm2 = vweird.f32 %v2834_v50 }
 0x4b6   :  { %1060 = vadd.xlane.f32.xlu2 %v1059_v28  ;;  %v1033_v46 = vpop.xlane.xlu2 %1032  ;;  %v1058_v18 = vpop.xlane.xlu1 %1057  ;;  %vm1081_vm4 = vmor %vm1079_vm3, %vm1080_vm2 }
 0x4b7   :  { %v1075_v47 = vmul.f32 %v2834_v50, %v1074_v25  ;;  %v1044_v12 = vmul.f32 %v3821_v34, %v1033_v46  ;;  %v1066_v30 = vmul.f32 %v1058_v18, %v3821_v34 }
 0x4b9   :  { %v3858_v33 = vsub.f32 %v1021_v55, %v1044_v12  ;;  %v1070_v7 = vadd.f32 1e-05, %v1066_v30  ;;  %v1076_v29 = vmul.f32 0.5, %v1075_v47 }
 0x4bb   :  { %2835 = vrsqrt.f32 %v1070_v7  ;;  %v1052_v20 = vmul.f32 %v3858_v33, %v3858_v33  ;;  %v1077_v58 = vsub.f32 1.5, %v1076_v29  ;;  %vm1089_vm6 = vweird.f32 %v1070_v7 }
 0x4bd   :  { %v1062_v22 = vsel %vm326_vm0, %v1052_v20, 0.0  ;;  %v1078_v39 = vmul.f32 %v2834_v50, %v1077_v58 }
 0x4be   :  { %1063 = vadd.xlane.f32.xlu0 %v1062_v22 }
 0x4bf   :  { %v1082_v56 = vsel %vm1081_vm4, %v2834_v50, %v1078_v39  ;;  %v3893_v50 = vpop.f32.mrf.mxu2 }
 0x4c0   :  { %v1113_v59 = vmul.f32 %v1082_v56, %v3827_v52 }
 0x4c1   :  { %v2836_v63 = vpop.eup %2835 }
 0x4c2   :  { %v1084_v32 = vmul.f32 %v2836_v63, %v1070_v7  ;;  %vm1090_vm5 = vweird.f32 %v2836_v63  ;;  %v1118_v60 = vmul.f32 %v2749_v51, %v1113_v59 }
 0x4c3   :  { %vm1091_vm7 = vmor %vm1089_vm6, %vm1090_vm5 }
 0x4c4   :  { %v1085_v49 = vmul.f32 %v2836_v63, %v1084_v32  ;;  %v3867_v11 = vadd.f32 %v2750_v62, %v1118_v60 }
 0x4c6   :  { %v1086_v6 = vmul.f32 0.5, %v1085_v49 }
 0x4c7   :  { %v3896_v7 = vpop.f32.mrf.mxu2 }
 0x4c8   :  { %v1087_v57 = vsub.f32 1.5, %v1086_v6 }
 0x4ca   :  { %v1088_v35 = vmul.f32 %v2836_v63, %v1087_v57 }
 0x4cc   :  { %v1092_v36 = vsel %vm1091_vm7, %v2836_v63, %v1088_v35  ;;  %v2752_v35 = vld [vmem:[%s4564_s16] ss:$0 sm:$0xff] }
 0x4cd   :  { %v1114_v61 = vmul.f32 %v1092_v36, %v1046_v14 }
 0x4cf   :  { %v1119_v40 = vmul.f32 %v2749_v51, %v1114_v61 }
 0x4d1   :  { %v3869_v45 = vadd.f32 %v2750_v62, %v1119_v40 }
 0x4d3   :  { %v1127_v5 = vpack.c.bf16 %v3869_v45, %v3867_v11 }
 0x4d5   :  { %2574 = vmatmul.msk.bf16.vlgmr.msra.gmra.mxu2 %vm326_vm0, %v1127_v5 }
 0x529   :  { %v1061_v10 = vpop.xlane.xlu2 %1060 }
 0x52a   :  { %v1067_v52 = vmul.f32 %v1061_v10, %v3821_v34 }
 0x52c   :  { %v1071_v3 = vadd.f32 1e-05, %v1067_v52 }
 0x52e   :  { %2837 = vrsqrt.f32 %v1071_v3  ;;  %vm1099_vm9 = vweird.f32 %v1071_v3 }
 0x531   :  { %v1064_v4 = vpop.xlane.xlu0 %1063 }
 0x532   :  { %v1068_v26 = vmul.f32 %v1064_v4, %v3821_v34 }
 0x534   :  { %v2838_v37 = vpop.eup %2837  ;;  %v1072_v14 = vadd.f32 1e-05, %v1068_v26 }
 0x535   :  { %v1094_v8 = vmul.f32 %v2838_v37, %v1071_v3  ;;  %vm1100_vm8 = vweird.f32 %v2838_v37 }
 0x536   :  { %2839 = vrsqrt.f32 %v1072_v14  ;;  %vm1101_vm10 = vmor %vm1099_vm9, %vm1100_vm8  ;;  %vm1109_vm12 = vweird.f32 %v1072_v14 }
 0x537   :  { %v1095_v9 = vmul.f32 %v2838_v37, %v1094_v8 }
 0x539   :  { %v1096_v17 = vmul.f32 0.5, %v1095_v9 }
 0x53b   :  { %v1097_v38 = vsub.f32 1.5, %v1096_v17 }
 0x53c   :  { %v2840_v0 = vpop.eup %2839 }
 0x53d   :  { %v1098_v55 = vmul.f32 %v2838_v37, %v1097_v38  ;;  %v1104_v48 = vmul.f32 %v2840_v0, %v1072_v14  ;;  %vm1110_vm11 = vweird.f32 %v2840_v0 }
 0x53e   :  { %vm1111_vm13 = vmor %vm1109_vm12, %vm1110_vm11 }
 0x53f   :  { %v1105_v16 = vmul.f32 %v2840_v0, %v1104_v48  ;;  %v1102_v21 = vsel %vm1101_vm10, %v2838_v37, %v1098_v55 }
 0x540   :  { %v1115_v43 = vmul.f32 %v1102_v21, %v3851_v2  ;;  %v2751_v2 = vld [vmem:[%s4562_s14] ss:$0 sm:$0xff]  ;;  %v2719_v21 = vld [vmem:[#allocation7 + $0x18] sm:$0xff] }
 0x541   :  { %v1106_v54 = vmul.f32 0.5, %v1105_v16  ;;  %1473 = vmatpush.bf16.msra.mxu0 %v2719_v21 }
 0x542   :  { %v1120_v46 = vmul.f32 %v2749_v51, %v1115_v43  ;;  %v2717_v43 = vld [vmem:[#allocation6 + $0x18] sm:$0xff] }
 0x543   :  { %v1107_v42 = vsub.f32 1.5, %v1106_v54  ;;  %1435 = vmatpush.bf16.msrb.mxu3 %v2717_v43 }
 0x544   :  { %v1125_v47 = vadd.f32 %v2750_v62, %v1120_v46 }
 0x545   :  { %v1108_v24 = vmul.f32 %v2840_v0, %v1107_v42  ;;  %v2715_v42 = vld [vmem:[%s4597_s25 + $0x18] sm:$0xff] }
 0x546   :  { %1403 = vmatpush.bf16.msra.mxu2 %v2715_v42 }
 0x547   :  { %v1112_v25 = vsel %vm1111_vm13, %v2840_v0, %v1108_v24 }
 0x548   :  { %v1116_v28 = vmul.f32 %v1112_v25, %v3858_v33 }
 0x54a   :  { %v1121_v18 = vmul.f32 %v2749_v51, %v1116_v28  ;;  %v2718_v28 = vld [vmem:[#allocation7 + $0x10] sm:$0xff] }
 0x54b   :  { %1474 = vmatpush.bf16.msra.mxu0 %v2718_v28 }
 0x54c   :  { %v1126_v12 = vadd.f32 %v2750_v62, %v1121_v18 }
 0x54e   :  { %v1128_v30 = vpack.c.bf16 %v1126_v12, %v1125_v47 }
 0x54f   :  { %2044 = vmatpush.msrb.mxu0 %v3693_v23 }
 0x550   :  { %2575 = vmatmul.msk.bf16.gmra.mxu2 %vm326_vm0, %v1128_v30 }
 0x551   :  { %2045 = vmatpush.msrb.mxu0 %v3696_v27 }
 0x553   :  { %2046 = vmatpush.msrb.mxu0 %v3700_v44 }
 0x555   :  { %2047 = vmatpush.msrb.mxu0 %v3705_v53 }
 0x558   :  { %v1157_v29 = vpop.f32.mrf.mxu2 }
 0x559   :  { %v1158_v20 = vadd.f32 %v2751_v2, %v1157_v29 }
 0x55b   :  { %v1167_v63 = vmax.f32 %v1158_v20, 0.0 }
 0x560   :  { %v1159_v22 = vpop.f32.mrf.mxu2 }
 0x561   :  { %v1160_v58 = vadd.f32 %v2751_v2, %v1159_v22 }
 0x563   :  { %v1168_v39 = vmax.f32 %v1160_v58, 0.0 }
 0x565   :  { %v1171_v33 = vpack.c.bf16 %v1168_v39, %v1167_v63 }
 0x567   :  { %2592 = vmatmul.msk.bf16.vlgmr.msrb.gmra.mxu2 %vm1198_vm14, %v1171_v33 }
 0x5d3   :  { %v1162_v32 = vpop.f32.mrf.mxu2 }
 0x5d4   :  { %v1163_v49 = vadd.f32 %v2751_v2, %v1162_v32 }
 0x5d6   :  { %v1169_v57 = vmax.f32 %v1163_v49, 0.0 }
 0x5db   :  { %v1164_v56 = vpop.f32.mrf.mxu2 }
 0x5dc   :  { %v1165_v6 = vadd.f32 %v2751_v2, %v1164_v56 }
 0x5de   :  { %v1170_v51 = vmax.f32 %v1165_v6, 0.0 }
 0x5e0   :  { %v1172_v59 = vpack.c.bf16 %v1170_v51, %v1169_v57 }
 0x5e2   :  { %2593 = vmatmul.msk.bf16.gmra.mxu2 %vm1198_vm14, %v1172_v59 }
 0x5ea   :  { %v1214_v36 = vpop.f32.mrf.mxu2 }
 0x5eb   :  { %v1215_v62 = vadd.f32 %v2752_v35, %v1214_v36  ;;  %v2753_v36 = vld [vmem:[%s4567_s19] ss:$0 sm:$0xff] }
 0x5ed   :  { %v1224_v60 = vadd.f32 %v1215_v62, %v3867_v11 }
 0x5ef   :  { %v1228_v61 = vsel %vm326_vm0, %v1224_v60, 0.0 }
 0x5f0   :  { %1229 = vadd.xlane.f32.xlu1 %v1228_v61 }
 0x5f2   :  { %v1216_v40 = vpop.f32.mrf.mxu2 }
 0x5f3   :  { %v1217_v5 = vadd.f32 %v2752_v35, %v1216_v40  ;;  %v2754_v40 = vld [vmem:[%s4568_s20] ss:$0 sm:$0xff] }
 0x5f5   :  { %v1225_v10 = vadd.f32 %v1217_v5, %v3869_v45 }
 0x5f7   :  { %v1231_v52 = vsel %vm326_vm0, %v1225_v10, 0.0 }
 0x5f8   :  { %1232 = vadd.xlane.f32.xlu2 %v1231_v52 }
 0x663   :  { %v1230_v3 = vpop.xlane.xlu1 %1229 }
 0x664   :  { %v1240_v4 = vmul.f32 %v1230_v3, %v3821_v34 }
 0x665   :  { %v1219_v26 = vpop.f32.mrf.mxu2 }
 0x666   :  { %v3912_v37 = vsub.f32 %v1224_v60, %v1240_v4  ;;  %v1220_v14 = vadd.f32 %v2752_v35, %v1219_v26 }
 0x668   :  { %v1248_v11 = vmul.f32 %v3912_v37, %v3912_v37  ;;  %v1226_v8 = vadd.f32 %v1220_v14, %v1125_v47  ;;  %v2714_v47 = vld [vmem:[%s4597_s25 + $0x10] sm:$0xff]  ;;  %v2941_v14 = vld [vmem:[%s4596_s0] sm:$0xff] }
 0x669   :  { %1404 = vmatpush.bf16.msra.mxu2 %v2714_v47 }
 0x66a   :  { %v1252_v41 = vsel %vm326_vm0, %v1248_v11, 0.0  ;;  %v1234_v9 = vsel %vm326_vm0, %v1226_v8, 0.0 }
 0x66b   :  { %v1233_v17 = vpop.xlane.xlu2 %1232  ;;  %1253 = vadd.xlane.f32.xlu2 %v1252_v41  ;;  %1235 = vadd.xlane.f32.xlu0 %v1234_v9 }
 0x66c   :  { %v1241_v45 = vmul.f32 %v1233_v17, %v3821_v34 }
 0x66d   :  { %v1221_v19 = vpop.f32.mrf.mxu2 }
 0x66e   :  { %v3919_v38 = vsub.f32 %v1225_v10, %v1241_v45  ;;  %v1222_v0 = vadd.f32 %v2752_v35, %v1221_v19 }
 0x670   :  { %v1227_v55 = vadd.f32 %v1222_v0, %v1126_v12  ;;  %v1249_v48 = vmul.f32 %v3919_v38, %v3919_v38  ;;  %v2716_v12 = vld [vmem:[#allocation6 + $0x10] sm:$0xff] }
 0x671   :  { %1436 = vmatpush.bf16.msrb.mxu3 %v2716_v12 }
 0x672   :  { %v1237_v31 = vsel %vm326_vm0, %v1227_v55, 0.0  ;;  %v1255_v16 = vsel %vm326_vm0, %v1249_v48, 0.0 }
 0x673   :  { %1238 = vadd.xlane.f32.xlu1 %v1237_v31  ;;  %1256 = vadd.xlane.f32.xlu0 %v1255_v16 }
 0x6de   :  { %v1254_v54 = vpop.xlane.xlu2 %1253  ;;  %v1236_v1 = vpop.xlane.xlu0 %1235 }
 0x6df   :  { %v1264_v24 = vmul.f32 %v1254_v54, %v3821_v34  ;;  %v1242_v25 = vmul.f32 %v1236_v1, %v3821_v34 }
 0x6e1   :  { %v1268_v46 = vadd.f32 1e-05, %v1264_v24  ;;  %v3930_v18 = vsub.f32 %v1226_v8, %v1242_v25  ;;  %v2942_v8 = vld [vmem:[%s4596_s0 + $0x8] sm:$0xff] }
 0x6e3   :  { %2841 = vrsqrt.f32 %v1268_v46  ;;  %v1250_v30 = vmul.f32 %v3930_v18, %v3930_v18  ;;  %vm1278_vm1 = vweird.f32 %v1268_v46 }
 0x6e5   :  { %v1258_v29 = vsel %vm326_vm0, %v1250_v30, 0.0 }
 0x6e6   :  { %v1239_v2 = vpop.xlane.xlu1 %1238  ;;  %1259 = vadd.xlane.f32.xlu1 %v1258_v29  ;;  %v1257_v20 = vpop.xlane.xlu0 %1256 }
 0x6e7   :  { %v1243_v22 = vmul.f32 %v1239_v2, %v3821_v34  ;;  %v1265_v58 = vmul.f32 %v1257_v20, %v3821_v34 }
 0x6e9   :  { %v2842_v63 = vpop.eup %2841  ;;  %v3943_v39 = vsub.f32 %v1227_v55, %v1243_v22  ;;  %v1269_v33 = vadd.f32 1e-05, %v1265_v58 }
 0x6ea   :  { %v1273_v23 = vmul.f32 %v2842_v63, %v1268_v46  ;;  %vm1279_vm15 = vweird.f32 %v2842_v63 }
 0x6eb   :  { %2843 = vrsqrt.f32 %v1269_v33  ;;  %v1251_v27 = vmul.f32 %v3943_v39, %v3943_v39  ;;  %vm1280_vm2 = vmor %vm1278_vm1, %vm1279_vm15  ;;  %vm1288_vm4 = vweird.f32 %v1269_v33 }
 0x6ec   :  { %v1274_v32 = vmul.f32 %v2842_v63, %v1273_v23  ;;  %v2944_v23 = vld [vmem:[%s4596_s0 + $0x18] sm:$0xff] }
 0x6ed   :  { %v1261_v49 = vsel %vm326_vm0, %v1251_v27, 0.0 }
 0x6ee   :  { %v1275_v56 = vmul.f32 0.5, %v1274_v32  ;;  %1262 = vadd.xlane.f32.xlu2 %v1261_v49 }
 0x6f0   :  { %v1276_v6 = vsub.f32 1.5, %v1275_v56 }
 0x6f1   :  { %v2844_v57 = vpop.eup %2843 }
 0x6f2   :  { %v1277_v44 = vmul.f32 %v2842_v63, %v1276_v6  ;;  %v1283_v51 = vmul.f32 %v2844_v57, %v1269_v33  ;;  %vm1289_vm3 = vweird.f32 %v2844_v57 }
 0x6f3   :  { %vm1290_vm5 = vmor %vm1288_vm4, %vm1289_vm3 }
 0x6f4   :  { %v1281_v59 = vsel %vm1280_vm2, %v2842_v63, %v1277_v44  ;;  %v1284_v35 = vmul.f32 %v2844_v57, %v1283_v51  ;;  %v2755_v44 = vld [vmem:[%s4558_s10 + $0x1] ss:$0 sm:$0xff] }
 0x6f5   :  { %v1312_v62 = vmul.f32 %v1281_v59, %v3912_v37 }
 0x6f6   :  { %v1285_v53 = vmul.f32 0.5, %v1284_v35 }
 0x6f7   :  { %v1317_v5 = vmul.f32 %v2753_v36, %v1312_v62 }
 0x6f8   :  { %v1286_v60 = vsub.f32 1.5, %v1285_v53 }
 0x6f9   :  { %v3957_v3 = vadd.f32 %v2754_v40, %v1317_v5 }
 0x6fa   :  { %v1287_v61 = vmul.f32 %v2844_v57, %v1286_v60 }
 0x6fb   :  { %v1370_v11 = vadd.f32 %v2941_v14, %v3957_v3 }
 0x6fc   :  { %v1291_v10 = vsel %vm1290_vm5, %v2844_v57, %v1287_v61 }
 0x6fd   :  { %v1313_v52 = vmul.f32 %v1291_v10, %v3919_v38 }
 0x6ff   :  { %v1318_v4 = vmul.f32 %v2753_v36, %v1313_v52 }
 0x701   :  { %v3959_v26 = vadd.f32 %v2754_v40, %v1318_v4 }
 0x703   :  { %v1376_v37 = vpack.c.bf16 %v3959_v26, %v3957_v3  ;;  %v1371_v41 = vadd.f32 %v2942_v8, %v3959_v26 }
 0x705   :  { %2634 = vmatmul.msk.bf16.vlgmr.msra.gmra.mxu0 %vm326_vm0, %v1376_v37  ;;  %v1374_v9 = vpack.c.bf16 %v1371_v41, %v1370_v11 }
 0x707   :  { %2614 = vmatmul.msk.bf16.vlgmr.msra.gmra.mxu2 %vm326_vm0, %v1374_v9  ;;  %2624 = vmatmul.msk.bf16.vlgmr.msrb.gmra.mxu3 %vm326_vm0, %v1374_v9  ;;  %v2756_v9 = vld [vmem:[%s4598_s28 + $0x1] ss:$0 sm:$0xff] }
 0x759   :  { %v1260_v17 = vpop.xlane.xlu1 %1259 }
 0x75a   :  { %v1266_v45 = vmul.f32 %v1260_v17, %v3821_v34 }
 0x75c   :  { %v1270_v19 = vadd.f32 1e-05, %v1266_v45 }
 0x75e   :  { %2845 = vrsqrt.f32 %v1270_v19  ;;  %vm1298_vm7 = vweird.f32 %v1270_v19 }
 0x761   :  { %v1263_v38 = vpop.xlane.xlu2 %1262 }
 0x762   :  { %v1267_v0 = vmul.f32 %v1263_v38, %v3821_v34 }
 0x764   :  { %v2846_v55 = vpop.eup %2845  ;;  %v1271_v48 = vadd.f32 1e-05, %v1267_v0  ;;  %v4006_v0 = vld [vmem:[#allocation2 + $0x8] sm:$0xff] }
 0x765   :  { %v1293_v31 = vmul.f32 %v2846_v55, %v1270_v19  ;;  %vm1299_vm6 = vweird.f32 %v2846_v55 }
 0x766   :  { %2847 = vrsqrt.f32 %v1271_v48  ;;  %vm1300_vm8 = vmor %vm1298_vm7, %vm1299_vm6  ;;  %vm1308_vm10 = vweird.f32 %v1271_v48 }
 0x767   :  { %v1294_v16 = vmul.f32 %v2846_v55, %v1293_v31 }
 0x769   :  { %v1295_v21 = vmul.f32 0.5, %v1294_v16 }
 0x76b   :  { %v1296_v54 = vsub.f32 1.5, %v1295_v21  ;;  %v4013_v21 = vld [vmem:[#allocation2 + $0x18] sm:$0xff] }
 0x76c   :  { %v2848_v1 = vpop.eup %2847 }
 0x76d   :  { %v1297_v42 = vmul.f32 %v2846_v55, %v1296_v54  ;;  %v1303_v43 = vmul.f32 %v2848_v1, %v1271_v48  ;;  %vm1309_vm9 = vweird.f32 %v2848_v1  ;;  %v4009_v48 = vld [vmem:[#allocation2] sm:$0xff] }
 0x76e   :  { %vm1310_vm11 = vmor %vm1308_vm10, %vm1309_vm9 }
 0x76f   :  { %v1301_v24 = vsel %vm1300_vm8, %v2846_v55, %v1297_v42  ;;  %v1304_v25 = vmul.f32 %v2848_v1, %v1303_v43 }
 0x770   :  { %v1314_v46 = vmul.f32 %v1301_v24, %v3930_v18  ;;  %v2943_v18 = vld [vmem:[%s4596_s0 + $0x10] sm:$0xff]  ;;  %v4020_v24 = vld [vmem:[#allocation2 + $0x28] sm:$0xff] }
 0x771   :  { %v1305_v28 = vmul.f32 0.5, %v1304_v25 }
 0x772   :  { %v1319_v30 = vmul.f32 %v2753_v36, %v1314_v46 }
 0x773   :  { %v1306_v47 = vsub.f32 1.5, %v1305_v28  ;;  %v4023_v28 = vld [vmem:[#allocation2 + $0x20] sm:$0xff] }
 0x774   :  { %v3978_v22 = vadd.f32 %v2754_v40, %v1319_v30  ;;  %v4027_v30 = vld [vmem:[#allocation2 + $0x38] sm:$0xff] }
 0x775   :  { %v1307_v12 = vmul.f32 %v2848_v1, %v1306_v47 }
 0x776   :  { %v1372_v33 = vadd.f32 %v2943_v18, %v3978_v22 }
 0x777   :  { %v1311_v29 = vsel %vm1310_vm11, %v2848_v1, %v1307_v12  ;;  %v4016_v1 = vld [vmem:[#allocation2 + $0x10] sm:$0xff] }
 0x778   :  { %v1315_v2 = vmul.f32 %v1311_v29, %v3943_v39 }
 0x77a   :  { %v1320_v20 = vmul.f32 %v2753_v36, %v1315_v2  ;;  %v4030_v2 = vld [vmem:[#allocation2 + $0x30] sm:$0xff] }
 0x77c   :  { %v3980_v58 = vadd.f32 %v2754_v40, %v1320_v20  ;;  %v2757_v40 = vld [vmem:[%s4556_s8 + $0x1] ss:$0 sm:$0xff] }
 0x77e   :  { %v1377_v63 = vpack.c.bf16 %v3980_v58, %v3978_v22  ;;  %v1373_v39 = vadd.f32 %v2944_v23, %v3980_v58 }
 0x780   :  { %2635 = vmatmul.msk.bf16.gmra.mxu0 %vm326_vm0, %v1377_v63  ;;  %v1375_v27 = vpack.c.bf16 %v1373_v39, %v1372_v33  ;;  %v4034_v39 = vld [vmem:[#allocation2 + $0x48] sm:$0xff] }
 0x782   :  { %2615 = vmatmul.msk.bf16.gmra.mxu2 %vm326_vm0, %v1375_v27  ;;  %2625 = vmatmul.msk.bf16.gmra.mxu3 %vm326_vm0, %v1375_v27  ;;  %v1476_v32 = vpop.f32.mrf.mxu0 }
 0x783   :  { %v1477_v60 = vadd.f32 %v2755_v44, %v1476_v32  ;;  %v4037_v32 = vld [vmem:[#allocation2 + $0x40] sm:$0xff] }
 0x78a   :  { %v1438_v49 = vpop.f32.mrf.mxu3  ;;  %v1478_v56 = vpop.f32.mrf.mxu0 }
 0x78b   :  { %v1479_v36 = vadd.f32 %v2755_v44, %v1478_v56  ;;  %v1406_v61 = vpop.f32.mrf.mxu2  ;;  %v1439_v8 = vadd.f32 %v2757_v40, %v1438_v49 }
 0x78c   :  { %v1407_v19 = vadd.f32 %v2756_v9, %v1406_v61  ;;  %v4055_v61 = vld [vmem:[#allocation2 + $0x78] sm:$0xff] }
 0x78d   :  { %v1775_v5 = vpack.c.bf16 %v1479_v36, %v1477_v60  ;;  %v4051_v36 = vld [vmem:[#allocation2 + $0x60] sm:$0xff] }
 0x78e   :  { %v1486_v31 = vmul.f32 %v4009_v48, %v1407_v19  ;;  %v1488_v42 = vmul.f32 %v4016_v1, %v1407_v19  ;;  %v1490_v46 = vmul.f32 %v4023_v28, %v1407_v19  ;;  %v1492_v20 = vmul.f32 %v4030_v2, %v1407_v19  ;;  %v2963_v19 = vld [vmem:[%s4599_s26 + $0x10] sm:$0xff] }
 0x792   :  { %v1440_v6 = vpop.f32.mrf.mxu3 }
 0x793   :  { %v1441_v14 = vadd.f32 %v2757_v40, %v1440_v6  ;;  %v1408_v41 = vpop.f32.mrf.mxu2  ;;  %v4041_v6 = vld [vmem:[#allocation2 + $0x58] sm:$0xff] }
 0x794   :  { %v1409_v45 = vadd.f32 %v2756_v9, %v1408_v41  ;;  %v2962_v41 = vld [vmem:[%s4599_s26 + $0x8] sm:$0xff] }
 0x795   :  { %v1510_v17 = vpack.c.bf16 %v1441_v14, %v1439_v8 }
 0x796   :  { %v1487_v55 = vmul.f32 %v4006_v0, %v1409_v45  ;;  %v1489_v54 = vmul.f32 %v4013_v21, %v1409_v45  ;;  %v1491_v25 = vmul.f32 %v4020_v24, %v1409_v45  ;;  %v1493_v29 = vmul.f32 %v4027_v30, %v1409_v45 }
 0x797   :  { %v1537_v38 = vsel %vm326_vm0, %v1510_v17, 0 }
 0x798   :  { %v1502_v16 = vpack.c.bf16 %v1487_v55, %v1486_v31  ;;  %v1503_v43 = vpack.c.bf16 %v1489_v54, %v1488_v42  ;;  %v1504_v47 = vpack.c.bf16 %v1491_v25, %v1490_v46  ;;  %v1505_v63 = vpack.c.bf16 %v1493_v29, %v1492_v20  ;;  %v2965_v25 = vld [vmem:[%s4599_s26 + $0x20] sm:$0xff]  ;;  %v2966_v29 = vld [vmem:[%s4599_s26 + $0x28] sm:$0xff] }
 0x7fd   :  { %v1481_v57 = vpop.f32.mrf.mxu0 }
 0x7fe   :  { %v1482_v35 = vadd.f32 %v2755_v44, %v1481_v57 }
 0x805   :  { %v1443_v51 = vpop.f32.mrf.mxu3  ;;  %v1483_v59 = vpop.f32.mrf.mxu0 }
 0x806   :  { %v1484_v53 = vadd.f32 %v2755_v44, %v1483_v59  ;;  %v1444_v4 = vadd.f32 %v2757_v40, %v1443_v51  ;;  %v1411_v12 = vpop.f32.mrf.mxu2  ;;  %v4044_v44 = vld [vmem:[#allocation2 + $0x50] sm:$0xff] }
 0x807   :  { %v1412_v23 = vadd.f32 %v2756_v9, %v1411_v12 }
 0x808   :  { %v1776_v62 = vpack.c.bf16 %v1484_v53, %v1482_v35  ;;  %v4048_v35 = vld [vmem:[#allocation2 + $0x68] sm:$0xff] }
 0x809   :  { %v1494_v49 = vmul.f32 %v4037_v32, %v1412_v23  ;;  %v1496_v51 = vmul.f32 %v4044_v44, %v1412_v23 }
 0x80a   :  { %1807 = vmatpush.bf16.msrb.mxu2 %v1776_v62  ;;  %v1498_v62 = vmul.f32 %v4051_v36, %v1412_v23 }
 0x80d   :  { %v1445_v10 = vpop.f32.mrf.mxu3 }
 0x80e   :  { %v1446_v52 = vadd.f32 %v2757_v40, %v1445_v10  ;;  %1808 = vmatpush.bf16.msrb.mxu2 %v1775_v5  ;;  %v1413_v18 = vpop.f32.mrf.mxu2  ;;  %v4058_v5 = vld [vmem:[#allocation2 + $0x70] sm:$0xff] }
 0x80f   :  { %v1414_v33 = vadd.f32 %v2756_v9, %v1413_v18  ;;  %v1500_v10 = vmul.f32 %v4058_v5, %v1412_v23 }
 0x810   :  { %v1511_v37 = vpack.c.bf16 %v1446_v52, %v1444_v4 }
 0x811   :  { %v1495_v27 = vmul.f32 %v4034_v39, %v1414_v33  ;;  %v1497_v57 = vmul.f32 %v4041_v6, %v1414_v33  ;;  %v1499_v53 = vmul.f32 %v4048_v35, %v1414_v33  ;;  %v1501_v40 = vmul.f32 %v4055_v61, %v1414_v33  ;;  %v2967_v33 = vld [vmem:[%s4599_s26 + $0x30] sm:$0xff] }
 0x812   :  { %v1540_v11 = vsel %vm326_vm0, %v1511_v37, 0  ;;  %v2961_v37 = vld [vmem:[%s4599_s26] sm:$0xff] }
 0x813   :  { %1548 = vmatpush.bf16.xpose.msra.mxu1 %v1540_v11  ;;  %v1506_v56 = vpack.c.bf16 %v1495_v27, %v1494_v49  ;;  %v1507_v59 = vpack.c.bf16 %v1497_v57, %v1496_v51  ;;  %v1508_v60 = vpack.c.bf16 %v1499_v53, %v1498_v62  ;;  %v1509_v52 = vpack.c.bf16 %v1501_v40, %v1500_v10  ;;  %v2969_v53 = vld [vmem:[%s4599_s26 + $0x40] sm:$0xff] }
 0x81b   :  { %1549 = vmatpush.bf16.xpose.msra.mxu1 %v1537_v38 }
 0x822   :  { %2636 = vmatmul.msk.bf16.vlgmr.msra.gmra.mxu1 %vm326_vm0, %v1502_v16  ;;  %v2964_v16 = vld [vmem:[%s4599_s26 + $0x18] sm:$0xff] }
 0x832   :  { %2637 = vmatmul.msk.bf16.gmra.mxu1 %vm326_vm0, %v1503_v43 }
 0x842   :  { %2638 = vmatmul.msk.bf16.gmra.mxu1 %vm326_vm0, %v1504_v47 }
 0x852   :  { %2639 = vmatmul.msk.bf16.gmra.mxu1 %vm326_vm0, %v1505_v63 }
 0x862   :  { %2640 = vmatmul.msk.bf16.gmra.mxu1 %vm326_vm0, %v1506_v56  ;;  %v2968_v56 = vld [vmem:[%s4599_s26 + $0x38] sm:$0xff] }
 0x872   :  { %2641 = vmatmul.msk.bf16.gmra.mxu1 %vm326_vm0, %v1507_v59 }
 0x882   :  { %2642 = vmatmul.msk.bf16.gmra.mxu1 %vm326_vm0, %v1508_v60 }
 0x892   :  { %2643 = vmatmul.msk.bf16.gmra.mxu1 %vm326_vm0, %v1509_v52 }
 0x89f   :  { %v1551_v4 = vpop.f32.mrf.mxu1 }
 0x8a0   :  { %v1552_v14 = vadd.f32 %v2961_v37, %v1551_v4 }
 0x8a2   :  { %v1591_v11 = vsel %vm326_vm0, %v1552_v14, -inf }
 0x8a3   :  { %1592 = vmax.xlane.f32.xlu0 %v1591_v11 }
 0x8a7   :  { %v1553_v8 = vpop.f32.mrf.mxu1 }
 0x8a8   :  { %v1554_v9 = vadd.f32 %v2962_v41, %v1553_v8 }
 0x8aa   :  { %v1594_v17 = vsel %vm326_vm0, %v1554_v9, -inf }
 0x8ab   :  { %1595 = vmax.xlane.f32.xlu1 %v1594_v17 }
 0x8af   :  { %v1556_v45 = vpop.f32.mrf.mxu1 }
 0x8b0   :  { %v1557_v38 = vadd.f32 %v2963_v19, %v1556_v45  ;;  %v2970_v19 = vld [vmem:[%s4599_s26 + $0x48] sm:$0xff] }
 0x8b2   :  { %v1597_v55 = vsel %vm326_vm0, %v1557_v38, -inf }
 0x8b3   :  { %1598 = vmax.xlane.f32.xlu2 %v1597_v55 }
 0x8b7   :  { %v1558_v31 = vpop.f32.mrf.mxu1 }
 0x8b8   :  { %v1559_v54 = vadd.f32 %v2964_v16, %v1558_v31 }
 0x8ba   :  { %v1600_v42 = vsel %vm326_vm0, %v1559_v54, -inf }
 0x8bb   :  { %1601 = vmax.xlane.f32.xlu0 %v1600_v42 }
 0x8bf   :  { %v1561_v43 = vpop.f32.mrf.mxu1 }
 0x8c0   :  { %v4081_v46 = vadd.f32 %v2965_v25, %v1561_v43 }
 0x8c2   :  { %v1603_v47 = vsel %vm326_vm0, %v4081_v46, -inf }
 0x8c3   :  { %1604 = vmax.xlane.f32.xlu1 %v1603_v47  ;;  %v2971_v47 = vld [vmem:[%s4599_s26 + $0x50] sm:$0xff] }
 0x8c7   :  { %v1563_v12 = vpop.f32.mrf.mxu1 }
 0x8c8   :  { %v4088_v20 = vadd.f32 %v2966_v29, %v1563_v12 }
 0x8ca   :  { %v1606_v63 = vsel %vm326_vm0, %v4088_v20, -inf }
 0x8cb   :  { %1607 = vmax.xlane.f32.xlu2 %v1606_v63 }
 0x8cf   :  { %v1566_v18 = vpop.f32.mrf.mxu1 }
 0x8d0   :  { %v4095_v23 = vadd.f32 %v2967_v33, %v1566_v18 }
 0x8d2   :  { %v1609_v27 = vsel %vm326_vm0, %v4095_v23, -inf }
 0x8d3   :  { %1610 = vmax.xlane.f32.xlu0 %v1609_v27 }
 0x8d7   :  { %v1568_v49 = vpop.f32.mrf.mxu1 }
 0x8d8   :  { %v4102_v57 = vadd.f32 %v2968_v56, %v1568_v49  ;;  %v2972_v56 = vld [vmem:[%s4599_s26 + $0x58] sm:$0xff] }
 0x8da   :  { %v1612_v51 = vsel %vm326_vm0, %v4102_v57, -inf }
 0x8db   :  { %1613 = vmax.xlane.f32.xlu1 %v1612_v51 }
 0x8df   :  { %v1571_v59 = vpop.f32.mrf.mxu1 }
 0x8e0   :  { %v4109_v62 = vadd.f32 %v2969_v53, %v1571_v59 }
 0x8e2   :  { %v1615_v60 = vsel %vm326_vm0, %v4109_v62, -inf }
 0x8e3   :  { %1616 = vmax.xlane.f32.xlu1 %v1615_v60 }
 0x8e7   :  { %v1573_v10 = vpop.f32.mrf.mxu1 }
 0x8e8   :  { %v4120_v55 = vadd.f32 %v2970_v19, %v1573_v10 }
 0x8ea   :  { %v1618_v43 = vsel %vm326_vm0, %v4120_v55, -inf }
 0x8ef   :  { %v1576_v41 = vpop.f32.mrf.mxu1 }
 0x8f0   :  { %v4131_v12 = vadd.f32 %v2971_v47, %v1576_v41 }
 0x8f2   :  { %v1621_v27 = vsel %vm326_vm0, %v4131_v12, -inf }
 0x8f7   :  { %v1578_v25 = vpop.f32.mrf.mxu1 }
 0x8f8   :  { %v4142_v51 = vadd.f32 %v2972_v56, %v1578_v25 }
 0x8ff   :  { %v1581_v49 = vpop.f32.mrf.mxu1 }
 0x916   :  { %v1593_v40 = vpop.xlane.xlu0 %1592 }
 0x917   :  { %v1639_v52 = vsub.f32 %v1552_v14, %v1593_v40  ;;  %v1624_v40 = vsel %vm326_vm0, %v4142_v51, -inf }
 0x919   :  { %v1655_v4 = vmul.f32 1.442695, %v1639_v52  ;;  %v2973_v52 = vld [vmem:[%s4599_s26 + $0x60] sm:$0xff] }
 0x91b   :  { %2849 = vpow2.f32 %v1655_v4  ;;  %v4154_v4 = vadd.f32 %v2973_v52, %v1581_v49 }
 0x91e   :  { %v1596_v37 = vpop.xlane.xlu1 %1595 }
 0x91f   :  { %v1640_v11 = vsub.f32 %v1554_v9, %v1596_v37 }
 0x921   :  { %v4113_v8 = vpop.eup %2849  ;;  %v1657_v17 = vmul.f32 1.442695, %v1640_v11 }
 0x922   :  { %v1687_v45 = vsel %vm326_vm0, %v4113_v8, 0.0 }
 0x923   :  { %2851 = vpow2.f32 %v1657_v17  ;;  %1688 = vadd.xlane.f32.xlu2 %v1687_v45  ;;  %v1627_v45 = vsel %vm326_vm0, %v4154_v4, -inf }
 0x926   :  { %v1599_v14 = vpop.xlane.xlu2 %1598 }
 0x927   :  { %v1641_v31 = vsub.f32 %v1557_v38, %v1599_v14  ;;  %v2974_v14 = vld [vmem:[%s4599_s26 + $0x68] sm:$0xff] }
 0x929   :  { %v4122_v16 = vpop.eup %2851  ;;  %v1659_v9 = vmul.f32 1.442695, %v1641_v31 }
 0x92a   :  { %v1690_v42 = vsel %vm326_vm0, %v4122_v16, 0.0 }
 0x92b   :  { %2853 = vpow2.f32 %v1659_v9  ;;  %1691 = vadd.xlane.f32.xlu0 %v1690_v42  ;;  %1619 = vmax.xlane.f32.xlu2 %v1618_v43 }
 0x92e   :  { %v1602_v38 = vpop.xlane.xlu0 %1601 }
 0x92f   :  { %v1642_v29 = vsub.f32 %v1559_v54, %v1602_v38 }
 0x931   :  { %v4133_v63 = vpop.eup %2853  ;;  %v1661_v18 = vmul.f32 1.442695, %v1642_v29  ;;  %v2975_v29 = vld [vmem:[%s4599_s26 + $0x70] sm:$0xff] }
 0x932   :  { %v1693_v33 = vsel %vm326_vm0, %v4133_v63, 0.0 }
 0x933   :  { %2855 = vpow2.f32 %v1661_v18  ;;  %1694 = vadd.xlane.f32.xlu0 %v1693_v33  ;;  %1622 = vmax.xlane.f32.xlu2 %v1621_v27 }
 0x936   :  { %v1605_v54 = vpop.xlane.xlu1 %1604 }
 0x937   :  { %v1643_v59 = vsub.f32 %v4081_v46, %v1605_v54  ;;  %v1583_v46 = vpop.f32.mrf.mxu1 }
 0x938   :  { %v4166_v31 = vadd.f32 %v2974_v14, %v1583_v46 }
 0x939   :  { %v4145_v53 = vpop.eup %2855  ;;  %v1663_v60 = vmul.f32 1.442695, %v1643_v59 }
 0x93a   :  { %v1696_v10 = vsel %vm326_vm0, %v4145_v53, 0.0  ;;  %v1630_v38 = vsel %vm326_vm0, %v4166_v31, -inf }
 0x93b   :  { %2857 = vpow2.f32 %v1663_v60  ;;  %1625 = vmax.xlane.f32.xlu0 %v1624_v40  ;;  %1697 = vadd.xlane.f32.xlu1 %v1696_v10  ;;  %v2976_v60 = vld [vmem:[%s4599_s26 + $0x78] sm:$0xff] }
 0x93e   :  { %v1608_v37 = vpop.xlane.xlu2 %1607 }
 0x93f   :  { %v1644_v11 = vsub.f32 %v4088_v20, %v1608_v37  ;;  %v1586_v43 = vpop.f32.mrf.mxu1 }
 0x940   :  { %v4178_v18 = vadd.f32 %v2975_v29, %v1586_v43 }
 0x941   :  { %v4157_v41 = vpop.eup %2857  ;;  %v1665_v17 = vmul.f32 1.442695, %v1644_v11 }
 0x942   :  { %v1699_v19 = vsel %vm326_vm0, %v4157_v41, 0.0  ;;  %v1633_v56 = vsel %vm326_vm0, %v4178_v18, -inf }
 0x943   :  { %2859 = vpow2.f32 %v1665_v17  ;;  %1628 = vmax.xlane.f32.xlu0 %v1627_v45  ;;  %1700 = vadd.xlane.f32.xlu1 %v1699_v19 }
 0x946   :  { %v1611_v9 = vpop.xlane.xlu0 %1610 }
 0x947   :  { %v1645_v20 = vsub.f32 %v4095_v23, %v1611_v9  ;;  %v1588_v59 = vpop.f32.mrf.mxu1 }
 0x948   :  { %v4190_v40 = vadd.f32 %v2976_v60, %v1588_v59 }
 0x949   :  { %v4169_v42 = vpop.eup %2859  ;;  %v1667_v25 = vmul.f32 1.442695, %v1645_v20 }
 0x94a   :  { %v1702_v47 = vsel %vm326_vm0, %v4169_v42, 0.0  ;;  %v1636_v11 = vsel %vm326_vm0, %v4190_v40, -inf }
 0x94b   :  { %2861 = vpow2.f32 %v1667_v25  ;;  %1703 = vadd.xlane.f32.xlu2 %v1702_v47  ;;  %1631 = vmax.xlane.f32.xlu1 %v1630_v38 }
 0x94e   :  { %v1614_v23 = vpop.xlane.xlu1 %1613 }
 0x94f   :  { %v1646_v33 = vsub.f32 %v4102_v57, %v1614_v23 }
 0x951   :  { %v4181_v27 = vpop.eup %2861  ;;  %v1669_v49 = vmul.f32 1.442695, %v1646_v33 }
 0x952   :  { %v1705_v54 = vsel %vm326_vm0, %v4181_v27, 0.0 }
 0x953   :  { %2863 = vpow2.f32 %v1669_v49  ;;  %1634 = vmax.xlane.f32.xlu1 %v1633_v56  ;;  %1706 = vadd.xlane.f32.xlu2 %v1705_v54 }
 0x956   :  { %v1617_v57 = vpop.xlane.xlu1 %1616 }
 0x957   :  { %v1647_v10 = vsub.f32 %v4109_v62, %v1617_v57 }
 0x959   :  { %v4193_v52 = vpop.eup %2863  ;;  %v1671_v37 = vmul.f32 1.442695, %v1647_v10 }
 0x95a   :  { %v1708_v46 = vsel %vm326_vm0, %v4193_v52, 0.0 }
 0x95b   :  { %2865 = vpow2.f32 %v1671_v37  ;;  %1709 = vadd.xlane.f32.xlu0 %v1708_v46  ;;  %1637 = vmax.xlane.f32.xlu2 %v1636_v11 }
 0x961   :  { %v4199_v17 = vpop.eup %2865 }
 0x962   :  { %v1711_v45 = vsel %vm326_vm0, %v4199_v17, 0.0 }
 0x963   :  { %1712 = vadd.xlane.f32.xlu0 %v1711_v45 }
 0x996   :  { %v1689_v19 = vpop.xlane.xlu2 %1688 }
 0x997   :  { %2867 = vrcp.f32 %v1689_v19 }
 0x99d   :  { %v2868_v43 = vpop.eup %2867 }
 0x99e   :  { %v1620_v62 = vpop.xlane.xlu2 %1619  ;;  %v1692_v14 = vpop.xlane.xlu0 %1691  ;;  %v1751_v47 = vmul.f32 %v2868_v43, %v4113_v8 }
 0x99f   :  { %v1648_v9 = vsub.f32 %v4120_v55, %v1620_v62  ;;  %2869 = vrcp.f32 %v1692_v14 }
 0x9a1   :  { %v1673_v20 = vmul.f32 1.442695, %v1648_v9 }
 0x9a3   :  { %2871 = vpow2.f32 %v1673_v20 }
 0x9a5   :  { %v2870_v25 = vpop.eup %2869 }
 0x9a6   :  { %v4206_v38 = vmul.f32 %v2870_v25, %v4122_v16  ;;  %v1623_v29 = vpop.xlane.xlu2 %1622  ;;  %v1695_v23 = vpop.xlane.xlu0 %1694 }
 0x9a7   :  { %v1649_v33 = vsub.f32 %v4131_v12, %v1623_v29 }
 0x9a8   :  { %v1767_v49 = vpack.c.bf16 %v4206_v38, %v1751_v47 }
 0x9a9   :  { %v4210_v56 = vpop.eup %2871  ;;  %v1675_v54 = vmul.f32 1.442695, %v1649_v33 }
 0x9aa   :  { %2644 = vmatmul.msk.bf16.vlgmr.msrb.gmra.mxu2 %vm326_vm0, %v1767_v49  ;;  %v1714_v55 = vsel %vm326_vm0, %v4210_v56, 0.0 }
 0x9ab   :  { %2873 = vpow2.f32 %v1675_v54  ;;  %1715 = vadd.xlane.f32.xlu1 %v1714_v55 }
 0x9ac   :  { %2875 = vrcp.f32 %v1695_v23 }
 0x9ae   :  { %v1698_v8 = vpop.xlane.xlu1 %1697  ;;  %v1626_v16 = vpop.xlane.xlu0 %1625 }
 0x9af   :  { %2877 = vrcp.f32 %v1698_v8  ;;  %v1650_v59 = vsub.f32 %v4142_v51, %v1626_v16 }
 0x9b1   :  { %v4216_v60 = vpop.eup %2873  ;;  %v1677_v12 = vmul.f32 1.442695, %v1650_v59 }
 0x9b2   :  { %v1717_v57 = vsel %vm326_vm0, %v4216_v60, 0.0  ;;  %v2876_v10 = vpop.eup %2875 }
 0x9b3   :  { %2879 = vpow2.f32 %v1677_v12  ;;  %1718 = vadd.xlane.f32.xlu2 %v1717_v57  ;;  %v1753_v45 = vmul.f32 %v2876_v10, %v4133_v63 }
 0x9b5   :  { %v2878_v37 = vpop.eup %2877  ;;  %v1993_v57 = vsel %vm326_vm0, %v1753_v45, 0.0 }
 0x9b6   :  { %v1701_v46 = vpop.xlane.xlu1 %1700  ;;  %v1629_v11 = vpop.xlane.xlu0 %1628  ;;  %v1754_v19 = vmul.f32 %v2878_v37, %v4145_v53 }
 0x9b7   :  { %v1651_v62 = vsub.f32 %v4154_v4, %v1629_v11 }
 0x9b8   :  { %v1768_v14 = vpack.c.bf16 %v1754_v19, %v1753_v45 }
 0x9b9   :  { %v4223_v51 = vpop.eup %2879  ;;  %v1679_v9 = vmul.f32 1.442695, %v1651_v62 }
 0x9ba   :  { %2645 = vmatmul.msk.bf16.gmra.mxu2 %vm326_vm0, %v1768_v14  ;;  %v1720_v20 = vsel %vm326_vm0, %v4223_v51, 0.0 }
 0x9bb   :  { %2881 = vpow2.f32 %v1679_v9  ;;  %1721 = vadd.xlane.f32.xlu0 %v1720_v20 }
 0x9bc   :  { %2883 = vrcp.f32 %v1701_v46 }
 0x9be   :  { %v1704_v43 = vpop.xlane.xlu2 %1703  ;;  %v1632_v25 = vpop.xlane.xlu1 %1631 }
 0x9bf   :  { %2885 = vrcp.f32 %v1704_v43  ;;  %v1652_v63 = vsub.f32 %v4166_v31, %v1632_v25 }
 0x9c1   :  { %v4229_v53 = vpop.eup %2881  ;;  %v1681_v4 = vmul.f32 1.442695, %v1652_v63 }
 0x9c2   :  { %v1723_v29 = vsel %vm326_vm0, %v4229_v53, 0.0  ;;  %v2884_v23 = vpop.eup %2883 }
 0x9c3   :  { %2887 = vpow2.f32 %v1681_v4  ;;  %1724 = vadd.xlane.f32.xlu1 %v1723_v29  ;;  %v1755_v49 = vmul.f32 %v2884_v23, %v4157_v41  ;;  %v1992_v41 = vsel %vm326_vm0, %v1751_v47, 0.0  ;;  %v2000_v47 = vsel %vm326_vm0, %v1754_v19, 0.0 }
 0x9c5   :  { %v2886_v33 = vpop.eup %2885 }
 0x9c6   :  { %v1756_v54 = vmul.f32 %v2886_v33, %v4169_v42  ;;  %v1635_v55 = vpop.xlane.xlu1 %1634  ;;  %v1707_v8 = vpop.xlane.xlu2 %1706  ;;  %v1995_v42 = vsel %vm326_vm0, %v1755_v49, 0.0 }
 0x9c7   :  { %v1653_v16 = vsub.f32 %v4178_v18, %v1635_v55  ;;  %2889 = vrcp.f32 %v1707_v8  ;;  %v1994_v18 = vadd.f32 %v1993_v57, %v1992_v41 }
 0x9c8   :  { %v1769_v31 = vpack.c.bf16 %v1756_v54, %v1755_v49 }
 0x9c9   :  { %v4236_v59 = vpop.eup %2887  ;;  %v1683_v12 = vmul.f32 1.442695, %v1653_v16  ;;  %v1996_v14 = vadd.f32 %v1995_v42, %v1994_v18 }
 0x9ca   :  { %2646 = vmatmul.msk.bf16.gmra.mxu2 %vm326_vm0, %v1769_v31  ;;  %v1726_v10 = vsel %vm326_vm0, %v4236_v59, 0.0 }
 0x9cb   :  { %2891 = vpow2.f32 %v1683_v12  ;;  %1727 = vadd.xlane.f32.xlu2 %v1726_v10 }
 0x9cd   :  { %v2890_v37 = vpop.eup %2889 }
 0x9ce   :  { %v1757_v46 = vmul.f32 %v2890_v37, %v4181_v27  ;;  %v1638_v11 = vpop.xlane.xlu2 %1637  ;;  %v1710_v62 = vpop.xlane.xlu0 %1709  ;;  %v1999_v27 = vsel %vm326_vm0, %v4206_v38, 0.0  ;;  %v2721_v38 = vld [vmem:[#allocation9 + $0x18] sm:$0xff] }
 0x9cf   :  { %v1654_v45 = vsub.f32 %v4190_v40, %v1638_v11  ;;  %2893 = vrcp.f32 %v1710_v62  ;;  %v2002_v40 = vsel %vm326_vm0, %v1756_v54, 0.0  ;;  %v2001_v29 = vadd.f32 %v2000_v47, %v1999_v27  ;;  %1916 = vmatpush.bf16.msra.mxu3 %v2721_v38  ;;  %v2720_v54 = vld [vmem:[#allocation9 + $0x10] sm:$0xff] }
 0x9d0   :  { %v1997_v9 = vsel %vm326_vm0, %v1757_v46, 0.0 }
 0x9d1   :  { %v4247_v20 = vpop.eup %2891  ;;  %v1998_v43 = vadd.f32 %v1997_v9, %v1996_v14  ;;  %v1685_v25 = vmul.f32 1.442695, %v1654_v45  ;;  %v2003_v33 = vadd.f32 %v2002_v40, %v2001_v29 }
 0x9d2   :  { %v1729_v63 = vsel %vm326_vm0, %v4247_v20, 0.0 }
 0x9d3   :  { %2895 = vpow2.f32 %v1685_v25  ;;  %2668 = vmatmul.msk.f32.vlgmr.msrb.gmra.mxu0 %vm326_vm0, %v1998_v43  ;;  %1730 = vadd.xlane.f32.xlu0 %v1729_v63 }
 0x9d4   :  { %1917 = vmatpush.bf16.msra.mxu3 %v2720_v54 }
 0x9d5   :  { %v2894_v4 = vpop.eup %2893 }
 0x9d6   :  { %v1758_v23 = vmul.f32 %v2894_v4, %v4193_v52  ;;  %v1713_v52 = vpop.xlane.xlu0 %1712 }
 0x9d7   :  { %2897 = vrcp.f32 %v1713_v52 }
 0x9d8   :  { %v1770_v49 = vpack.c.bf16 %v1758_v23, %v1757_v46  ;;  %v2004_v19 = vsel %vm326_vm0, %v1758_v23, 0.0 }
 0x9d9   :  { %v4258_v55 = vpop.eup %2895  ;;  %v2005_v8 = vadd.f32 %v2004_v19, %v2003_v33 }
 0x9da   :  { %2647 = vmatmul.msk.bf16.gmra.mxu2 %vm326_vm0, %v1770_v49  ;;  %v1732_v16 = vsel %vm326_vm0, %v4258_v55, 0.0 }
 0x9db   :  { %1733 = vadd.xlane.f32.xlu1 %v1732_v16  ;;  %2669 = vmatmul.msk.f32.gmra.mxu0 %vm326_vm0, %v2005_v8 }
 0x9dd   :  { %v2898_v12 = vpop.eup %2897 }
 0x9de   :  { %v1759_v10 = vmul.f32 %v2898_v12, %v4199_v17 }
 0x9e0   :  { %v2006_v8 = vsel %vm326_vm0, %v1759_v10, 0.0 }
 0xa1e   :  { %v1716_v31 = vpop.xlane.xlu1 %1715 }
 0xa1f   :  { %2899 = vrcp.f32 %v1716_v31 }
 0xa25   :  { %v2900_v57 = vpop.eup %2899 }
 0xa26   :  { %v1760_v41 = vmul.f32 %v2900_v57, %v4210_v56  ;;  %v1719_v37 = vpop.xlane.xlu2 %1718 }
 0xa27   :  { %2901 = vrcp.f32 %v1719_v37 }
 0xa28   :  { %v1771_v42 = vpack.c.bf16 %v1760_v41, %v1759_v10  ;;  %v2013_v57 = vsel %vm326_vm0, %v1760_v41, 0.0 }
 0xa2a   :  { %2648 = vmatmul.msk.bf16.gmra.mxu2 %vm326_vm0, %v1771_v42 }
 0xa2d   :  { %v1810_v18 = vpop.f32.mrf.mxu2  ;;  %v2902_v11 = vpop.eup %2901 }
 0xa2e   :  { %v1722_v46 = vpop.xlane.xlu0 %1721  ;;  %v1761_v45 = vmul.f32 %v2902_v11, %v4216_v60  ;;  %v1850_v9 = vmul.f32 %v4009_v48, %v1810_v18 }
 0xa2f   :  { %2903 = vrcp.f32 %v1722_v46 }
 0xa30   :  { %v2007_v19 = vsel %vm326_vm0, %v1761_v45, 0.0 }
 0xa35   :  { %v2904_v62 = vpop.eup %2903  ;;  %v1812_v14 = vpop.f32.mrf.mxu2 }
 0xa36   :  { %v1762_v43 = vmul.f32 %v2904_v62, %v4223_v51  ;;  %v1851_v17 = vmul.f32 %v4006_v0, %v1812_v14  ;;  %v1725_v47 = vpop.xlane.xlu1 %1724 }
 0xa37   :  { %2905 = vrcp.f32 %v1725_v47 }
 0xa38   :  { %v1866_v56 = vpack.c.bf16 %v1851_v17, %v1850_v9  ;;  %v1772_v25 = vpack.c.bf16 %v1762_v43, %v1761_v45  ;;  %v2014_v12 = vsel %vm326_vm0, %v1762_v43, 0.0 }
 0xa39   :  { %v2015_v37 = vadd.f32 %v2014_v12, %v2013_v57 }
 0xa3a   :  { %2649 = vmatmul.msk.bf16.gmra.mxu2 %vm326_vm0, %v1772_v25  ;;  %2660 = vmatmul.msk.bf16.vlgmr.msra.gmra.mxu3 %vm326_vm0, %v1866_v56 }
 0xa3d   :  { %v1815_v63 = vpop.f32.mrf.mxu2  ;;  %v2906_v40 = vpop.eup %2905 }
 0xa3e   :  { %v1728_v27 = vpop.xlane.xlu2 %1727  ;;  %v1763_v48 = vmul.f32 %v2906_v40, %v4229_v53  ;;  %v1852_v51 = vmul.f32 %v4016_v1, %v1815_v63  ;;  %v2008_v1 = vadd.f32 %v2007_v19, %v2006_v8 }
 0xa3f   :  { %2907 = vrcp.f32 %v1728_v27 }
 0xa40   :  { %v2009_v53 = vsel %vm326_vm0, %v1763_v48, 0.0 }
 0xa41   :  { %v2010_v54 = vadd.f32 %v2009_v53, %v2008_v1 }
 0xa45   :  { %v2908_v4 = vpop.eup %2907  ;;  %v1817_v60 = vpop.f32.mrf.mxu2 }
 0xa46   :  { %v1764_v0 = vmul.f32 %v2908_v4, %v4236_v59  ;;  %v1853_v29 = vmul.f32 %v4013_v21, %v1817_v60  ;;  %v1731_v23 = vpop.xlane.xlu0 %1730 }
 0xa47   :  { %2909 = vrcp.f32 %v1731_v23 }
 0xa48   :  { %v1867_v33 = vpack.c.bf16 %v1853_v29, %v1852_v51  ;;  %v1773_v49 = vpack.c.bf16 %v1764_v0, %v1763_v48  ;;  %v2016_v10 = vsel %vm326_vm0, %v1764_v0, 0.0 }
 0xa49   :  { %v2017_v62 = vadd.f32 %v2016_v10, %v2015_v37 }
 0xa4a   :  { %2650 = vmatmul.msk.bf16.gmra.mxu2 %vm326_vm0, %v1773_v49  ;;  %2661 = vmatmul.msk.bf16.gmra.mxu3 %vm326_vm0, %v1867_v33 }
 0xa4d   :  { %v2910_v16 = vpop.eup %2909  ;;  %v1820_v38 = vpop.f32.mrf.mxu2 }
 0xa4e   :  { %v1765_v59 = vmul.f32 %v2910_v16, %v4247_v20  ;;  %v1734_v21 = vpop.xlane.xlu1 %1733  ;;  %v1854_v46 = vmul.f32 %v4023_v28, %v1820_v38 }
 0xa4f   :  { %2911 = vrcp.f32 %v1734_v21 }
 0xa50   :  { %v2011_v52 = vsel %vm326_vm0, %v1765_v59, 0.0 }
 0xa51   :  { %v2012_v31 = vadd.f32 %v2011_v52, %v2010_v54  ;;  %v2758_v52 = vld [vmem:[#allocation10 + $0x1] ss:$0 sm:$0xff] }
 0xa53   :  { %2670 = vmatmul.msk.f32.gmra.mxu0 %vm326_vm0, %v2012_v31 }
 0xa55   :  { %v2912_v42 = vpop.eup %2911  ;;  %v1822_v18 = vpop.f32.mrf.mxu2 }
 0xa56   :  { %v1766_v20 = vmul.f32 %v2912_v42, %v4258_v55  ;;  %v1855_v11 = vmul.f32 %v4020_v24, %v1822_v18 }
 0xa58   :  { %v1868_v14 = vpack.c.bf16 %v1855_v11, %v1854_v46  ;;  %v1774_v45 = vpack.c.bf16 %v1766_v20, %v1765_v59  ;;  %v2018_v9 = vsel %vm326_vm0, %v1766_v20, 0.0 }
 0xa59   :  { %v2019_v43 = vadd.f32 %v2018_v9, %v2017_v62 }
 0xa5a   :  { %2651 = vmatmul.msk.bf16.gmra.mxu2 %vm326_vm0, %v1774_v45  ;;  %2662 = vmatmul.msk.bf16.gmra.mxu3 %vm326_vm0, %v1868_v14 }
 0xa5b   :  { %2671 = vmatmul.msk.f32.gmra.mxu0 %vm326_vm0, %v2019_v43 }
 0xa5d   :  { %v1825_v41 = vpop.f32.mrf.mxu2 }
 0xa5e   :  { %v1856_v28 = vmul.f32 %v4030_v2, %v1825_v41 }
 0xa65   :  { %v1827_v17 = vpop.f32.mrf.mxu2 }
 0xa66   :  { %v1857_v55 = vmul.f32 %v4027_v30, %v1827_v17 }
 0xa68   :  { %v1869_v56 = vpack.c.bf16 %v1857_v55, %v1856_v28 }
 0xa6a   :  { %2663 = vmatmul.msk.bf16.gmra.mxu3 %vm326_vm0, %v1869_v56 }
 0xaad   :  { %v1830_v24 = vpop.f32.mrf.mxu2 }
 0xaae   :  { %v1858_v47 = vmul.f32 %v4037_v32, %v1830_v24 }
 0xab5   :  { %v1832_v25 = vpop.f32.mrf.mxu2 }
 0xab6   :  { %v1859_v63 = vmul.f32 %v4034_v39, %v1832_v25 }
 0xab8   :  { %v1870_v27 = vpack.c.bf16 %v1859_v63, %v1858_v47 }
 0xaba   :  { %2664 = vmatmul.msk.bf16.gmra.mxu3 %vm326_vm0, %v1870_v27 }
 0xabd   :  { %v1835_v40 = vpop.f32.mrf.mxu2  ;;  %v1919_v4 = vpop.f32.mrf.mxu3 }
 0xabe   :  { %v1860_v2 = vmul.f32 %v4044_v44, %v1835_v40  ;;  %v1959_v59 = vsel %vm326_vm0, %v1919_v4, 0.0 }
 0xac5   :  { %v1837_v60 = vpop.f32.mrf.mxu2  ;;  %v1921_v48 = vpop.f32.mrf.mxu3 }
 0xac6   :  { %v1861_v30 = vmul.f32 %v4041_v6, %v1837_v60 }
 0xac8   :  { %v1871_v51 = vpack.c.bf16 %v1861_v30, %v1860_v2 }
 0xaca   :  { %2665 = vmatmul.msk.bf16.gmra.mxu3 %vm326_vm0, %v1871_v51 }
 0xacd   :  { %v1840_v0 = vpop.f32.mrf.mxu2  ;;  %v1924_v29 = vpop.f32.mrf.mxu3 }
 0xace   :  { %v1862_v39 = vmul.f32 %v4051_v36, %v1840_v0  ;;  %v1960_v1 = vsel %vm326_vm0, %v1924_v29, 0.0 }
 0xad5   :  { %v1842_v23 = vpop.f32.mrf.mxu2  ;;  %v1926_v32 = vpop.f32.mrf.mxu3 }
 0xad6   :  { %v1863_v33 = vmul.f32 %v4048_v35, %v1842_v23  ;;  %v1961_v35 = vadd.f32 %v1960_v1, %v1959_v59 }
 0xad8   :  { %v1872_v49 = vpack.c.bf16 %v1863_v33, %v1862_v39 }
 0xada   :  { %2666 = vmatmul.msk.bf16.gmra.mxu3 %vm326_vm0, %v1872_v49 }
 0xadd   :  { %v1845_v19 = vpop.f32.mrf.mxu2  ;;  %v1929_v8 = vpop.f32.mrf.mxu3 }
 0xade   :  { %v1864_v6 = vmul.f32 %v4058_v5, %v1845_v19  ;;  %v1962_v36 = vsel %vm326_vm0, %v1929_v8, 0.0  ;;  %v1967_v5 = vsel %vm326_vm0, %v1926_v32, 0.0 }
 0xadf   :  { %v1963_v21 = vadd.f32 %v1962_v36, %v1961_v35 }
 0xae5   :  { %v1847_v53 = vpop.f32.mrf.mxu2  ;;  %v1931_v44 = vpop.f32.mrf.mxu3 }
 0xae6   :  { %v1865_v16 = vmul.f32 %v4055_v61, %v1847_v53  ;;  %v1966_v61 = vsel %vm326_vm0, %v1921_v48, 0.0  ;;  %v1969_v10 = vsel %vm326_vm0, %v1931_v44, 0.0 }
 0xae7   :  { %v1968_v42 = vadd.f32 %v1967_v5, %v1966_v61 }
 0xae8   :  { %v1873_v38 = vpack.c.bf16 %v1865_v16, %v1864_v6 }
 0xae9   :  { %v1970_v18 = vadd.f32 %v1969_v10, %v1968_v42 }
 0xaea   :  { %2667 = vmatmul.msk.bf16.gmra.mxu3 %vm326_vm0, %v1873_v38 }
 0xaed   :  { %v1934_v54 = vpop.f32.mrf.mxu3 }
 0xaee   :  { %v1964_v31 = vsel %vm326_vm0, %v1934_v54, 0.0 }
 0xaef   :  { %v1965_v12 = vadd.f32 %v1964_v31, %v1963_v21  ;;  %v2723_v31 = vld [vmem:[#allocation12 + $0x18] sm:$0xff] }
 0xaf0   :  { %2211 = vmatpush.bf16.msra.mxu0 %v2723_v31 }
 0xaf1   :  { %v1988_v57 = vadd.f32 %v2758_v52, %v1965_v12 }
 0xaf3   :  { %v2082_v37 = vadd.f32 %v1988_v57, %v3957_v3 }
 0xaf5   :  { %v1936_v46 = vpop.f32.mrf.mxu3  ;;  %v2086_v20 = vsel %vm326_vm0, %v2082_v37, 0.0 }
 0xaf6   :  { %v1971_v11 = vsel %vm326_vm0, %v1936_v46, 0.0  ;;  %2087 = vadd.xlane.f32.xlu2 %v2086_v20 }
 0xaf7   :  { %v1972_v62 = vadd.f32 %v1971_v11, %v1970_v18 }
 0xaf9   :  { %v1989_v14 = vadd.f32 %v2758_v52, %v1972_v62 }
 0xafb   :  { %v2083_v45 = vadd.f32 %v1989_v14, %v3959_v26 }
 0xafd   :  { %v2089_v9 = vsel %vm326_vm0, %v2083_v45, 0.0 }
 0xafe   :  { %2090 = vadd.xlane.f32.xlu0 %v2089_v9 }
 0xb3d   :  { %v1939_v43 = vpop.f32.mrf.mxu3 }
 0xb3e   :  { %v1973_v25 = vsel %vm326_vm0, %v1939_v43, 0.0 }
 0xb45   :  { %v1941_v41 = vpop.f32.mrf.mxu3 }
 0xb46   :  { %v1980_v23 = vsel %vm326_vm0, %v1941_v41, 0.0 }
 0xb4d   :  { %v1944_v17 = vpop.f32.mrf.mxu3 }
 0xb4e   :  { %v1974_v56 = vsel %vm326_vm0, %v1944_v17, 0.0 }
 0xb4f   :  { %v1975_v27 = vadd.f32 %v1974_v56, %v1973_v25 }
 0xb55   :  { %v1946_v28 = vpop.f32.mrf.mxu3 }
 0xb56   :  { %v1981_v30 = vsel %vm326_vm0, %v1946_v28, 0.0 }
 0xb57   :  { %v1982_v33 = vadd.f32 %v1981_v30, %v1980_v23 }
 0xb5d   :  { %v1949_v55 = vpop.f32.mrf.mxu3 }
 0xb5e   :  { %v1976_v47 = vsel %vm326_vm0, %v1949_v55, 0.0 }
 0xb5f   :  { %v1977_v40 = vadd.f32 %v1976_v47, %v1975_v27  ;;  %v2759_v47 = vld [vmem:[%s4565_s17 + $0x1] ss:$0 sm:$0xff] }
 0xb65   :  { %v1951_v3 = vpop.f32.mrf.mxu3 }
 0xb66   :  { %v1983_v32 = vsel %vm326_vm0, %v1951_v3, 0.0 }
 0xb67   :  { %v1984_v19 = vadd.f32 %v1983_v32, %v1982_v33  ;;  %v4368_v32 = vpop.f32.mrf.mxu0 }
 0xb69   :  { %v2088_v24 = vpop.xlane.xlu2 %2087 }
 0xb6a   :  { %v2098_v63 = vmul.f32 %v2088_v24, %v3821_v34 }
 0xb6c   :  { %v4326_v26 = vsub.f32 %v2082_v37, %v2098_v63 }
 0xb6d   :  { %v1954_v4 = vpop.f32.mrf.mxu3 }
 0xb6e   :  { %v1978_v60 = vsel %vm326_vm0, %v1954_v4, 0.0  ;;  %v2106_v48 = vmul.f32 %v4326_v26, %v4326_v26  ;;  %v2760_v4 = vld [vmem:[#allocation13 + $0x1] ss:$0 sm:$0xff] }
 0xb6f   :  { %v1979_v2 = vadd.f32 %v1978_v60, %v1977_v40 }
 0xb70   :  { %v2110_v51 = vsel %vm326_vm0, %v2106_v48, 0.0 }
 0xb71   :  { %v1990_v0 = vadd.f32 %v2758_v52, %v1979_v2  ;;  %2111 = vadd.xlane.f32.xlu0 %v2110_v51  ;;  %v2091_v29 = vpop.xlane.xlu0 %2090 }
 0xb72   :  { %v2099_v39 = vmul.f32 %v2091_v29, %v3821_v34 }
 0xb73   :  { %v2084_v49 = vadd.f32 %v1990_v0, %v3978_v22 }
 0xb74   :  { %v2103_v8 = vsub.f32 %v2083_v45, %v2099_v39  ;;  %v2727_v39 = vld [vmem:[%s4563_s15 + $0x38] sm:$0xff] }
 0xb75   :  { %v1956_v53 = vpop.f32.mrf.mxu3  ;;  %v2092_v44 = vsel %vm326_vm0, %v2084_v49, 0.0 }
 0xb76   :  { %v1985_v6 = vsel %vm326_vm0, %v1956_v53, 0.0  ;;  %2093 = vadd.xlane.f32.xlu1 %v2092_v44  ;;  %v2107_v38 = vmul.f32 %v2103_v8, %v2103_v8  ;;  %v2726_v53 = vld [vmem:[%s4563_s15 + $0x30] sm:$0xff] }
 0xb77   :  { %v1986_v16 = vadd.f32 %v1985_v6, %v1984_v19 }
 0xb78   :  { %v2113_v35 = vsel %vm326_vm0, %v2107_v38, 0.0 }
 0xb79   :  { %v1991_v1 = vadd.f32 %v2758_v52, %v1986_v16  ;;  %v2722_v52 = vld [vmem:[#allocation12 + $0x10] sm:$0xff]  ;;  %v4377_v16 = vpop.f32.mrf.mxu0 }
 0xb7a   :  { %2212 = vmatpush.bf16.msra.mxu0 %v2722_v52 }
 0xb7b   :  { %v2085_v59 = vadd.f32 %v1991_v1, %v3980_v58  ;;  %v2725_v1 = vld [vmem:[%s4563_s15 + $0x28] sm:$0xff] }
 0xb7d   :  { %v2095_v36 = vsel %vm326_vm0, %v2085_v59, 0.0 }
 0xb7e   :  { %2096 = vadd.xlane.f32.xlu2 %v2095_v36  ;;  %2114 = vadd.xlane.f32.xlu1 %v2113_v35  ;;  %v2724_v35 = vld [vmem:[%s4563_s15 + $0x20] sm:$0xff] }
 0xb7f   :  { %2265 = vmatpush.bf16.msrb.mxu0 %v2727_v39 }
 0xb81   :  { %v4385_v31 = vpop.f32.mrf.mxu0 }
 0xb83   :  { %2266 = vmatpush.bf16.msrb.mxu0 %v2726_v53 }
 0xb87   :  { %2267 = vmatpush.bf16.msrb.mxu0 %v2725_v1 }
 0xb8b   :  { %2268 = vmatpush.bf16.msrb.mxu0 %v2724_v35 }
 0xbe4   :  { %v2112_v22 = vpop.xlane.xlu0 %2111 }
 0xbe5   :  { %v2122_v21 = vmul.f32 %v2112_v22, %v3821_v34 }
 0xbe7   :  { %v2126_v54 = vadd.f32 1e-05, %v2122_v21 }
 0xbe9   :  { %2913 = vrsqrt.f32 %v2126_v54  ;;  %v2094_v12 = vpop.xlane.xlu1 %2093  ;;  %vm2136_vm13 = vweird.f32 %v2126_v54 }
 0xbea   :  { %v2100_v5 = vmul.f32 %v2094_v12, %v3821_v34 }
 0xbec   :  { %v4344_v57 = vsub.f32 %v2084_v49, %v2100_v5 }
 0xbee   :  { %v2108_v58 = vmul.f32 %v4344_v57, %v4344_v57 }
 0xbef   :  { %v2914_v61 = vpop.eup %2913 }
 0xbf0   :  { %v2131_v10 = vmul.f32 %v2914_v61, %v2126_v54  ;;  %v2116_v42 = vsel %vm326_vm0, %v2108_v58, 0.0  ;;  %vm2137_vm12 = vweird.f32 %v2914_v61 }
 0xbf1   :  { %2117 = vadd.xlane.f32.xlu2 %v2116_v42  ;;  %v2097_v37 = vpop.xlane.xlu2 %2096  ;;  %v2115_v18 = vpop.xlane.xlu1 %2114  ;;  %vm2138_vm15 = vmor %vm2136_vm13, %vm2137_vm12  ;;  %vm1013_vm12 = vcmask 392448  }
 0xbf2   :  { %v2132_v46 = vmul.f32 %v2914_v61, %v2131_v10  ;;  %v2101_v20 = vmul.f32 %v2097_v37, %v3821_v34  ;;  %v2123_v11 = vmul.f32 %v2115_v18, %v3821_v34  ;;  %v4389_v18 = vpop.f32.mrf.mxu0 }
 0xbf4   :  { %v4351_v62 = vsub.f32 %v2085_v59, %v2101_v20  ;;  %v2127_v14 = vadd.f32 1e-05, %v2123_v11  ;;  %v2133_v45 = vmul.f32 0.5, %v2132_v46 }
 0xbf6   :  { %2915 = vrsqrt.f32 %v2127_v14  ;;  %v2109_v9 = vmul.f32 %v4351_v62, %v4351_v62  ;;  %v2134_v41 = vsub.f32 1.5, %v2133_v45  ;;  %vm2146_vm2 = vweird.f32 %v2127_v14 }
 0xbf8   :  { %v2119_v43 = vsel %vm326_vm0, %v2109_v9, 0.0  ;;  %v2135_v28 = vmul.f32 %v2914_v61, %v2134_v41 }
 0xbf9   :  { %2120 = vadd.xlane.f32.xlu0 %v2119_v43 }
 0xbfa   :  { %v2139_v56 = vsel %vm2138_vm15, %v2914_v61, %v2135_v28 }
 0xbfb   :  { %v2170_v63 = vmul.f32 %v2139_v56, %v4326_v26 }
 0xbfc   :  { %v2916_v17 = vpop.eup %2915 }
 0xbfd   :  { %v2141_v55 = vmul.f32 %v2916_v17, %v2127_v14  ;;  %vm2147_vm1 = vweird.f32 %v2916_v17  ;;  %v2175_v60 = vmul.f32 %v2759_v47, %v2170_v63 }
 0xbfe   :  { %vm2148_vm3 = vmor %vm2146_vm2, %vm2147_vm1 }
 0xbff   :  { %v2142_v3 = vmul.f32 %v2916_v17, %v2141_v55  ;;  %v4360_v30 = vadd.f32 %v2760_v4, %v2175_v60 }
 0xc01   :  { %v2143_v24 = vmul.f32 0.5, %v2142_v3 }
 0xc03   :  { %v2144_v25 = vsub.f32 1.5, %v2143_v24 }
 0xc05   :  { %v2145_v27 = vmul.f32 %v2916_v17, %v2144_v25 }
 0xc07   :  { %v2149_v40 = vsel %vm2148_vm3, %v2916_v17, %v2145_v27  ;;  %v2762_v27 = vld [vmem:[%s4564_s16 + $0x1] ss:$0 sm:$0xff] }
 0xc08   :  { %v2171_v48 = vmul.f32 %v2149_v40, %v2103_v8 }
 0xc0a   :  { %v2176_v2 = vmul.f32 %v2759_v47, %v2171_v48 }
 0xc0c   :  { %v4362_v51 = vadd.f32 %v2760_v4, %v2176_v2 }
 0xc0e   :  { %v2184_v0 = vpack.c.bf16 %v4362_v51, %v4360_v30 }
 0xc10   :  { %2680 = vmatmul.msk.bf16.vlgmr.msra.gmra.mxu0 %vm326_vm0, %v2184_v0 }
 0xc64   :  { %v2118_v29 = vpop.xlane.xlu2 %2117 }
 0xc65   :  { %v2124_v26 = vmul.f32 %v2118_v29, %v3821_v34 }
 0xc67   :  { %v2128_v23 = vadd.f32 1e-05, %v2124_v26 }
 0xc69   :  { %2917 = vrsqrt.f32 %v2128_v23  ;;  %vm2156_vm5 = vweird.f32 %v2128_v23 }
 0xc6c   :  { %v2121_v33 = vpop.xlane.xlu0 %2120 }
 0xc6d   :  { %v2125_v49 = vmul.f32 %v2121_v33, %v3821_v34 }
 0xc6f   :  { %v2918_v19 = vpop.eup %2917  ;;  %v2129_v8 = vadd.f32 1e-05, %v2125_v49 }
 0xc70   :  { %v2151_v44 = vmul.f32 %v2918_v19, %v2128_v23  ;;  %vm2157_vm4 = vweird.f32 %v2918_v19 }
 0xc71   :  { %2919 = vrsqrt.f32 %v2129_v8  ;;  %vm2158_vm6 = vmor %vm2156_vm5, %vm2157_vm4  ;;  %vm2166_vm8 = vweird.f32 %v2129_v8 }
 0xc72   :  { %v2152_v6 = vmul.f32 %v2918_v19, %v2151_v44 }
 0xc74   :  { %v2153_v38 = vmul.f32 0.5, %v2152_v6 }
 0xc76   :  { %v2154_v59 = vsub.f32 1.5, %v2153_v38 }
 0xc77   :  { %v2920_v36 = vpop.eup %2919 }
 0xc78   :  { %v2155_v22 = vmul.f32 %v2918_v19, %v2154_v59  ;;  %v2161_v21 = vmul.f32 %v2920_v36, %v2129_v8  ;;  %vm2167_vm7 = vweird.f32 %v2920_v36 }
 0xc79   :  { %vm2168_vm9 = vmor %vm2166_vm8, %vm2167_vm7 }
 0xc7a   :  { %v2162_v54 = vmul.f32 %v2920_v36, %v2161_v21  ;;  %v2159_v12 = vsel %vm2158_vm6, %v2918_v19, %v2155_v22 }
 0xc7b   :  { %v2172_v58 = vmul.f32 %v2159_v12, %v4344_v57  ;;  %v2761_v57 = vld [vmem:[%s4562_s14 + $0x1] ss:$0 sm:$0xff]  ;;  %s3244_s14 = smov 32  }
 0xc7c   :  { %v2163_v5 = vmul.f32 0.5, %v2162_v54 }
 0xc7d   :  { %v2177_v37 = vmul.f32 %v2759_v47, %v2172_v58 }
 0xc7e   :  { %v2164_v52 = vsub.f32 1.5, %v2163_v5 }
 0xc7f   :  { %v2182_v20 = vadd.f32 %v2760_v4, %v2177_v37 }
 0xc80   :  { %v2165_v61 = vmul.f32 %v2920_v36, %v2164_v52 }
 0xc82   :  { %v2169_v10 = vsel %vm2168_vm9, %v2920_v36, %v2165_v61 }
 0xc83   :  { %v2173_v42 = vmul.f32 %v2169_v10, %v4351_v62 }
 0xc85   :  { %v2178_v46 = vmul.f32 %v2759_v47, %v2173_v42 }
 0xc87   :  { %v2183_v11 = vadd.f32 %v2760_v4, %v2178_v46 }
 0xc89   :  { %v2185_v14 = vpack.c.bf16 %v2183_v11, %v2182_v20 }
 0xc8b   :  { %2681 = vmatmul.msk.bf16.gmra.mxu0 %vm326_vm0, %v2185_v14 }
 0xc8d   :  { %v2214_v45 = vpop.f32.mrf.mxu0 }
 0xc8e   :  { %v2215_v9 = vadd.f32 %v2761_v57, %v2214_v45 }
 0xc90   :  { %v2224_v17 = vmax.f32 %v2215_v9, 0.0 }
 0xc95   :  { %v2216_v43 = vpop.f32.mrf.mxu0 }
 0xc96   :  { %v2217_v41 = vadd.f32 %v2761_v57, %v2216_v43 }
 0xc98   :  { %v2225_v28 = vmax.f32 %v2217_v41, 0.0 }
 0xc9a   :  { %v2228_v62 = vpack.c.bf16 %v2225_v28, %v2224_v17 }
 0xc9c   :  { %2698 = vmatmul.msk.bf16.vlgmr.msrb.gmra.mxu0 %vm1198_vm14, %v2228_v62 }
 0xd08   :  { %v2219_v55 = vpop.f32.mrf.mxu0 }
 0xd09   :  { %v2220_v3 = vadd.f32 %v2761_v57, %v2219_v55 }
 0xd0b   :  { %v2226_v25 = vmax.f32 %v2220_v3, 0.0 }
 0xd10   :  { %v2221_v56 = vpop.f32.mrf.mxu0 }
 0xd11   :  { %v2222_v24 = vadd.f32 %v2761_v57, %v2221_v56  ;;  %v4429_v56 = vld [vmem:[%s4567_s19 + $0x1] ss:$0 sm:$0xff] }
 0xd13   :  { %v2227_v47 = vmax.f32 %v2222_v24, 0.0 }
 0xd15   :  { %v2229_v63 = vpack.c.bf16 %v2227_v47, %v2226_v25 }
 0xd17   :  { %2699 = vmatmul.msk.bf16.gmra.mxu0 %vm1198_vm14, %v2229_v63  ;;  %v4434_v63 = vld [vmem:[%s4568_s20 + $0x1] ss:$0 sm:$0xff] }
 0xd19   :  { %v2270_v40 = vpop.f32.mrf.mxu0 }
 0xd1a   :  { %v2271_v4 = vadd.f32 %v2762_v27, %v2270_v40 }
 0xd1c   :  { %v2280_v60 = vadd.f32 %v2271_v4, %v4360_v30 }
 0xd1e   :  { %v2284_v48 = vsel %vm326_vm0, %v2280_v60, 0.0 }
 0xd1f   :  { %2285 = vadd.xlane.f32.xlu1 %v2284_v48 }
 0xd21   :  { %v2272_v2 = vpop.f32.mrf.mxu0 }
 0xd22   :  { %v2273_v0 = vadd.f32 %v2762_v27, %v2272_v2 }
 0xd24   :  { %v2281_v29 = vadd.f32 %v2273_v0, %v4362_v51 }
 0xd26   :  { %v2287_v26 = vsel %vm326_vm0, %v2281_v29, 0.0 }
 0xd27   :  { %2288 = vadd.xlane.f32.xlu2 %v2287_v26 }
 0xd92   :  { %v2286_v23 = vpop.xlane.xlu1 %2285 }
 0xd93   :  { %v2296_v39 = vmul.f32 %v2286_v23, %v3821_v34 }
 0xd94   :  { %v2275_v33 = vpop.f32.mrf.mxu0 }
 0xd95   :  { %v2300_v49 = vsub.f32 %v2280_v60, %v2296_v39  ;;  %v2276_v19 = vadd.f32 %v2762_v27, %v2275_v33 }
 0xd97   :  { %v2304_v8 = vmul.f32 %v2300_v49, %v2300_v49  ;;  %v2282_v53 = vadd.f32 %v2276_v19, %v2182_v20 }
 0xd99   :  { %v2308_v30 = vsel %vm326_vm0, %v2304_v8, 0.0  ;;  %v2290_v44 = vsel %vm326_vm0, %v2282_v53, 0.0 }
 0xd9a   :  { %v2289_v6 = vpop.xlane.xlu2 %2288  ;;  %2309 = vadd.xlane.f32.xlu2 %v2308_v30  ;;  %2291 = vadd.xlane.f32.xlu0 %v2290_v44 }
 0xd9b   :  { %v2297_v51 = vmul.f32 %v2289_v6, %v3821_v34 }
 0xd9c   :  { %v2277_v1 = vpop.f32.mrf.mxu0 }
 0xd9d   :  { %v2301_v38 = vsub.f32 %v2281_v29, %v2297_v51  ;;  %v2278_v59 = vadd.f32 %v2762_v27, %v2277_v1 }
 0xd9f   :  { %v2283_v36 = vadd.f32 %v2278_v59, %v2183_v11  ;;  %v2305_v35 = vmul.f32 %v2301_v38, %v2301_v38 }
 0xda1   :  { %v2293_v22 = vsel %vm326_vm0, %v2283_v36, 0.0  ;;  %v2311_v21 = vsel %vm326_vm0, %v2305_v35, 0.0 }
 0xda2   :  { %2294 = vadd.xlane.f32.xlu1 %v2293_v22  ;;  %2312 = vadd.xlane.f32.xlu0 %v2311_v21 }
 0xdb6   :  { %1003 = vrot.lane.b32.xlu0 %v3884_v15, %s3244_s14 }
 0xe0d   :  { %v2310_v54 = vpop.xlane.xlu2 %2309  ;;  %v2292_v12 = vpop.xlane.xlu0 %2291 }
 0xe0e   :  { %v2320_v5 = vmul.f32 %v2310_v54, %v3821_v34  ;;  %v2298_v52 = vmul.f32 %v2292_v12, %v3821_v34 }
 0xe10   :  { %v2324_v58 = vadd.f32 1e-05, %v2320_v5  ;;  %v4414_v61 = vsub.f32 %v2282_v53, %v2298_v52 }
 0xe12   :  { %2921 = vrsqrt.f32 %v2324_v58  ;;  %v2306_v10 = vmul.f32 %v4414_v61, %v4414_v61  ;;  %vm2334_vm10 = vweird.f32 %v2324_v58 }
 0xe14   :  { %v2314_v42 = vsel %vm326_vm0, %v2306_v10, 0.0 }
 0xe15   :  { %v2295_v37 = vpop.xlane.xlu1 %2294  ;;  %2315 = vadd.xlane.f32.xlu1 %v2314_v42  ;;  %v2313_v46 = vpop.xlane.xlu0 %2312 }
 0xe16   :  { %v2299_v15 = vmul.f32 %v2295_v37, %v3821_v34  ;;  %v2321_v20 = vmul.f32 %v2313_v46, %v3821_v34 }
 0xe18   :  { %v2922_v11 = vpop.eup %2921  ;;  %v4421_v14 = vsub.f32 %v2283_v36, %v2299_v15  ;;  %v2325_v45 = vadd.f32 1e-05, %v2321_v20 }
 0xe19   :  { %v2329_v57 = vmul.f32 %v2922_v11, %v2324_v58  ;;  %vm2335_vm14 = vweird.f32 %v2922_v11 }
 0xe1a   :  { %2923 = vrsqrt.f32 %v2325_v45  ;;  %v2307_v9 = vmul.f32 %v4421_v14, %v4421_v14  ;;  %vm2336_vm11 = vmor %vm2334_vm10, %vm2335_vm14  ;;  %vm2344_vm15 = vweird.f32 %v2325_v45  ;;  %vm2077_vm10 = vcmask 523648  }
 0xe1b   :  { %v2330_v43 = vmul.f32 %v2922_v11, %v2329_v57 }
 0xe1c   :  { %v2317_v41 = vsel %vm326_vm0, %v2307_v9, 0.0 }
 0xe1d   :  { %v2331_v17 = vmul.f32 0.5, %v2330_v43  ;;  %2318 = vadd.xlane.f32.xlu2 %v2317_v41 }
 0xe1f   :  { %v2332_v28 = vsub.f32 1.5, %v2331_v17 }
 0xe20   :  { %v2924_v62 = vpop.eup %2923 }
 0xe21   :  { %v2333_v55 = vmul.f32 %v2922_v11, %v2332_v28  ;;  %v2339_v3 = vmul.f32 %v2924_v62, %v2325_v45  ;;  %vm2345_vm13 = vweird.f32 %v2924_v62 }
 0xe22   :  { %vm2346_vm1 = vmor %vm2344_vm15, %vm2345_vm13 }
 0xe23   :  { %v2340_v24 = vmul.f32 %v2924_v62, %v2339_v3  ;;  %v2337_v25 = vsel %vm2336_vm11, %v2922_v11, %v2333_v55 }
 0xe24   :  { %v2368_v47 = vmul.f32 %v2337_v25, %v2300_v49 }
 0xe25   :  { %v2341_v27 = vmul.f32 0.5, %v2340_v24 }
 0xe26   :  { %v2373_v40 = vmul.f32 %v4429_v56, %v2368_v47 }
 0xe27   :  { %v2342_v4 = vsub.f32 1.5, %v2341_v27 }
 0xe28   :  { %v1004_v60 = vpop.permute.xlu0 %1003  ;;  %v2378_v48 = vadd.f32 %v4434_v63, %v2373_v40 }
 0xe29   :  { %v2343_v2 = vmul.f32 %v2924_v62, %v2342_v4  ;;  %1015 = vst.msk [vmem:[%s4571_s23 + $0x8] sm:$0xff] %vm1013_vm12, %v1004_v60 }
 0xe2a   :  { %v2384_v0 = vsel %vm326_vm0, %v2378_v48, 0.0 }
 0xe2b   :  { %2385 = vadd.xlane.f32.xlu0 %v2384_v0  ;;  %v2347_v29 = vsel %vm2346_vm1, %v2924_v62, %v2343_v2 }
 0xe2c   :  { %v2369_v26 = vmul.f32 %v2347_v29, %v2301_v38 }
 0xe2e   :  { %v2374_v23 = vmul.f32 %v4429_v56, %v2369_v26 }
 0xe30   :  { %v2379_v39 = vadd.f32 %v4434_v63, %v2374_v23 }
 0xe32   :  { %v2387_v33 = vsel %vm326_vm0, %v2379_v39, 0.0 }
 0xe33   :  { %2388 = vadd.xlane.f32.xlu1 %v2387_v33  ;;  %v4495_v33 = vld [vmem:[#allocation15] ss:$0 sm:$0xff] }
 0xe35   :  { %1001 = vrot.lane.b32.xlu2 %v3876_v13, %s3244_s14 }
 0xe4c   :  { %1005 = vrot.lane.b32.xlu1 %v3893_v50, %s3244_s14 }
 0xe88   :  { %v2316_v49 = vpop.xlane.xlu1 %2315 }
 0xe89   :  { %v2322_v19 = vmul.f32 %v2316_v49, %v3821_v34 }
 0xe8b   :  { %v2326_v8 = vadd.f32 1e-05, %v2322_v19  ;;  %v4497_v19 = vld [vmem:[#allocation16] ss:$0 sm:$0xff] }
 0xe8d   :  { %2925 = vrsqrt.f32 %v2326_v8  ;;  %vm2354_vm3 = vweird.f32 %v2326_v8 }
 0xe90   :  { %v2319_v53 = vpop.xlane.xlu2 %2318 }
 0xe91   :  { %v2323_v30 = vmul.f32 %v2319_v53, %v3821_v34 }
 0xe93   :  { %v2926_v44 = vpop.eup %2925  ;;  %v2327_v6 = vadd.f32 1e-05, %v2323_v30 }
 0xe94   :  { %v2349_v51 = vmul.f32 %v2926_v44, %v2326_v8  ;;  %vm2355_vm2 = vweird.f32 %v2926_v44 }
 0xe95   :  { %2927 = vrsqrt.f32 %v2327_v6  ;;  %vm2356_vm4 = vmor %vm2354_vm3, %vm2355_vm2  ;;  %vm2364_vm6 = vweird.f32 %v2327_v6 }
 0xe96   :  { %v2350_v1 = vmul.f32 %v2926_v44, %v2349_v51 }
 0xe98   :  { %v2351_v38 = vmul.f32 0.5, %v2350_v1  ;;  %v1002_v59 = vpop.permute.xlu2 %1001 }
 0xe99   :  { %1014 = vst.msk [vmem:[%s4571_s23] sm:$0xff] %vm1013_vm12, %v1002_v59 }
 0xe9a   :  { %v2352_v13 = vsub.f32 1.5, %v2351_v38 }
 0xe9b   :  { %v2928_v50 = vpop.eup %2927 }
 0xe9c   :  { %v2353_v36 = vmul.f32 %v2926_v44, %v2352_v13  ;;  %v2359_v35 = vmul.f32 %v2928_v50, %v2327_v6  ;;  %vm2365_vm5 = vweird.f32 %v2928_v50 }
 0xe9d   :  { %vm2366_vm7 = vmor %vm2364_vm6, %vm2365_vm5 }
 0xe9e   :  { %v2360_v22 = vmul.f32 %v2928_v50, %v2359_v35  ;;  %v2386_v21 = vpop.xlane.xlu0 %2385  ;;  %v2357_v54 = vsel %vm2356_vm4, %v2926_v44, %v2353_v36 }
 0xe9f   :  { %v2396_v12 = vmul.f32 %v2386_v21, %v3821_v34  ;;  %v2370_v5 = vmul.f32 %v2357_v54, %v4414_v61 }
 0xea0   :  { %v2361_v52 = vmul.f32 0.5, %v2360_v22 }
 0xea1   :  { %v2400_v58 = vsub.f32 %v2378_v48, %v2396_v12  ;;  %v2375_v10 = vmul.f32 %v4429_v56, %v2370_v5 }
 0xea2   :  { %v2362_v42 = vsub.f32 1.5, %v2361_v52 }
 0xea3   :  { %v2380_v37 = vadd.f32 %v4434_v63, %v2375_v10  ;;  %v2404_v46 = vmul.f32 %v2400_v58, %v2400_v58 }
 0xea4   :  { %v2363_v15 = vmul.f32 %v2928_v50, %v2362_v42 }
 0xea5   :  { %v2390_v20 = vsel %vm326_vm0, %v2380_v37, 0.0  ;;  %v2408_v11 = vsel %vm326_vm0, %v2404_v46, 0.0 }
 0xea6   :  { %2391 = vadd.xlane.f32.xlu2 %v2390_v20  ;;  %2409 = vadd.xlane.f32.xlu1 %v2408_v11  ;;  %v2367_v45 = vsel %vm2366_vm7, %v2928_v50, %v2363_v15  ;;  %v2389_v41 = vpop.xlane.xlu1 %2388 }
 0xea7   :  { %v2371_v61 = vmul.f32 %v2367_v45, %v4421_v14  ;;  %v2397_v14 = vmul.f32 %v2389_v41, %v3821_v34 }
 0xea9   :  { %v2376_v57 = vmul.f32 %v4429_v56, %v2371_v61  ;;  %v2401_v28 = vsub.f32 %v2379_v39, %v2397_v14 }
 0xeab   :  { %v2381_v9 = vadd.f32 %v4434_v63, %v2376_v57  ;;  %v2405_v62 = vmul.f32 %v2401_v28, %v2401_v28 }
 0xead   :  { %v2393_v43 = vsel %vm326_vm0, %v2381_v9, 0.0  ;;  %v2411_v55 = vsel %vm326_vm0, %v2405_v62, 0.0 }
 0xeae   :  { %2394 = vadd.xlane.f32.xlu0 %v2393_v43 }
 0xebe   :  { %1007 = vrot.lane.b32.xlu2 %v3896_v7, %s3244_s14  ;;  %v1006_v17 = vpop.permute.xlu1 %1005 }
 0xebf   :  { %1016 = vst.msk [vmem:[%s4571_s23 + $0x10] sm:$0xff] %vm1013_vm12, %v1006_v17 }
 0xec2   :  { %2065 = vrot.lane.b32.xlu0 %v4368_v32, %s3245_s9 }
 0xee7   :  { %2412 = vadd.xlane.f32.xlu2 %v2411_v55 }
 0xeff   :  { %2067 = vrot.lane.b32.xlu2 %v4377_v16, %s3245_s9 }
 0xf19   :  { %v2392_v7 = vpop.xlane.xlu2 %2391  ;;  %v2410_v3 = vpop.xlane.xlu1 %2409 }
 0xf1a   :  { %v2398_v56 = vmul.f32 %v2392_v7, %v3821_v34  ;;  %v2420_v24 = vmul.f32 %v2410_v3, %v3821_v34 }
 0xf1c   :  { %v4480_v25 = vsub.f32 %v2380_v37, %v2398_v56  ;;  %v2424_v47 = vadd.f32 1e-05, %v2420_v24 }
 0xf1e   :  { %2929 = vrsqrt.f32 %v2424_v47  ;;  %v2406_v32 = vmul.f32 %v4480_v25, %v4480_v25  ;;  %vm2434_vm9 = vweird.f32 %v2424_v47 }
 0xf20   :  { %v2414_v63 = vsel %vm326_vm0, %v2406_v32, 0.0 }
 0xf21   :  { %2415 = vadd.xlane.f32.xlu0 %v2414_v63  ;;  %v1008_v27 = vpop.permute.xlu2 %1007  ;;  %v2395_v40 = vpop.xlane.xlu0 %2394 }
 0xf22   :  { %1017 = vst.msk [vmem:[%s4571_s23 + $0x18] sm:$0xff] %vm1013_vm12, %v1008_v27  ;;  %v2399_v16 = vmul.f32 %v2395_v40, %v3821_v34 }
 0xf24   :  { %v2930_v4 = vpop.eup %2929  ;;  %v4490_v60 = vsub.f32 %v2381_v9, %v2399_v16 }
 0xf25   :  { %v2429_v48 = vmul.f32 %v2930_v4, %v2424_v47  ;;  %vm2435_vm8 = vweird.f32 %v2930_v4 }
 0xf26   :  { %v2407_v2 = vmul.f32 %v4490_v60, %v4490_v60  ;;  %vm2436_vm14 = vmor %vm2434_vm9, %vm2435_vm8 }
 0xf27   :  { %v2430_v0 = vmul.f32 %v2930_v4, %v2429_v48 }
 0xf28   :  { %v2417_v29 = vsel %vm326_vm0, %v2407_v2, 0.0 }
 0xf29   :  { %v2431_v26 = vmul.f32 0.5, %v2430_v0  ;;  %2418 = vadd.xlane.f32.xlu1 %v2417_v29 }
 0xf2b   :  { %v2432_v23 = vsub.f32 1.5, %v2431_v26 }
 0xf2d   :  { %v2433_v39 = vmul.f32 %v2930_v4, %v2432_v23 }
 0xf2f   :  { %v2437_v49 = vsel %vm2436_vm14, %v2930_v4, %v2433_v39 }
 0xf30   :  { %v2468_v8 = vmul.f32 %v2437_v49, %v2400_v58 }
 0xf32   :  { %v2475_v53 = vmul.f32 %v4495_v33, %v2468_v8 }
 0xf34   :  { %v2482_v30 = vadd.f32 %v4497_v19, %v2475_v53  ;;  %v2066_v44 = vpop.permute.xlu0 %2065 }
 0xf35   :  { %2078 = vst.msk [vmem:[%s4571_s23] sm:$0xff] %vm2077_vm10, %v2066_v44  ;;  %2071 = vrot.lane.b32.xlu0 %v4389_v18, %s3245_s9 }
 0xf36   :  { %2486 = vst.msk [vmem:[%s4571_s23] sm:$0xff] %vm326_vm0, %v2482_v30 }
 0xf42   :  { %2069 = vrot.lane.b32.xlu1 %v4385_v31, %s3245_s9 }
 0xf5a   :  { %v2413_v6 = vpop.xlane.xlu2 %2412 }
 0xf5b   :  { %v2421_v51 = vmul.f32 %v2413_v6, %v3821_v34 }
 0xf5d   :  { %v2425_v1 = vadd.f32 1e-05, %v2421_v51 }
 0xf5f   :  { %2931 = vrsqrt.f32 %v2425_v1  ;;  %vm2444_vm12 = vweird.f32 %v2425_v1 }
 0xf62   :  { %v2068_v38 = vpop.permute.xlu2 %2067 }
 0xf63   :  { %2079 = vst.msk [vmem:[%s4571_s23 + $0x8] sm:$0xff] %vm2077_vm10, %v2068_v38 }
 0xf65   :  { %v2932_v18 = vpop.eup %2931 }
 0xf66   :  { %v2439_v59 = vmul.f32 %v2932_v18, %v2425_v1  ;;  %vm2445_vm11 = vweird.f32 %v2932_v18 }
 0xf67   :  { %vm2446_vm13 = vmor %vm2444_vm12, %vm2445_vm11 }
 0xf68   :  { %v2440_v13 = vmul.f32 %v2932_v18, %v2439_v59 }
 0xf6a   :  { %v2441_v50 = vmul.f32 0.5, %v2440_v13 }
 0xf6c   :  { %v2442_v36 = vsub.f32 1.5, %v2441_v50 }
 0xf6e   :  { %v2443_v35 = vmul.f32 %v2932_v18, %v2442_v36 }
 0xf70   :  { %v2447_v31 = vsel %vm2446_vm13, %v2932_v18, %v2443_v35 }
 0xf71   :  { %v2469_v22 = vmul.f32 %v2447_v31, %v2401_v28 }
 0xf73   :  { %v2476_v21 = vmul.f32 %v4495_v33, %v2469_v22 }
 0xf75   :  { %v2483_v54 = vadd.f32 %v4497_v19, %v2476_v21 }
 0xf77   :  { %2487 = vst.msk [vmem:[%s4571_s23 + $0x8] sm:$0xff] %vm326_vm0, %v2483_v54 }
 0xf94   :  { %v2416_v12 = vpop.xlane.xlu0 %2415 }
 0xf95   :  { %v2422_v5 = vmul.f32 %v2416_v12, %v3821_v34 }
 0xf97   :  { %v2426_v52 = vadd.f32 1e-05, %v2422_v5 }
 0xf99   :  { %2933 = vrsqrt.f32 %v2426_v52  ;;  %vm2454_vm1 = vweird.f32 %v2426_v52 }
 0xf9c   :  { %v2419_v58 = vpop.xlane.xlu1 %2418 }
 0xf9d   :  { %v2423_v10 = vmul.f32 %v2419_v58, %v3821_v34 }
 0xf9f   :  { %v2934_v42 = vpop.eup %2933  ;;  %v2427_v37 = vadd.f32 1e-05, %v2423_v10 }
 0xfa0   :  { %v2449_v46 = vmul.f32 %v2934_v42, %v2426_v52  ;;  %vm2455_vm15 = vweird.f32 %v2934_v42 }
 0xfa1   :  { %2935 = vrsqrt.f32 %v2427_v37  ;;  %vm2456_vm2 = vmor %vm2454_vm1, %vm2455_vm15  ;;  %vm2464_vm4 = vweird.f32 %v2427_v37 }
 0xfa2   :  { %v2450_v15 = vmul.f32 %v2934_v42, %v2449_v46 }
 0xfa4   :  { %v2451_v20 = vmul.f32 0.5, %v2450_v15 }
 0xfa6   :  { %v2452_v11 = vsub.f32 1.5, %v2451_v20 }
 0xfa7   :  { %v2936_v45 = vpop.eup %2935  ;;  %v2072_v61 = vpop.permute.xlu0 %2071 }
 0xfa8   :  { %v2453_v57 = vmul.f32 %v2934_v42, %v2452_v11  ;;  %v2459_v9 = vmul.f32 %v2936_v45, %v2427_v37  ;;  %2081 = vst.msk [vmem:[%s4571_s23 + $0x18] sm:$0xff] %vm2077_vm10, %v2072_v61  ;;  %vm2465_vm3 = vweird.f32 %v2936_v45 }
 0xfa9   :  { %vm2466_vm5 = vmor %vm2464_vm4, %vm2465_vm3 }
 0xfaa   :  { %v2457_v34 = vsel %vm2456_vm2, %v2934_v42, %v2453_v57  ;;  %v2460_v43 = vmul.f32 %v2936_v45, %v2459_v9 }
 0xfab   :  { %v2470_v41 = vmul.f32 %v2457_v34, %v4480_v25 }
 0xfac   :  { %v2461_v17 = vmul.f32 0.5, %v2460_v43 }
 0xfad   :  { %v2477_v28 = vmul.f32 %v4495_v33, %v2470_v41 }
 0xfae   :  { %v2462_v14 = vsub.f32 1.5, %v2461_v17 }
 0xfaf   :  { %v2484_v3 = vadd.f32 %v4497_v19, %v2477_v28 }
 0xfb0   :  { %v2463_v62 = vmul.f32 %v2936_v45, %v2462_v14 }
 0xfb2   :  { %v2467_v55 = vsel %vm2466_vm5, %v2936_v45, %v2463_v62 }
 0xfb3   :  { %v2471_v7 = vmul.f32 %v2467_v55, %v4490_v60 }
 0xfb4   :  { %v2070_v56 = vpop.permute.xlu1 %2069 }
 0xfb5   :  { %v2478_v24 = vmul.f32 %v4495_v33, %v2471_v7  ;;  %2080 = vst.msk [vmem:[%s4571_s23 + $0x10] sm:$0xff] %vm2077_vm10, %v2070_v56 }
 0xfb6   :  { %2488 = vst.msk [vmem:[%s4571_s23 + $0x10] sm:$0xff] %vm326_vm0, %v2484_v3 }
 0xfb7   :  { %v2485_v25 = vadd.f32 %v4497_v19, %v2478_v24 }
 0xfb9   :  { %2489 = vst.msk [vmem:[%s4571_s23 + $0x18] sm:$0xff] %vm326_vm0, %v2485_v25 }
 0xfba   :  { %2494 = vsyncpa [#allocation3], 1 }
 0xfbb   :  { %2495 = vsyncpa [#allocation5], 1 }
 0xfbc   :  { %2496 = vsyncpa [#allocation8], 1 }
 0xfbd   :  { %2497 = vsyncpa [#allocation11], 1 }
 0xfbe   :  { %2498 = vsyncpa [#allocation14], 1 }
 0xfbf   :  { %2499 = vsyncpa [#allocation17], 1 }

</bundles_post_ra>
